<compile_context>
chip_gen: v5e
topology: v5e:2x2
jax: 0.10.0
libtpu: 0.0.40
codegen_flags: <defaults>
</compile_context>

<pallas_src>
import numpy as np
import jax
import jax.numpy as jnp
from jax import lax
from jax.experimental import pallas as pl
from jax.experimental.pallas import tpu as pltpu

# ---------------- small, module-consistent config ----------------
BATCH = 2
IN_C = 3                  # input_channels
IMG = 16                  # image_size (small)
HID0, HID1 = 16, 32       # hidden_dims_enc = [16, 32]
EMB_D = 32                # embedding_dim
NUM_EMB = 64              # num_embeddings
DEC0 = 32                 # hidden_dims_dec truncated to [32] (module logic)
COMMITMENT_COST = 0.25
LEAKY_SLOPE = 0.01
BN_EPS = 1e-5

# derived layout constants
H_ENC1 = IMG // 2                    # 8   spatial after enc0
H_VQ = IMG // 4                      # 4   latent spatial grid
R_ENC0 = BATCH * H_ENC1 * H_ENC1     # 128 rows of the enc0 output
R_VQ = BATCH * H_VQ * H_VQ           # 32  rows at the latent grid
R_DEC0 = R_ENC0                      # 128 rows of the dec0 output
K0_PAD = 32                          # enc0 im2col K (27) padded for sublane alignment
K_PAD = 128                          # codebook size padded to a full lane width
PAD_ROWS = 16                        # zero rows appended to h4 for shifted loads


# ---------------- the single fused Pallas kernel ----------------
def _vqvae_kernel(cols0_ref, w0_ref, gb0_ref,
                  g1_ref, w1_ref, gb1_ref,
                  w2_ref, b2_ref,
                  et_ref, epad_ref, e2_ref,
                  gd0_hbm, wd0_ref, gb3_ref,
                  wdec_ref, bd1_ref,
                  recon_ref, zezq_ref, loss_ref,
                  gd0_vmem, gd0_sem, h4pad_ref):
    f32 = jnp.float32

    # Kick off the decoder gather-matrix DMA immediately; it overlaps the whole
    # encoder + VQ compute and is only waited on right before dec0.
    gd0_copy = pltpu.make_async_copy(gd0_hbm, gd0_vmem, gd0_sem)
    gd0_copy.start()

    def dot(a, b):
        return jnp.dot(a, b, preferred_element_type=f32)

    def bn_lrelu(y, gb_ref):
        # training-mode BatchNorm (biased batch variance over all rows) + LeakyReLU
        gamma, beta = gb_ref[0:1, :], gb_ref[1:2, :]
        mean = jnp.mean(y, axis=0, keepdims=True)
        var = jnp.mean(y * y, axis=0, keepdims=True) - mean * mean
        scale = gamma * lax.rsqrt(var + BN_EPS)          # (1, C): EUP rsqrt, no divide
        shift = beta - mean * scale
        z = y * scale + shift
        return jnp.where(z >= 0, z, LEAKY_SLOPE * z)

    # ---------------- encoder ----------------
    # enc0: stride-2 conv == (wrapper im2col of the input) @ W ; then BN + LeakyReLU
    h1 = bn_lrelu(dot(cols0_ref[...], w0_ref[...]), gb0_ref)           # (128, 16)

    # enc1: one tall gather matmul, then 9 independent per-tap weight matmuls
    q1 = dot(g1_ref[...], h1)                                          # (288, 16)
    acc = jnp.zeros((R_VQ, HID1), f32)
    for t in range(9):
        acc = acc + dot(q1[t * R_VQ:(t + 1) * R_VQ, :], w1_ref[t])
    h2 = bn_lrelu(acc, gb1_ref)                                        # (32, 32)

    # enc2: 1x1 conv (bias kept: no BN follows)
    z_e = dot(h2, w2_ref[...]) + b2_ref[...]                           # (32, 32)
    zezq_ref[pl.ds(0, R_VQ), :] = z_e

    # ---------------- vector quantizer (distances + argmin + lookup + loss) ----------------
    x2 = jnp.sum(z_e * z_e, axis=1, keepdims=True)                     # (32, 1)
    d = x2 + e2_ref[...] - 2.0 * dot(z_e, et_ref[...])                 # (32, 128) lane-dense
    dmin = jnp.min(d, axis=1, keepdims=True)
    kiota = lax.broadcasted_iota(jnp.int32, d.shape, 1)
    cand = jnp.where(d <= dmin, kiota, K_PAD)                          # torch-style first-min
    idx = jnp.min(cand, axis=1, keepdims=True)
    onehot = (kiota == idx).astype(f32)                                # (32, 128)
    z_q = dot(onehot, epad_ref[...])                                   # (32, 32)
    zezq_ref[pl.ds(R_VQ, R_VQ), :] = z_q

    diff = z_q - z_e
    sse = jnp.sum(jnp.sum(diff * diff, axis=1, keepdims=True), axis=0, keepdims=True)
    # q_latent_loss + commitment_cost * e_latent_loss (same forward value)
    loss_ref[...] = ((1.0 + COMMITMENT_COST) / float(R_VQ * EMB_D)) * sse

    # ---------------- decoder ----------------
    # dec0: conv-transpose (4x4 -> 8x8): one tall gather matmul + 9 per-tap weight matmuls.
    gd0_copy.wait()                                                    # overlapped DMA done
    qd = dot(gd0_vmem[...], z_q)                                       # (1152, 32)
    acc2 = jnp.zeros((R_DEC0, DEC0), f32)
    for t in range(9):
        acc2 = acc2 + dot(qd[t * R_DEC0:(t + 1) * R_DEC0, :], wd0_ref[t])
    h4 = bn_lrelu(acc2, gb3_ref)                                       # (128, 32), rows=(n,y,x)

    # dec1: conv-transpose (8x8 -> 16x16) via the sub-pixel 4-phase decomposition with a
    # lane-dense (128, 12) epilogue.  Shifted neighbours (x+1 / y+1 / x+1,y+1) are read as
    # sublane-offset loads of a zero-padded VMEM copy of h4 (no shift matmuls, no sdec
    # constant) and masked at the image boundary.
    h4pad_ref[pl.ds(0, R_DEC0), :] = h4
    h4pad_ref[pl.ds(R_DEC0, PAD_ROWS), :] = jnp.zeros((PAD_ROWS, DEC0), f32)

    riota = lax.broadcasted_iota(jnp.int32, (R_DEC0, 1), 0)
    # row = n*64 + y*8 + x  ->  x==7 iff (row & 7)==7 ;  y==7 iff (row & 63) >= 56
    not_x_last = (riota & (H_ENC1 - 1)) != (H_ENC1 - 1)
    not_y_last = (riota & (H_ENC1 * H_ENC1 - 1)) < H_ENC1 * (H_ENC1 - 1)

    y = dot(h4, wdec_ref[0]) + bd1_ref[...]                            # (128, 12)
    h4x = jnp.where(not_x_last, h4pad_ref[pl.ds(1, R_DEC0), :], 0.0)
    y = y + dot(h4x, wdec_ref[1])
    h4y = jnp.where(not_y_last, h4pad_ref[pl.ds(H_ENC1, R_DEC0), :], 0.0)
    y = y + dot(h4y, wdec_ref[2])
    h4xy = jnp.where(not_x_last & not_y_last,
                     h4pad_ref[pl.ds(H_ENC1 + 1, R_DEC0), :], 0.0)
    y = y + dot(h4xy, wdec_ref[3])
    recon_ref[...] = jnp.tanh(y)                                       # one tanh, one store


# ---------------- structural 0/1 matrices (built once, with numpy) ----------------
def _conv_gather_mats(n, h, w, ho, wo, stride, pad, k=3):
    g = np.zeros((k * k, n * ho * wo, n * h * w), np.float32)
    for b in range(n):
        for yo in range(ho):
            for xo in range(wo):
                ro = (b * ho + yo) * wo + xo
                for dy in range(k):
                    for dx in range(k):
                        y, x = yo * stride + dy - pad, xo * stride + dx - pad
                        if 0 <= y < h and 0 <= x < w:
                            g[dy * k + dx, ro, (b * h + y) * w + x] = 1.0
    return g


def _deconv_gather_mats(n, h, w, ho, wo, stride, pad, k=3):
    g = np.zeros((k * k, n * ho * wo, n * h * w), np.float32)
    for b in range(n):
        for yi in range(h):
            for xi in range(w):
                ri = (b * h + yi) * w + xi
                for dy in range(k):
                    for dx in range(k):
                        yo, xo = yi * stride - pad + dy, xi * stride - pad + dx
                        if 0 <= yo < ho and 0 <= xo < wo:
                            g[dy * k + dx, (b * ho + yo) * wo + xo, ri] = 1.0
    return g


# ---------------- model ----------------
def init_params(key):
    ks = jax.random.split(key, 17)

    def w_init(k, shape, fan_in):
        return jax.random.normal(k, shape, jnp.float32) * (1.0 / jnp.sqrt(float(fan_in)))

    def v_init(k, n, scale=0.1):
        return scale * jax.random.normal(k, (n,), jnp.float32)

    return {
        "enc0": dict(w=w_init(ks[0], (HID0, IN_C, 3, 3), IN_C * 9),
                     b=v_init(ks[1], HID0),            # unused by kernel (cancelled by BN)
                     gamma=1.0 + v_init(ks[2], HID0),
                     beta=v_init(ks[3], HID0)),
        "enc1": dict(w=w_init(ks[4], (HID1, HID0, 3, 3), HID0 * 9),
                     b=v_init(ks[5], HID1),            # unused by kernel (cancelled by BN)
                     gamma=1.0 + v_init(ks[6], HID1),
                     beta=v_init(ks[7], HID1)),
        "enc2": dict(w=w_init(ks[8], (EMB_D, HID1, 1, 1), HID1),
                     b=v_init(ks[9], EMB_D)),
        "codebook": jax.random.uniform(ks[10], (NUM_EMB, EMB_D), jnp.float32,
                                       -1.0 / NUM_EMB, 1.0 / NUM_EMB),
        "dec0": dict(w=w_init(ks[11], (EMB_D, DEC0, 3, 3), EMB_D * 9),
                     b=v_init(ks[12], DEC0),           # unused by kernel (cancelled by BN)
                     gamma=1.0 + v_init(ks[13], DEC0),
                     beta=v_init(ks[14], DEC0)),
        "dec1": dict(w=w_init(ks[15], (DEC0, IN_C, 3, 3), DEC0 * 9),
                     b=v_init(ks[16], IN_C)),
    }


def prepare_inputs(params):
    """One-time repacking of parameters + structural constants into kernel layouts."""
    f32 = jnp.float32
    # enc0
    w0 = jnp.transpose(params["enc0"]["w"], (2, 3, 1, 0)).reshape(9 * IN_C, HID0)
    w0 = jnp.pad(w0, ((0, K0_PAD - 9 * IN_C), (0, 0)))                 # (32, 16)
    gb0 = jnp.stack([params["enc0"]["gamma"], params["enc0"]["beta"]])
    # enc1
    w1 = jnp.transpose(params["enc1"]["w"], (2, 3, 1, 0)).reshape(9, HID0, HID1)
    gb1 = jnp.stack([params["enc1"]["gamma"], params["enc1"]["beta"]])
    # enc2
    w2 = params["enc2"]["w"][:, :, 0, 0].T                             # (32, 32)
    b2 = params["enc2"]["b"].reshape(1, EMB_D)
    # codebook (pre-transposed / K-padded to a full lane width)
    emb = params["codebook"]
    et = jnp.pad(emb.T, ((0, 0), (0, K_PAD - NUM_EMB)))                # (32, 128)
    epad = jnp.pad(emb, ((0, K_PAD - NUM_EMB), (0, 0)))                # (128, 32)
    e2 = jnp.concatenate([jnp.sum(emb * emb, axis=1),
                          jnp.full((K_PAD - NUM_EMB,), 1e30, f32)]).reshape(1, K_PAD)
    # dec0
    wd0 = jnp.transpose(params["dec0"]["w"], (2, 3, 0, 1)).reshape(9, EMB_D, DEC0)
    gb3 = jnp.stack([params["dec0"]["gamma"], params["dec0"]["beta"]])
    # dec1: 4 stacked phase weight matrices, columns = (phase, out_channel) = 12 lanes
    w5 = params["dec1"]["w"]                                           # (in=32, out=3, kh, kw)
    tap = lambda kh, kw: w5[:, :, kh, kw]                              # (32, 3)
    z3 = jnp.zeros((DEC0, IN_C), f32)
    wA = jnp.concatenate([tap(1, 1), tap(1, 2), tap(2, 1), tap(2, 2)], axis=1)
    wB = jnp.concatenate([z3,        tap(1, 0), z3,        tap(2, 0)], axis=1)
    wC = jnp.concatenate([z3,        z3,        tap(0, 1), tap(0, 2)], axis=1)
    wD = jnp.concatenate([z3,        z3,        z3,        tap(0, 0)], axis=1)
    wdec = jnp.stack([wA, wB, wC, wD])                                 # (4, 32, 12)
    bd1 = jnp.tile(params["dec1"]["b"], 4).reshape(1, 4 * IN_C)        # (1, 12)
    # structural 0/1 gather matrices (stacked tall -> one matmul each in-kernel)
    g1cat = jnp.asarray(
        _conv_gather_mats(BATCH, H_ENC1, H_ENC1, H_VQ, H_VQ, 2, 1).reshape(9 * R_VQ, R_ENC0))
    gd0cat = jnp.asarray(
        _deconv_gather_mats(BATCH, H_VQ, H_VQ, H_ENC1, H_ENC1, 2, 1).reshape(9 * R_DEC0, R_VQ))
    return dict(w0=w0, gb0=gb0, g1cat=g1cat, w1=w1, gb1=gb1, w2=w2, b2=b2,
                et=et, epad=epad, e2=e2, gd0cat=gd0cat, wd0=wd0, gb3=gb3,
                wdec=wdec, bd1=bd1)


@jax.jit
def vqvae_forward(packed, x_nchw):
    f32 = jnp.float32
    x = jnp.transpose(x_nchw, (0, 2, 3, 1)).astype(f32)                 # NHWC (2,16,16,3)

    # ---- wrapper-side im2col of the input only (column order (kh, kw, c)) ----
    xp = jnp.pad(x, ((0, 0), (1, 1), (1, 1), (0, 0)))
    taps = [xp[:, dy:dy + IMG:2, dx:dx + IMG:2, :] for dy in range(3) for dx in range(3)]
    cols0 = jnp.concatenate(taps, axis=-1).reshape(R_ENC0, 9 * IN_C)
    cols0 = jnp.pad(cols0, ((0, 0), (0, K0_PAD - 9 * IN_C)))            # (128, 32)

    inputs = (cols0, packed["w0"], packed["gb0"],
              packed["g1cat"], packed["w1"], packed["gb1"],
              packed["w2"], packed["b2"],
              packed["et"], packed["epad"], packed["e2"],
              packed["gd0cat"], packed["wd0"], packed["gb3"],
              packed["wdec"], packed["bd1"])

    def full_spec(shape):
        nd = len(shape)
        return pl.BlockSpec(shape, lambda i, _nd=nd: (0,) * _nd)

    in_specs = [full_spec(a.shape) for a in inputs]
    in_specs[11] = pl.BlockSpec(memory_space=pl.ANY)   # gd0cat: manual, overlapped DMA

    out_shapes = (jax.ShapeDtypeStruct((R_DEC0, 4 * IN_C), f32),  # recon, 4 phases packed in lanes
                  jax.ShapeDtypeStruct((2 * R_VQ, EMB_D), f32),   # z_e (rows 0:32) | z_q (rows 32:64)
                  jax.ShapeDtypeStruct((1, 1), f32))              # vq loss

    recon_pack, zezq, loss = pl.pallas_call(
        _vqvae_kernel,
        out_shape=out_shapes,
        grid=(1,),
        in_specs=in_specs,
        out_specs=tuple(full_spec(s.shape) for s in out_shapes),
        scratch_shapes=[pltpu.VMEM((9 * R_DEC0, R_VQ), f32),      # gd0cat landing buffer
                        pltpu.SemaphoreType.DMA,                  # its DMA semaphore
                        pltpu.VMEM((R_DEC0 + PAD_ROWS, DEC0), f32)],  # zero-padded h4
        compiler_params=pltpu.CompilerParams(dimension_semantics=("arbitrary",)),
    )(*inputs)

    # ---- thin layout plumbing back to the PyTorch NCHW convention ----
    z_e = zezq[:R_VQ].reshape(BATCH, H_VQ, H_VQ, EMB_D)
    z_q = zezq[R_VQ:].reshape(BATCH, H_VQ, H_VQ, EMB_D)
    rp = recon_pack.reshape(BATCH, H_ENC1, H_ENC1, 2, 2, IN_C)     # (n, y, x, py, px, c)
    recon = jnp.transpose(rp, (0, 1, 3, 2, 4, 5)).reshape(BATCH, IMG, IMG, IN_C)

    to_nchw = lambda a: jnp.transpose(a, (0, 3, 1, 2))
    # TODO(synk): straight-through / detach gradient wiring is not implemented (forward only).
    return to_nchw(recon), loss[0, 0], to_nchw(z_e), to_nchw(z_q)


# ---------------- pure-JAX reference (for validation only) ----------------
@jax.jit
def reference_forward(params, x_nchw):
    dn = ("NHWC", "HWIO", "NHWC")
    hp = lax.Precision.HIGHEST

    def conv(h, w, b, stride, pad):
        wj = jnp.transpose(w, (2, 3, 1, 0))
        y = lax.conv_general_dilated(h, wj, (stride, stride), [(pad, pad)] * 2,
                                     dimension_numbers=dn, precision=hp)
        return y + b.reshape(1, 1, 1, -1)

    def convT(h, w, b):  # stride 2, pad 1, output_padding 1
        wj = jnp.transpose(w[:, :, ::-1, ::-1], (2, 3, 0, 1))
        y = lax.conv_general_dilated(h, wj, (1, 1), [(1, 2), (1, 2)],
                                     lhs_dilation=(2, 2), dimension_numbers=dn, precision=hp)
        return y + b.reshape(1, 1, 1, -1)

    def bn_lrelu(h, gamma, beta):
        mean = jnp.mean(h, axis=(0, 1, 2), keepdims=True)
        var = jnp.mean(h * h, axis=(0, 1, 2), keepdims=True) - mean * mean
        z = (h - mean) / jnp.sqrt(var + BN_EPS) * gamma + beta
        return jnp.where(z >= 0, z, LEAKY_SLOPE * z)

    x = jnp.transpose(x_nchw, (0, 2, 3, 1)).astype(jnp.float32)
    h = bn_lrelu(conv(x, params["enc0"]["w"], params["enc0"]["b"], 2, 1),
                 params["enc0"]["gamma"], params["enc0"]["beta"])
    h = bn_lrelu(conv(h, params["enc1"]["w"], params["enc1"]["b"], 2, 1),
                 params["enc1"]["gamma"], params["enc1"]["beta"])
    z_e = conv(h, params["enc2"]["w"], params["enc2"]["b"], 1, 0)

    emb = params["codebook"]
    zf = z_e.reshape(-1, EMB_D)
    d = (jnp.sum(zf ** 2, 1, keepdims=True) + jnp.sum(emb ** 2, 1)[None, :]
         - 2.0 * jnp.dot(zf, emb.T, precision=hp))
    qf = emb[jnp.argmin(d, axis=1)]
    loss = (1.0 + COMMITMENT_COST) * jnp.mean((qf - zf) ** 2)
    z_q = qf.reshape(z_e.shape)

    h = bn_lrelu(convT(z_q, params["dec0"]["w"], params["dec0"]["b"]),
                 params["dec0"]["gamma"], params["dec0"]["beta"])
    recon = jnp.tanh(convT(h, params["dec1"]["w"], params["dec1"]["b"]))
    to_nchw = lambda a: jnp.transpose(a, (0, 3, 1, 2))
    return to_nchw(recon), loss, to_nchw(z_e), to_nchw(z_q)


if __name__ == "__main__":
    key = jax.random.PRNGKey(0)
    pkey, xkey = jax.random.split(key)
    params = init_params(pkey)
    packed = prepare_inputs(params)          # one-time weight / constant repacking
    x = jax.random.normal(xkey, (BATCH, IN_C, IMG, IMG), jnp.float32)

    recon, vq_loss, z_e, z_q = vqvae_forward(packed, x)
    jax.block_until_ready((recon, vq_loss, z_e, z_q))

    assert recon.shape == (BATCH, IN_C, IMG, IMG)
    assert z_e.shape == (BATCH, EMB_D, H_VQ, H_VQ)
    assert z_q.shape == z_e.shape
    assert bool(jnp.isfinite(vq_loss))

    # validate against a pure-JAX reference with identical forward semantics
    r_recon, r_loss, r_ze, r_zq = reference_forward(params, x)
    np.testing.assert_allclose(np.asarray(z_e), np.asarray(r_ze), rtol=2e-3, atol=2e-3)
    np.testing.assert_allclose(np.asarray(z_q), np.asarray(r_zq), rtol=2e-3, atol=2e-3)
    np.testing.assert_allclose(np.asarray(recon), np.asarray(r_recon), rtol=2e-3, atol=2e-3)
    np.testing.assert_allclose(float(vq_loss), float(r_loss), rtol=2e-3, atol=2e-3)

    print("KERNEL_OK")
</pallas_src>

<mosaic_0001>
module attributes {stable_mosaic.version = 11 : i64} {
  func.func @_vqvae_kernel(%arg0: i32, %arg1: memref<128x32xf32, #tpu.memory_space<vmem>>, %arg2: memref<32x16xf32, #tpu.memory_space<vmem>>, %arg3: memref<2x16xf32, #tpu.memory_space<vmem>>, %arg4: memref<288x128xf32, #tpu.memory_space<vmem>>, %arg5: memref<9x16x32xf32, #tpu.memory_space<vmem>>, %arg6: memref<2x32xf32, #tpu.memory_space<vmem>>, %arg7: memref<32x32xf32, #tpu.memory_space<vmem>>, %arg8: memref<1x32xf32, #tpu.memory_space<vmem>>, %arg9: memref<32x128xf32, #tpu.memory_space<vmem>>, %arg10: memref<128x32xf32, #tpu.memory_space<vmem>>, %arg11: memref<1x128xf32, #tpu.memory_space<vmem>>, %arg12: memref<1152x32xf32, #tpu.memory_space<any>>, %arg13: memref<9x32x32xf32, #tpu.memory_space<vmem>>, %arg14: memref<2x32xf32, #tpu.memory_space<vmem>>, %arg15: memref<4x32x12xf32, #tpu.memory_space<vmem>>, %arg16: memref<1x12xf32, #tpu.memory_space<vmem>>, %arg17: memref<128x12xf32, #tpu.memory_space<vmem>>, %arg18: memref<64x32xf32, #tpu.memory_space<vmem>>, %arg19: memref<1x1xf32, #tpu.memory_space<vmem>>, %arg20: memref<1152x32xf32, #tpu.memory_space<vmem>>, %arg21: memref<!tpu.dma_semaphore, #tpu.memory_space<semaphore_mem>>, %arg22: memref<144x32xf32, #tpu.memory_space<vmem>>) attributes {dimension_semantics = [#tpu.dimension_semantics<arbitrary>], iteration_bounds = array<i64: 1>, scalar_prefetch = 0 : i64, scratch_operands = 3 : i64, tpu.core_type = #tpu.core_type<tc>, window_params = [{pipeline_mode = #tpu.pipeline_mode<synchronous>, transform_indices = @transform_0, window_bounds = array<i64: 128, 32>}, {pipeline_mode = #tpu.pipeline_mode<synchronous>, transform_indices = @transform_1, window_bounds = array<i64: 32, 16>}, {pipeline_mode = #tpu.pipeline_mode<synchronous>, transform_indices = @transform_2, window_bounds = array<i64: 2, 16>}, {pipeline_mode = #tpu.pipeline_mode<synchronous>, transform_indices = @transform_3, window_bounds = array<i64: 288, 128>}, {pipeline_mode = #tpu.pipeline_mode<synchronous>, transform_indices = @transform_4, window_bounds = array<i64: 9, 16, 32>}, {pipeline_mode = #tpu.pipeline_mode<synchronous>, transform_indices = @transform_5, window_bounds = array<i64: 2, 32>}, {pipeline_mode = #tpu.pipeline_mode<synchronous>, transform_indices = @transform_6, window_bounds = array<i64: 32, 32>}, {pipeline_mode = #tpu.pipeline_mode<synchronous>, transform_indices = @transform_7, window_bounds = array<i64: 1, 32>}, {pipeline_mode = #tpu.pipeline_mode<synchronous>, transform_indices = @transform_8, window_bounds = array<i64: 32, 128>}, {pipeline_mode = #tpu.pipeline_mode<synchronous>, transform_indices = @transform_9, window_bounds = array<i64: 128, 32>}, {pipeline_mode = #tpu.pipeline_mode<synchronous>, transform_indices = @transform_10, window_bounds = array<i64: 1, 128>}, {}, {pipeline_mode = #tpu.pipeline_mode<synchronous>, transform_indices = @transform_12, window_bounds = array<i64: 9, 32, 32>}, {pipeline_mode = #tpu.pipeline_mode<synchronous>, transform_indices = @transform_13, window_bounds = array<i64: 2, 32>}, {pipeline_mode = #tpu.pipeline_mode<synchronous>, transform_indices = @transform_14, window_bounds = array<i64: 4, 32, 12>}, {pipeline_mode = #tpu.pipeline_mode<synchronous>, transform_indices = @transform_15, window_bounds = array<i64: 1, 12>}, {pipeline_mode = #tpu.pipeline_mode<synchronous>, transform_indices = @transform_16, window_bounds = array<i64: 128, 12>}, {pipeline_mode = #tpu.pipeline_mode<synchronous>, transform_indices = @transform_17, window_bounds = array<i64: 64, 32>}, {pipeline_mode = #tpu.pipeline_mode<synchronous>, transform_indices = @transform_18, window_bounds = array<i64: 1, 1>}]} {
    tpu.enqueue_dma source(%arg12 : memref<1152x32xf32, #tpu.memory_space<any>>) target(%arg20 : memref<1152x32xf32, #tpu.memory_space<vmem>>) target_semaphore(%arg21 : memref<!tpu.dma_semaphore, #tpu.memory_space<semaphore_mem>>)
    %c0 = arith.constant 0 : index
    %c0_0 = arith.constant 0 : index
    %0 = vector.load %arg1[%c0, %c0_0] : memref<128x32xf32, #tpu.memory_space<vmem>>, vector<128x32xf32>
    %c0_1 = arith.constant 0 : index
    %c0_2 = arith.constant 0 : index
    %1 = vector.load %arg2[%c0_1, %c0_2] : memref<32x16xf32, #tpu.memory_space<vmem>>, vector<32x16xf32>
    %cst = arith.constant dense<0.000000e+00> : vector<128x16xf32>
    %2 = tpu.matmul %0, %1, %cst {dimension_numbers = #tpu.dot_dimension_numbers<[1], [0], [0], [1], [0, 0, 1, 1], [], []>} : vector<128x32xf32>, vector<32x16xf32>, vector<128x16xf32> -> vector<128x16xf32>
    %c0_3 = arith.constant 0 : index
    %c0_4 = arith.constant 0 : index
    %3 = vector.load %arg3[%c0_3, %c0_4] : memref<2x16xf32, #tpu.memory_space<vmem>>, vector<1x16xf32>
    %c1 = arith.constant 1 : index
    %c0_5 = arith.constant 0 : index
    %4 = vector.load %arg3[%c1, %c0_5] : memref<2x16xf32, #tpu.memory_space<vmem>>, vector<1x16xf32>
    %cst_6 = arith.constant dense<0.000000e+00> : vector<16xf32>
    %5 = vector.multi_reduction <add>, %2, %cst_6 [0] : vector<128x16xf32> to vector<16xf32>
    %6 = vector.shape_cast %5 : vector<16xf32> to vector<1x16xf32>
    %cst_7 = arith.constant 1.280000e+02 : f32
    %7 = vector.broadcast %cst_7 : f32 to vector<1x16xf32>
    %8 = arith.divf %6, %7 : vector<1x16xf32>
    %9 = arith.mulf %2, %2 : vector<128x16xf32>
    %cst_8 = arith.constant dense<0.000000e+00> : vector<16xf32>
    %10 = vector.multi_reduction <add>, %9, %cst_8 [0] : vector<128x16xf32> to vector<16xf32>
    %11 = vector.shape_cast %10 : vector<16xf32> to vector<1x16xf32>
    %cst_9 = arith.constant 1.280000e+02 : f32
    %12 = vector.broadcast %cst_9 : f32 to vector<1x16xf32>
    %13 = arith.divf %11, %12 : vector<1x16xf32>
    %14 = arith.mulf %8, %8 : vector<1x16xf32>
    %15 = arith.subf %13, %14 : vector<1x16xf32>
    %cst_10 = arith.constant 9.99999974E-6 : f32
    %16 = vector.broadcast %cst_10 : f32 to vector<1x16xf32>
    %17 = arith.addf %15, %16 : vector<1x16xf32>
    %18 = math.rsqrt %17 : vector<1x16xf32>
    %19 = arith.mulf %3, %18 : vector<1x16xf32>
    %20 = arith.mulf %8, %19 : vector<1x16xf32>
    %21 = arith.subf %4, %20 : vector<1x16xf32>
    %22 = vector.broadcast %19 : vector<1x16xf32> to vector<128x16xf32>
    %23 = arith.mulf %2, %22 : vector<128x16xf32>
    %24 = vector.broadcast %21 : vector<1x16xf32> to vector<128x16xf32>
    %25 = arith.addf %23, %24 : vector<128x16xf32>
    %cst_11 = arith.constant 0.000000e+00 : f32
    %26 = vector.broadcast %cst_11 : f32 to vector<128x16xf32>
    %27 = arith.cmpf oge, %25, %26 : vector<128x16xf32>
    %cst_12 = arith.constant 0.00999999977 : f32
    %28 = vector.broadcast %cst_12 : f32 to vector<128x16xf32>
    %29 = arith.mulf %28, %25 : vector<128x16xf32>
    %30 = arith.select %27, %25, %29 : vector<128x16xi1>, vector<128x16xf32>
    %c0_13 = arith.constant 0 : index
    %c0_14 = arith.constant 0 : index
    %31 = vector.load %arg4[%c0_13, %c0_14] : memref<288x128xf32, #tpu.memory_space<vmem>>, vector<288x128xf32>
    %cst_15 = arith.constant dense<0.000000e+00> : vector<288x16xf32>
    %32 = tpu.matmul %31, %30, %cst_15 {dimension_numbers = #tpu.dot_dimension_numbers<[1], [0], [0], [1], [0, 0, 1, 1], [], []>} : vector<288x128xf32>, vector<128x16xf32>, vector<288x16xf32> -> vector<288x16xf32>
    %cst_16 = arith.constant 0.000000e+00 : f32
    %33 = vector.broadcast %cst_16 : f32 to vector<32x32xf32>
    %34 = vector.extract_strided_slice %32 {offsets = [0, 0], sizes = [32, 16], strides = [1, 1]} : vector<288x16xf32> to vector<32x16xf32>
    %c0_17 = arith.constant 0 : index
    %c0_18 = arith.constant 0 : index
    %c0_19 = arith.constant 0 : index
    %35 = vector.load %arg5[%c0_17, %c0_18, %c0_19] : memref<9x16x32xf32, #tpu.memory_space<vmem>>, vector<1x16x32xf32>
    %36 = vector.shape_cast %35 : vector<1x16x32xf32> to vector<16x32xf32>
    %cst_20 = arith.constant dense<0.000000e+00> : vector<32x32xf32>
    %37 = tpu.matmul %34, %36, %cst_20 {dimension_numbers = #tpu.dot_dimension_numbers<[1], [0], [0], [1], [0, 0, 1, 1], [], []>} : vector<32x16xf32>, vector<16x32xf32>, vector<32x32xf32> -> vector<32x32xf32>
    %38 = arith.addf %33, %37 : vector<32x32xf32>
    %39 = vector.extract_strided_slice %32 {offsets = [32, 0], sizes = [32, 16], strides = [1, 1]} : vector<288x16xf32> to vector<32x16xf32>
    %c1_21 = arith.constant 1 : index
    %c0_22 = arith.constant 0 : index
    %c0_23 = arith.constant 0 : index
    %40 = vector.load %arg5[%c1_21, %c0_22, %c0_23] : memref<9x16x32xf32, #tpu.memory_space<vmem>>, vector<1x16x32xf32>
    %41 = vector.shape_cast %40 : vector<1x16x32xf32> to vector<16x32xf32>
    %cst_24 = arith.constant dense<0.000000e+00> : vector<32x32xf32>
    %42 = tpu.matmul %39, %41, %cst_24 {dimension_numbers = #tpu.dot_dimension_numbers<[1], [0], [0], [1], [0, 0, 1, 1], [], []>} : vector<32x16xf32>, vector<16x32xf32>, vector<32x32xf32> -> vector<32x32xf32>
    %43 = arith.addf %38, %42 : vector<32x32xf32>
    %44 = vector.extract_strided_slice %32 {offsets = [64, 0], sizes = [32, 16], strides = [1, 1]} : vector<288x16xf32> to vector<32x16xf32>
    %c2 = arith.constant 2 : index
    %c0_25 = arith.constant 0 : index
    %c0_26 = arith.constant 0 : index
    %45 = vector.load %arg5[%c2, %c0_25, %c0_26] : memref<9x16x32xf32, #tpu.memory_space<vmem>>, vector<1x16x32xf32>
    %46 = vector.shape_cast %45 : vector<1x16x32xf32> to vector<16x32xf32>
    %cst_27 = arith.constant dense<0.000000e+00> : vector<32x32xf32>
    %47 = tpu.matmul %44, %46, %cst_27 {dimension_numbers = #tpu.dot_dimension_numbers<[1], [0], [0], [1], [0, 0, 1, 1], [], []>} : vector<32x16xf32>, vector<16x32xf32>, vector<32x32xf32> -> vector<32x32xf32>
    %48 = arith.addf %43, %47 : vector<32x32xf32>
    %49 = vector.extract_strided_slice %32 {offsets = [96, 0], sizes = [32, 16], strides = [1, 1]} : vector<288x16xf32> to vector<32x16xf32>
    %c3 = arith.constant 3 : index
    %c0_28 = arith.constant 0 : index
    %c0_29 = arith.constant 0 : index
    %50 = vector.load %arg5[%c3, %c0_28, %c0_29] : memref<9x16x32xf32, #tpu.memory_space<vmem>>, vector<1x16x32xf32>
    %51 = vector.shape_cast %50 : vector<1x16x32xf32> to vector<16x32xf32>
    %cst_30 = arith.constant dense<0.000000e+00> : vector<32x32xf32>
    %52 = tpu.matmul %49, %51, %cst_30 {dimension_numbers = #tpu.dot_dimension_numbers<[1], [0], [0], [1], [0, 0, 1, 1], [], []>} : vector<32x16xf32>, vector<16x32xf32>, vector<32x32xf32> -> vector<32x32xf32>
    %53 = arith.addf %48, %52 : vector<32x32xf32>
    %54 = vector.extract_strided_slice %32 {offsets = [128, 0], sizes = [32, 16], strides = [1, 1]} : vector<288x16xf32> to vector<32x16xf32>
    %c4 = arith.constant 4 : index
    %c0_31 = arith.constant 0 : index
    %c0_32 = arith.constant 0 : index
    %55 = vector.load %arg5[%c4, %c0_31, %c0_32] : memref<9x16x32xf32, #tpu.memory_space<vmem>>, vector<1x16x32xf32>
    %56 = vector.shape_cast %55 : vector<1x16x32xf32> to vector<16x32xf32>
    %cst_33 = arith.constant dense<0.000000e+00> : vector<32x32xf32>
    %57 = tpu.matmul %54, %56, %cst_33 {dimension_numbers = #tpu.dot_dimension_numbers<[1], [0], [0], [1], [0, 0, 1, 1], [], []>} : vector<32x16xf32>, vector<16x32xf32>, vector<32x32xf32> -> vector<32x32xf32>
    %58 = arith.addf %53, %57 : vector<32x32xf32>
    %59 = vector.extract_strided_slice %32 {offsets = [160, 0], sizes = [32, 16], strides = [1, 1]} : vector<288x16xf32> to vector<32x16xf32>
    %c5 = arith.constant 5 : index
    %c0_34 = arith.constant 0 : index
    %c0_35 = arith.constant 0 : index
    %60 = vector.load %arg5[%c5, %c0_34, %c0_35] : memref<9x16x32xf32, #tpu.memory_space<vmem>>, vector<1x16x32xf32>
    %61 = vector.shape_cast %60 : vector<1x16x32xf32> to vector<16x32xf32>
    %cst_36 = arith.constant dense<0.000000e+00> : vector<32x32xf32>
    %62 = tpu.matmul %59, %61, %cst_36 {dimension_numbers = #tpu.dot_dimension_numbers<[1], [0], [0], [1], [0, 0, 1, 1], [], []>} : vector<32x16xf32>, vector<16x32xf32>, vector<32x32xf32> -> vector<32x32xf32>
    %63 = arith.addf %58, %62 : vector<32x32xf32>
    %64 = vector.extract_strided_slice %32 {offsets = [192, 0], sizes = [32, 16], strides = [1, 1]} : vector<288x16xf32> to vector<32x16xf32>
    %c6 = arith.constant 6 : index
    %c0_37 = arith.constant 0 : index
    %c0_38 = arith.constant 0 : index
    %65 = vector.load %arg5[%c6, %c0_37, %c0_38] : memref<9x16x32xf32, #tpu.memory_space<vmem>>, vector<1x16x32xf32>
    %66 = vector.shape_cast %65 : vector<1x16x32xf32> to vector<16x32xf32>
    %cst_39 = arith.constant dense<0.000000e+00> : vector<32x32xf32>
    %67 = tpu.matmul %64, %66, %cst_39 {dimension_numbers = #tpu.dot_dimension_numbers<[1], [0], [0], [1], [0, 0, 1, 1], [], []>} : vector<32x16xf32>, vector<16x32xf32>, vector<32x32xf32> -> vector<32x32xf32>
    %68 = arith.addf %63, %67 : vector<32x32xf32>
    %69 = vector.extract_strided_slice %32 {offsets = [224, 0], sizes = [32, 16], strides = [1, 1]} : vector<288x16xf32> to vector<32x16xf32>
    %c7 = arith.constant 7 : index
    %c0_40 = arith.constant 0 : index
    %c0_41 = arith.constant 0 : index
    %70 = vector.load %arg5[%c7, %c0_40, %c0_41] : memref<9x16x32xf32, #tpu.memory_space<vmem>>, vector<1x16x32xf32>
    %71 = vector.shape_cast %70 : vector<1x16x32xf32> to vector<16x32xf32>
    %cst_42 = arith.constant dense<0.000000e+00> : vector<32x32xf32>
    %72 = tpu.matmul %69, %71, %cst_42 {dimension_numbers = #tpu.dot_dimension_numbers<[1], [0], [0], [1], [0, 0, 1, 1], [], []>} : vector<32x16xf32>, vector<16x32xf32>, vector<32x32xf32> -> vector<32x32xf32>
    %73 = arith.addf %68, %72 : vector<32x32xf32>
    %74 = vector.extract_strided_slice %32 {offsets = [256, 0], sizes = [32, 16], strides = [1, 1]} : vector<288x16xf32> to vector<32x16xf32>
    %c8 = arith.constant 8 : index
    %c0_43 = arith.constant 0 : index
    %c0_44 = arith.constant 0 : index
    %75 = vector.load %arg5[%c8, %c0_43, %c0_44] : memref<9x16x32xf32, #tpu.memory_space<vmem>>, vector<1x16x32xf32>
    %76 = vector.shape_cast %75 : vector<1x16x32xf32> to vector<16x32xf32>
    %cst_45 = arith.constant dense<0.000000e+00> : vector<32x32xf32>
    %77 = tpu.matmul %74, %76, %cst_45 {dimension_numbers = #tpu.dot_dimension_numbers<[1], [0], [0], [1], [0, 0, 1, 1], [], []>} : vector<32x16xf32>, vector<16x32xf32>, vector<32x32xf32> -> vector<32x32xf32>
    %78 = arith.addf %73, %77 : vector<32x32xf32>
    %c0_46 = arith.constant 0 : index
    %c0_47 = arith.constant 0 : index
    %79 = vector.load %arg6[%c0_46, %c0_47] : memref<2x32xf32, #tpu.memory_space<vmem>>, vector<1x32xf32>
    %c1_48 = arith.constant 1 : index
    %c0_49 = arith.constant 0 : index
    %80 = vector.load %arg6[%c1_48, %c0_49] : memref<2x32xf32, #tpu.memory_space<vmem>>, vector<1x32xf32>
    %cst_50 = arith.constant dense<0.000000e+00> : vector<32xf32>
    %81 = vector.multi_reduction <add>, %78, %cst_50 [0] : vector<32x32xf32> to vector<32xf32>
    %82 = vector.shape_cast %81 : vector<32xf32> to vector<1x32xf32>
    %cst_51 = arith.constant 3.200000e+01 : f32
    %83 = vector.broadcast %cst_51 : f32 to vector<1x32xf32>
    %84 = arith.divf %82, %83 : vector<1x32xf32>
    %85 = arith.mulf %78, %78 : vector<32x32xf32>
    %cst_52 = arith.constant dense<0.000000e+00> : vector<32xf32>
    %86 = vector.multi_reduction <add>, %85, %cst_52 [0] : vector<32x32xf32> to vector<32xf32>
    %87 = vector.shape_cast %86 : vector<32xf32> to vector<1x32xf32>
    %cst_53 = arith.constant 3.200000e+01 : f32
    %88 = vector.broadcast %cst_53 : f32 to vector<1x32xf32>
    %89 = arith.divf %87, %88 : vector<1x32xf32>
    %90 = arith.mulf %84, %84 : vector<1x32xf32>
    %91 = arith.subf %89, %90 : vector<1x32xf32>
    %cst_54 = arith.constant 9.99999974E-6 : f32
    %92 = vector.broadcast %cst_54 : f32 to vector<1x32xf32>
    %93 = arith.addf %91, %92 : vector<1x32xf32>
    %94 = math.rsqrt %93 : vector<1x32xf32>
    %95 = arith.mulf %79, %94 : vector<1x32xf32>
    %96 = arith.mulf %84, %95 : vector<1x32xf32>
    %97 = arith.subf %80, %96 : vector<1x32xf32>
    %98 = vector.broadcast %95 : vector<1x32xf32> to vector<32x32xf32>
    %99 = arith.mulf %78, %98 : vector<32x32xf32>
    %100 = vector.broadcast %97 : vector<1x32xf32> to vector<32x32xf32>
    %101 = arith.addf %99, %100 : vector<32x32xf32>
    %cst_55 = arith.constant 0.000000e+00 : f32
    %102 = vector.broadcast %cst_55 : f32 to vector<32x32xf32>
    %103 = arith.cmpf oge, %101, %102 : vector<32x32xf32>
    %cst_56 = arith.constant 0.00999999977 : f32
    %104 = vector.broadcast %cst_56 : f32 to vector<32x32xf32>
    %105 = arith.mulf %104, %101 : vector<32x32xf32>
    %106 = arith.select %103, %101, %105 : vector<32x32xi1>, vector<32x32xf32>
    %c0_57 = arith.constant 0 : index
    %c0_58 = arith.constant 0 : index
    %107 = vector.load %arg7[%c0_57, %c0_58] : memref<32x32xf32, #tpu.memory_space<vmem>>, vector<32x32xf32>
    %cst_59 = arith.constant dense<0.000000e+00> : vector<32x32xf32>
    %108 = tpu.matmul %106, %107, %cst_59 {dimension_numbers = #tpu.dot_dimension_numbers<[1], [0], [0], [1], [0, 0, 1, 1], [], []>} : vector<32x32xf32>, vector<32x32xf32>, vector<32x32xf32> -> vector<32x32xf32>
    %c0_60 = arith.constant 0 : index
    %c0_61 = arith.constant 0 : index
    %109 = vector.load %arg8[%c0_60, %c0_61] : memref<1x32xf32, #tpu.memory_space<vmem>>, vector<1x32xf32>
    %110 = vector.broadcast %109 : vector<1x32xf32> to vector<32x32xf32>
    %111 = arith.addf %108, %110 : vector<32x32xf32>
    %c0_62 = arith.constant 0 : index
    %c0_63 = arith.constant 0 : index
    %112 = vector.load %arg18[%c0_62, %c0_63] : memref<64x32xf32, #tpu.memory_space<vmem>>, vector<32x32xf32>
    tpu.vector_store %arg18[%c0_62, %c0_63], %111 {strides = array<i32>} : memref<64x32xf32, #tpu.memory_space<vmem>>, vector<32x32xf32>,
    %113 = arith.mulf %111, %111 : vector<32x32xf32>
    %cst_64 = arith.constant dense<0.000000e+00> : vector<32xf32>
    %114 = vector.multi_reduction <add>, %113, %cst_64 [1] : vector<32x32xf32> to vector<32xf32>
    %115 = vector.shape_cast %114 : vector<32xf32> to vector<32x1xf32>
    %c0_65 = arith.constant 0 : index
    %c0_66 = arith.constant 0 : index
    %116 = vector.load %arg11[%c0_65, %c0_66] : memref<1x128xf32, #tpu.memory_space<vmem>>, vector<1x128xf32>
    %117 = vector.broadcast %115 : vector<32x1xf32> to vector<32x128xf32>
    %118 = vector.broadcast %116 : vector<1x128xf32> to vector<32x128xf32>
    %119 = arith.addf %117, %118 : vector<32x128xf32>
    %c0_67 = arith.constant 0 : index
    %c0_68 = arith.constant 0 : index
    %120 = vector.load %arg9[%c0_67, %c0_68] : memref<32x128xf32, #tpu.memory_space<vmem>>, vector<32x128xf32>
    %cst_69 = arith.constant dense<0.000000e+00> : vector<32x128xf32>
    %121 = tpu.matmul %111, %120, %cst_69 {dimension_numbers = #tpu.dot_dimension_numbers<[1], [0], [0], [1], [0, 0, 1, 1], [], []>} : vector<32x32xf32>, vector<32x128xf32>, vector<32x128xf32> -> vector<32x128xf32>
    %cst_70 = arith.constant 2.000000e+00 : f32
    %122 = vector.broadcast %cst_70 : f32 to vector<32x128xf32>
    %123 = arith.mulf %122, %121 : vector<32x128xf32>
    %124 = arith.subf %119, %123 : vector<32x128xf32>
    %cst_71 = arith.constant dense<0x7F800000> : vector<32xf32>
    %125 = vector.multi_reduction <minimumf>, %124, %cst_71 [1] : vector<32x128xf32> to vector<32xf32>
    %126 = vector.shape_cast %125 : vector<32xf32> to vector<32x1xf32>
    %127 = tpu.iota {dimensions = array<i32: 1>} : vector<32x128xi32>
    %128 = vector.broadcast %126 : vector<32x1xf32> to vector<32x128xf32>
    %129 = arith.cmpf ole, %124, %128 : vector<32x128xf32>
    %c128_i32 = arith.constant 128 : i32
    %130 = vector.broadcast %c128_i32 : i32 to vector<32x128xi32>
    %131 = arith.select %129, %127, %130 : vector<32x128xi1>, vector<32x128xi32>
    %cst_72 = arith.constant dense<2147483647> : vector<32xi32>
    %132 = vector.multi_reduction <minsi>, %131, %cst_72 [1] : vector<32x128xi32> to vector<32xi32>
    %133 = vector.shape_cast %132 : vector<32xi32> to vector<32x1xi32>
    %134 = vector.broadcast %133 : vector<32x1xi32> to vector<32x128xi32>
    %135 = arith.cmpi eq, %127, %134 : vector<32x128xi32>
    %136 = arith.extui %135 : vector<32x128xi1> to vector<32x128xi32>
    %137 = arith.sitofp %136 : vector<32x128xi32> to vector<32x128xf32>
    %c0_73 = arith.constant 0 : index
    %c0_74 = arith.constant 0 : index
    %138 = vector.load %arg10[%c0_73, %c0_74] : memref<128x32xf32, #tpu.memory_space<vmem>>, vector<128x32xf32>
    %cst_75 = arith.constant dense<0.000000e+00> : vector<32x32xf32>
    %139 = tpu.matmul %137, %138, %cst_75 {dimension_numbers = #tpu.dot_dimension_numbers<[1], [0], [0], [1], [0, 0, 1, 1], [], []>} : vector<32x128xf32>, vector<128x32xf32>, vector<32x32xf32> -> vector<32x32xf32>
    %c32 = arith.constant 32 : index
    %c0_76 = arith.constant 0 : index
    %140 = vector.load %arg18[%c32, %c0_76] : memref<64x32xf32, #tpu.memory_space<vmem>>, vector<32x32xf32>
    tpu.vector_store %arg18[%c32, %c0_76], %139 {strides = array<i32>} : memref<64x32xf32, #tpu.memory_space<vmem>>, vector<32x32xf32>,
    %141 = arith.subf %139, %111 : vector<32x32xf32>
    %142 = arith.mulf %141, %141 : vector<32x32xf32>
    %cst_77 = arith.constant dense<0.000000e+00> : vector<32xf32>
    %143 = vector.multi_reduction <add>, %142, %cst_77 [1] : vector<32x32xf32> to vector<32xf32>
    %144 = vector.shape_cast %143 : vector<32xf32> to vector<32x1xf32>
    %cst_78 = arith.constant dense<0.000000e+00> : vector<1xf32>
    %145 = vector.multi_reduction <add>, %144, %cst_78 [0] : vector<32x1xf32> to vector<1xf32>
    %146 = vector.shape_cast %145 : vector<1xf32> to vector<1x1xf32>
    %cst_79 = arith.constant 0.00122070313 : f32
    %147 = vector.broadcast %cst_79 : f32 to vector<1x1xf32>
    %148 = arith.mulf %147, %146 : vector<1x1xf32>
    %c0_80 = arith.constant 0 : index
    %c0_81 = arith.constant 0 : index
    %149 = vector.load %arg19[%c0_80, %c0_81] : memref<1x1xf32, #tpu.memory_space<vmem>>, vector<1x1xf32>
    tpu.vector_store %arg19[%c0_80, %c0_81], %148 {strides = array<i32>} : memref<1x1xf32, #tpu.memory_space<vmem>>, vector<1x1xf32>,
    tpu.wait_dma2 semaphore(%arg21 : memref<!tpu.dma_semaphore, #tpu.memory_space<semaphore_mem>>) src(%arg12 : memref<1152x32xf32, #tpu.memory_space<any>>) dst(%arg20 : memref<1152x32xf32, #tpu.memory_space<vmem>>)
    %c0_82 = arith.constant 0 : index
    %c0_83 = arith.constant 0 : index
    %150 = vector.load %arg20[%c0_82, %c0_83] : memref<1152x32xf32, #tpu.memory_space<vmem>>, vector<1152x32xf32>
    %cst_84 = arith.constant dense<0.000000e+00> : vector<1152x32xf32>
    %151 = tpu.matmul %150, %139, %cst_84 {dimension_numbers = #tpu.dot_dimension_numbers<[1], [0], [0], [1], [0, 0, 1, 1], [], []>} : vector<1152x32xf32>, vector<32x32xf32>, vector<1152x32xf32> -> vector<1152x32xf32>
    %cst_85 = arith.constant 0.000000e+00 : f32
    %152 = vector.broadcast %cst_85 : f32 to vector<128x32xf32>
    %153 = vector.extract_strided_slice %151 {offsets = [0, 0], sizes = [128, 32], strides = [1, 1]} : vector<1152x32xf32> to vector<128x32xf32>
    %c0_86 = arith.constant 0 : index
    %c0_87 = arith.constant 0 : index
    %c0_88 = arith.constant 0 : index
    %154 = vector.load %arg13[%c0_86, %c0_87, %c0_88] : memref<9x32x32xf32, #tpu.memory_space<vmem>>, vector<1x32x32xf32>
    %155 = vector.shape_cast %154 : vector<1x32x32xf32> to vector<32x32xf32>
    %cst_89 = arith.constant dense<0.000000e+00> : vector<128x32xf32>
    %156 = tpu.matmul %153, %155, %cst_89 {dimension_numbers = #tpu.dot_dimension_numbers<[1], [0], [0], [1], [0, 0, 1, 1], [], []>} : vector<128x32xf32>, vector<32x32xf32>, vector<128x32xf32> -> vector<128x32xf32>
    %157 = arith.addf %152, %156 : vector<128x32xf32>
    %158 = vector.extract_strided_slice %151 {offsets = [128, 0], sizes = [128, 32], strides = [1, 1]} : vector<1152x32xf32> to vector<128x32xf32>
    %c1_90 = arith.constant 1 : index
    %c0_91 = arith.constant 0 : index
    %c0_92 = arith.constant 0 : index
    %159 = vector.load %arg13[%c1_90, %c0_91, %c0_92] : memref<9x32x32xf32, #tpu.memory_space<vmem>>, vector<1x32x32xf32>
    %160 = vector.shape_cast %159 : vector<1x32x32xf32> to vector<32x32xf32>
    %cst_93 = arith.constant dense<0.000000e+00> : vector<128x32xf32>
    %161 = tpu.matmul %158, %160, %cst_93 {dimension_numbers = #tpu.dot_dimension_numbers<[1], [0], [0], [1], [0, 0, 1, 1], [], []>} : vector<128x32xf32>, vector<32x32xf32>, vector<128x32xf32> -> vector<128x32xf32>
    %162 = arith.addf %157, %161 : vector<128x32xf32>
    %163 = vector.extract_strided_slice %151 {offsets = [256, 0], sizes = [128, 32], strides = [1, 1]} : vector<1152x32xf32> to vector<128x32xf32>
    %c2_94 = arith.constant 2 : index
    %c0_95 = arith.constant 0 : index
    %c0_96 = arith.constant 0 : index
    %164 = vector.load %arg13[%c2_94, %c0_95, %c0_96] : memref<9x32x32xf32, #tpu.memory_space<vmem>>, vector<1x32x32xf32>
    %165 = vector.shape_cast %164 : vector<1x32x32xf32> to vector<32x32xf32>
    %cst_97 = arith.constant dense<0.000000e+00> : vector<128x32xf32>
    %166 = tpu.matmul %163, %165, %cst_97 {dimension_numbers = #tpu.dot_dimension_numbers<[1], [0], [0], [1], [0, 0, 1, 1], [], []>} : vector<128x32xf32>, vector<32x32xf32>, vector<128x32xf32> -> vector<128x32xf32>
    %167 = arith.addf %162, %166 : vector<128x32xf32>
    %168 = vector.extract_strided_slice %151 {offsets = [384, 0], sizes = [128, 32], strides = [1, 1]} : vector<1152x32xf32> to vector<128x32xf32>
    %c3_98 = arith.constant 3 : index
    %c0_99 = arith.constant 0 : index
    %c0_100 = arith.constant 0 : index
    %169 = vector.load %arg13[%c3_98, %c0_99, %c0_100] : memref<9x32x32xf32, #tpu.memory_space<vmem>>, vector<1x32x32xf32>
    %170 = vector.shape_cast %169 : vector<1x32x32xf32> to vector<32x32xf32>
    %cst_101 = arith.constant dense<0.000000e+00> : vector<128x32xf32>
    %171 = tpu.matmul %168, %170, %cst_101 {dimension_numbers = #tpu.dot_dimension_numbers<[1], [0], [0], [1], [0, 0, 1, 1], [], []>} : vector<128x32xf32>, vector<32x32xf32>, vector<128x32xf32> -> vector<128x32xf32>
    %172 = arith.addf %167, %171 : vector<128x32xf32>
    %173 = vector.extract_strided_slice %151 {offsets = [512, 0], sizes = [128, 32], strides = [1, 1]} : vector<1152x32xf32> to vector<128x32xf32>
    %c4_102 = arith.constant 4 : index
    %c0_103 = arith.constant 0 : index
    %c0_104 = arith.constant 0 : index
    %174 = vector.load %arg13[%c4_102, %c0_103, %c0_104] : memref<9x32x32xf32, #tpu.memory_space<vmem>>, vector<1x32x32xf32>
    %175 = vector.shape_cast %174 : vector<1x32x32xf32> to vector<32x32xf32>
    %cst_105 = arith.constant dense<0.000000e+00> : vector<128x32xf32>
    %176 = tpu.matmul %173, %175, %cst_105 {dimension_numbers = #tpu.dot_dimension_numbers<[1], [0], [0], [1], [0, 0, 1, 1], [], []>} : vector<128x32xf32>, vector<32x32xf32>, vector<128x32xf32> -> vector<128x32xf32>
    %177 = arith.addf %172, %176 : vector<128x32xf32>
    %178 = vector.extract_strided_slice %151 {offsets = [640, 0], sizes = [128, 32], strides = [1, 1]} : vector<1152x32xf32> to vector<128x32xf32>
    %c5_106 = arith.constant 5 : index
    %c0_107 = arith.constant 0 : index
    %c0_108 = arith.constant 0 : index
    %179 = vector.load %arg13[%c5_106, %c0_107, %c0_108] : memref<9x32x32xf32, #tpu.memory_space<vmem>>, vector<1x32x32xf32>
    %180 = vector.shape_cast %179 : vector<1x32x32xf32> to vector<32x32xf32>
    %cst_109 = arith.constant dense<0.000000e+00> : vector<128x32xf32>
    %181 = tpu.matmul %178, %180, %cst_109 {dimension_numbers = #tpu.dot_dimension_numbers<[1], [0], [0], [1], [0, 0, 1, 1], [], []>} : vector<128x32xf32>, vector<32x32xf32>, vector<128x32xf32> -> vector<128x32xf32>
    %182 = arith.addf %177, %181 : vector<128x32xf32>
    %183 = vector.extract_strided_slice %151 {offsets = [768, 0], sizes = [128, 32], strides = [1, 1]} : vector<1152x32xf32> to vector<128x32xf32>
    %c6_110 = arith.constant 6 : index
    %c0_111 = arith.constant 0 : index
    %c0_112 = arith.constant 0 : index
    %184 = vector.load %arg13[%c6_110, %c0_111, %c0_112] : memref<9x32x32xf32, #tpu.memory_space<vmem>>, vector<1x32x32xf32>
    %185 = vector.shape_cast %184 : vector<1x32x32xf32> to vector<32x32xf32>
    %cst_113 = arith.constant dense<0.000000e+00> : vector<128x32xf32>
    %186 = tpu.matmul %183, %185, %cst_113 {dimension_numbers = #tpu.dot_dimension_numbers<[1], [0], [0], [1], [0, 0, 1, 1], [], []>} : vector<128x32xf32>, vector<32x32xf32>, vector<128x32xf32> -> vector<128x32xf32>
    %187 = arith.addf %182, %186 : vector<128x32xf32>
    %188 = vector.extract_strided_slice %151 {offsets = [896, 0], sizes = [128, 32], strides = [1, 1]} : vector<1152x32xf32> to vector<128x32xf32>
    %c7_114 = arith.constant 7 : index
    %c0_115 = arith.constant 0 : index
    %c0_116 = arith.constant 0 : index
    %189 = vector.load %arg13[%c7_114, %c0_115, %c0_116] : memref<9x32x32xf32, #tpu.memory_space<vmem>>, vector<1x32x32xf32>
    %190 = vector.shape_cast %189 : vector<1x32x32xf32> to vector<32x32xf32>
    %cst_117 = arith.constant dense<0.000000e+00> : vector<128x32xf32>
    %191 = tpu.matmul %188, %190, %cst_117 {dimension_numbers = #tpu.dot_dimension_numbers<[1], [0], [0], [1], [0, 0, 1, 1], [], []>} : vector<128x32xf32>, vector<32x32xf32>, vector<128x32xf32> -> vector<128x32xf32>
    %192 = arith.addf %187, %191 : vector<128x32xf32>
    %193 = vector.extract_strided_slice %151 {offsets = [1024, 0], sizes = [128, 32], strides = [1, 1]} : vector<1152x32xf32> to vector<128x32xf32>
    %c8_118 = arith.constant 8 : index
    %c0_119 = arith.constant 0 : index
    %c0_120 = arith.constant 0 : index
    %194 = vector.load %arg13[%c8_118, %c0_119, %c0_120] : memref<9x32x32xf32, #tpu.memory_space<vmem>>, vector<1x32x32xf32>
    %195 = vector.shape_cast %194 : vector<1x32x32xf32> to vector<32x32xf32>
    %cst_121 = arith.constant dense<0.000000e+00> : vector<128x32xf32>
    %196 = tpu.matmul %193, %195, %cst_121 {dimension_numbers = #tpu.dot_dimension_numbers<[1], [0], [0], [1], [0, 0, 1, 1], [], []>} : vector<128x32xf32>, vector<32x32xf32>, vector<128x32xf32> -> vector<128x32xf32>
    %197 = arith.addf %192, %196 : vector<128x32xf32>
    %c0_122 = arith.constant 0 : index
    %c0_123 = arith.constant 0 : index
    %198 = vector.load %arg14[%c0_122, %c0_123] : memref<2x32xf32, #tpu.memory_space<vmem>>, vector<1x32xf32>
    %c1_124 = arith.constant 1 : index
    %c0_125 = arith.constant 0 : index
    %199 = vector.load %arg14[%c1_124, %c0_125] : memref<2x32xf32, #tpu.memory_space<vmem>>, vector<1x32xf32>
    %cst_126 = arith.constant dense<0.000000e+00> : vector<32xf32>
    %200 = vector.multi_reduction <add>, %197, %cst_126 [0] : vector<128x32xf32> to vector<32xf32>
    %201 = vector.shape_cast %200 : vector<32xf32> to vector<1x32xf32>
    %cst_127 = arith.constant 1.280000e+02 : f32
    %202 = vector.broadcast %cst_127 : f32 to vector<1x32xf32>
    %203 = arith.divf %201, %202 : vector<1x32xf32>
    %204 = arith.mulf %197, %197 : vector<128x32xf32>
    %cst_128 = arith.constant dense<0.000000e+00> : vector<32xf32>
    %205 = vector.multi_reduction <add>, %204, %cst_128 [0] : vector<128x32xf32> to vector<32xf32>
    %206 = vector.shape_cast %205 : vector<32xf32> to vector<1x32xf32>
    %cst_129 = arith.constant 1.280000e+02 : f32
    %207 = vector.broadcast %cst_129 : f32 to vector<1x32xf32>
    %208 = arith.divf %206, %207 : vector<1x32xf32>
    %209 = arith.mulf %203, %203 : vector<1x32xf32>
    %210 = arith.subf %208, %209 : vector<1x32xf32>
    %cst_130 = arith.constant 9.99999974E-6 : f32
    %211 = vector.broadcast %cst_130 : f32 to vector<1x32xf32>
    %212 = arith.addf %210, %211 : vector<1x32xf32>
    %213 = math.rsqrt %212 : vector<1x32xf32>
    %214 = arith.mulf %198, %213 : vector<1x32xf32>
    %215 = arith.mulf %203, %214 : vector<1x32xf32>
    %216 = arith.subf %199, %215 : vector<1x32xf32>
    %217 = vector.broadcast %214 : vector<1x32xf32> to vector<128x32xf32>
    %218 = arith.mulf %197, %217 : vector<128x32xf32>
    %219 = vector.broadcast %216 : vector<1x32xf32> to vector<128x32xf32>
    %220 = arith.addf %218, %219 : vector<128x32xf32>
    %cst_131 = arith.constant 0.000000e+00 : f32
    %221 = vector.broadcast %cst_131 : f32 to vector<128x32xf32>
    %222 = arith.cmpf oge, %220, %221 : vector<128x32xf32>
    %cst_132 = arith.constant 0.00999999977 : f32
    %223 = vector.broadcast %cst_132 : f32 to vector<128x32xf32>
    %224 = arith.mulf %223, %220 : vector<128x32xf32>
    %225 = arith.select %222, %220, %224 : vector<128x32xi1>, vector<128x32xf32>
    %c0_133 = arith.constant 0 : index
    %c0_134 = arith.constant 0 : index
    %226 = vector.load %arg22[%c0_133, %c0_134] : memref<144x32xf32, #tpu.memory_space<vmem>>, vector<128x32xf32>
    tpu.vector_store %arg22[%c0_133, %c0_134], %225 {strides = array<i32>} : memref<144x32xf32, #tpu.memory_space<vmem>>, vector<128x32xf32>,
    %cst_135 = arith.constant 0.000000e+00 : f32
    %227 = vector.broadcast %cst_135 : f32 to vector<16x32xf32>
    %c128 = arith.constant 128 : index
    %c0_136 = arith.constant 0 : index
    %228 = vector.load %arg22[%c128, %c0_136] : memref<144x32xf32, #tpu.memory_space<vmem>>, vector<16x32xf32>
    tpu.vector_store %arg22[%c128, %c0_136], %227 {strides = array<i32>} : memref<144x32xf32, #tpu.memory_space<vmem>>, vector<16x32xf32>,
    %229 = tpu.iota {dimensions = array<i32: 0>} : vector<128x1xi32>
    %c7_i32 = arith.constant 7 : i32
    %230 = vector.broadcast %c7_i32 : i32 to vector<128x1xi32>
    %231 = arith.andi %229, %230 : vector<128x1xi32>
    %c7_i32_137 = arith.constant 7 : i32
    %232 = vector.broadcast %c7_i32_137 : i32 to vector<128x1xi32>
    %233 = arith.cmpi ne, %231, %232 : vector<128x1xi32>
    %c63_i32 = arith.constant 63 : i32
    %234 = vector.broadcast %c63_i32 : i32 to vector<128x1xi32>
    %235 = arith.andi %229, %234 : vector<128x1xi32>
    %c56_i32 = arith.constant 56 : i32
    %236 = vector.broadcast %c56_i32 : i32 to vector<128x1xi32>
    %237 = arith.cmpi slt, %235, %236 : vector<128x1xi32>
    %c0_138 = arith.constant 0 : index
    %c0_139 = arith.constant 0 : index
    %c0_140 = arith.constant 0 : index
    %238 = vector.load %arg15[%c0_138, %c0_139, %c0_140] : memref<4x32x12xf32, #tpu.memory_space<vmem>>, vector<1x32x12xf32>
    %239 = vector.shape_cast %238 : vector<1x32x12xf32> to vector<32x12xf32>
    %cst_141 = arith.constant dense<0.000000e+00> : vector<128x12xf32>
    %240 = tpu.matmul %225, %239, %cst_141 {dimension_numbers = #tpu.dot_dimension_numbers<[1], [0], [0], [1], [0, 0, 1, 1], [], []>} : vector<128x32xf32>, vector<32x12xf32>, vector<128x12xf32> -> vector<128x12xf32>
    %c0_142 = arith.constant 0 : index
    %c0_143 = arith.constant 0 : index
    %241 = vector.load %arg16[%c0_142, %c0_143] : memref<1x12xf32, #tpu.memory_space<vmem>>, vector<1x12xf32>
    %242 = vector.broadcast %241 : vector<1x12xf32> to vector<128x12xf32>
    %243 = arith.addf %240, %242 : vector<128x12xf32>
    %c1_144 = arith.constant 1 : index
    %c0_145 = arith.constant 0 : index
    %244 = vector.load %arg22[%c1_144, %c0_145] : memref<144x32xf32, #tpu.memory_space<vmem>>, vector<128x32xf32>
    %cst_146 = arith.constant 0.000000e+00 : f32
    %245 = vector.shape_cast %233 : vector<128x1xi1> to vector<128x1xi1>
    %246 = vector.broadcast %245 : vector<128x1xi1> to vector<128x32xi1>
    %247 = vector.broadcast %cst_146 : f32 to vector<128x32xf32>
    %248 = arith.select %246, %244, %247 : vector<128x32xi1>, vector<128x32xf32>
    %c1_147 = arith.constant 1 : index
    %c0_148 = arith.constant 0 : index
    %c0_149 = arith.constant 0 : index
    %249 = vector.load %arg15[%c1_147, %c0_148, %c0_149] : memref<4x32x12xf32, #tpu.memory_space<vmem>>, vector<1x32x12xf32>
    %250 = vector.shape_cast %249 : vector<1x32x12xf32> to vector<32x12xf32>
    %cst_150 = arith.constant dense<0.000000e+00> : vector<128x12xf32>
    %251 = tpu.matmul %248, %250, %cst_150 {dimension_numbers = #tpu.dot_dimension_numbers<[1], [0], [0], [1], [0, 0, 1, 1], [], []>} : vector<128x32xf32>, vector<32x12xf32>, vector<128x12xf32> -> vector<128x12xf32>
    %252 = arith.addf %243, %251 : vector<128x12xf32>
    %c8_151 = arith.constant 8 : index
    %c0_152 = arith.constant 0 : index
    %253 = vector.load %arg22[%c8_151, %c0_152] : memref<144x32xf32, #tpu.memory_space<vmem>>, vector<128x32xf32>
    %cst_153 = arith.constant 0.000000e+00 : f32
    %254 = vector.shape_cast %237 : vector<128x1xi1> to vector<128x1xi1>
    %255 = vector.broadcast %254 : vector<128x1xi1> to vector<128x32xi1>
    %256 = vector.broadcast %cst_153 : f32 to vector<128x32xf32>
    %257 = arith.select %255, %253, %256 : vector<128x32xi1>, vector<128x32xf32>
    %c2_154 = arith.constant 2 : index
    %c0_155 = arith.constant 0 : index
    %c0_156 = arith.constant 0 : index
    %258 = vector.load %arg15[%c2_154, %c0_155, %c0_156] : memref<4x32x12xf32, #tpu.memory_space<vmem>>, vector<1x32x12xf32>
    %259 = vector.shape_cast %258 : vector<1x32x12xf32> to vector<32x12xf32>
    %cst_157 = arith.constant dense<0.000000e+00> : vector<128x12xf32>
    %260 = tpu.matmul %257, %259, %cst_157 {dimension_numbers = #tpu.dot_dimension_numbers<[1], [0], [0], [1], [0, 0, 1, 1], [], []>} : vector<128x32xf32>, vector<32x12xf32>, vector<128x12xf32> -> vector<128x12xf32>
    %261 = arith.addf %252, %260 : vector<128x12xf32>
    %262 = arith.andi %233, %237 : vector<128x1xi1>
    %c9 = arith.constant 9 : index
    %c0_158 = arith.constant 0 : index
    %263 = vector.load %arg22[%c9, %c0_158] : memref<144x32xf32, #tpu.memory_space<vmem>>, vector<128x32xf32>
    %cst_159 = arith.constant 0.000000e+00 : f32
    %264 = vector.shape_cast %262 : vector<128x1xi1> to vector<128x1xi1>
    %265 = vector.broadcast %264 : vector<128x1xi1> to vector<128x32xi1>
    %266 = vector.broadcast %cst_159 : f32 to vector<128x32xf32>
    %267 = arith.select %265, %263, %266 : vector<128x32xi1>, vector<128x32xf32>
    %c3_160 = arith.constant 3 : index
    %c0_161 = arith.constant 0 : index
    %c0_162 = arith.constant 0 : index
    %268 = vector.load %arg15[%c3_160, %c0_161, %c0_162] : memref<4x32x12xf32, #tpu.memory_space<vmem>>, vector<1x32x12xf32>
    %269 = vector.shape_cast %268 : vector<1x32x12xf32> to vector<32x12xf32>
    %cst_163 = arith.constant dense<0.000000e+00> : vector<128x12xf32>
    %270 = tpu.matmul %267, %269, %cst_163 {dimension_numbers = #tpu.dot_dimension_numbers<[1], [0], [0], [1], [0, 0, 1, 1], [], []>} : vector<128x32xf32>, vector<32x12xf32>, vector<128x12xf32> -> vector<128x12xf32>
    %271 = arith.addf %261, %270 : vector<128x12xf32>
    %272 = math.tanh %271 : vector<128x12xf32>
    %c0_164 = arith.constant 0 : index
    %c0_165 = arith.constant 0 : index
    %273 = vector.load %arg17[%c0_164, %c0_165] : memref<128x12xf32, #tpu.memory_space<vmem>>, vector<128x12xf32>
    tpu.vector_store %arg17[%c0_164, %c0_165], %272 {strides = array<i32>} : memref<128x12xf32, #tpu.memory_space<vmem>>, vector<128x12xf32>,
    return
  }
  func.func @transform_0(%arg0: i32) -> (i32, i32) {
    %c0_i32 = arith.constant 0 : i32
    %c0_i32_0 = arith.constant 0 : i32
    %c0_i32_1 = arith.constant 0 : i32
    return %c0_i32, %c0_i32_0 : i32, i32
  }
  func.func @transform_1(%arg0: i32) -> (i32, i32) {
    %c0_i32 = arith.constant 0 : i32
    %c0_i32_0 = arith.constant 0 : i32
    %c0_i32_1 = arith.constant 0 : i32
    return %c0_i32, %c0_i32_0 : i32, i32
  }
  func.func @transform_2(%arg0: i32) -> (i32, i32) {
    %c0_i32 = arith.constant 0 : i32
    %c0_i32_0 = arith.constant 0 : i32
    %c0_i32_1 = arith.constant 0 : i32
    return %c0_i32, %c0_i32_0 : i32, i32
  }
  func.func @transform_3(%arg0: i32) -> (i32, i32) {
    %c0_i32 = arith.constant 0 : i32
    %c0_i32_0 = arith.constant 0 : i32
    %c0_i32_1 = arith.constant 0 : i32
    return %c0_i32, %c0_i32_0 : i32, i32
  }
  func.func @transform_4(%arg0: i32) -> (i32, i32, i32) {
    %c0_i32 = arith.constant 0 : i32
    %c0_i32_0 = arith.constant 0 : i32
    %c0_i32_1 = arith.constant 0 : i32
    %c0_i32_2 = arith.constant 0 : i32
    return %c0_i32, %c0_i32_0, %c0_i32_1 : i32, i32, i32
  }
  func.func @transform_5(%arg0: i32) -> (i32, i32) {
    %c0_i32 = arith.constant 0 : i32
    %c0_i32_0 = arith.constant 0 : i32
    %c0_i32_1 = arith.constant 0 : i32
    return %c0_i32, %c0_i32_0 : i32, i32
  }
  func.func @transform_6(%arg0: i32) -> (i32, i32) {
    %c0_i32 = arith.constant 0 : i32
    %c0_i32_0 = arith.constant 0 : i32
    %c0_i32_1 = arith.constant 0 : i32
    return %c0_i32, %c0_i32_0 : i32, i32
  }
  func.func @transform_7(%arg0: i32) -> (i32, i32) {
    %c0_i32 = arith.constant 0 : i32
    %c0_i32_0 = arith.constant 0 : i32
    %c0_i32_1 = arith.constant 0 : i32
    return %c0_i32, %c0_i32_0 : i32, i32
  }
  func.func @transform_8(%arg0: i32) -> (i32, i32) {
    %c0_i32 = arith.constant 0 : i32
    %c0_i32_0 = arith.constant 0 : i32
    %c0_i32_1 = arith.constant 0 : i32
    return %c0_i32, %c0_i32_0 : i32, i32
  }
  func.func @transform_9(%arg0: i32) -> (i32, i32) {
    %c0_i32 = arith.constant 0 : i32
    %c0_i32_0 = arith.constant 0 : i32
    %c0_i32_1 = arith.constant 0 : i32
    return %c0_i32, %c0_i32_0 : i32, i32
  }
  func.func @transform_10(%arg0: i32) -> (i32, i32) {
    %c0_i32 = arith.constant 0 : i32
    %c0_i32_0 = arith.constant 0 : i32
    %c0_i32_1 = arith.constant 0 : i32
    return %c0_i32, %c0_i32_0 : i32, i32
  }
  func.func @transform_12(%arg0: i32) -> (i32, i32, i32) {
    %c0_i32 = arith.constant 0 : i32
    %c0_i32_0 = arith.constant 0 : i32
    %c0_i32_1 = arith.constant 0 : i32
    %c0_i32_2 = arith.constant 0 : i32
    return %c0_i32, %c0_i32_0, %c0_i32_1 : i32, i32, i32
  }
  func.func @transform_13(%arg0: i32) -> (i32, i32) {
    %c0_i32 = arith.constant 0 : i32
    %c0_i32_0 = arith.constant 0 : i32
    %c0_i32_1 = arith.constant 0 : i32
    return %c0_i32, %c0_i32_0 : i32, i32
  }
  func.func @transform_14(%arg0: i32) -> (i32, i32, i32) {
    %c0_i32 = arith.constant 0 : i32
    %c0_i32_0 = arith.constant 0 : i32
    %c0_i32_1 = arith.constant 0 : i32
    %c0_i32_2 = arith.constant 0 : i32
    return %c0_i32, %c0_i32_0, %c0_i32_1 : i32, i32, i32
  }
  func.func @transform_15(%arg0: i32) -> (i32, i32) {
    %c0_i32 = arith.constant 0 : i32
    %c0_i32_0 = arith.constant 0 : i32
    %c0_i32_1 = arith.constant 0 : i32
    return %c0_i32, %c0_i32_0 : i32, i32
  }
  func.func @transform_16(%arg0: i32) -> (i32, i32) {
    %c0_i32 = arith.constant 0 : i32
    %c0_i32_0 = arith.constant 0 : i32
    %c0_i32_1 = arith.constant 0 : i32
    return %c0_i32, %c0_i32_0 : i32, i32
  }
  func.func @transform_17(%arg0: i32) -> (i32, i32) {
    %c0_i32 = arith.constant 0 : i32
    %c0_i32_0 = arith.constant 0 : i32
    %c0_i32_1 = arith.constant 0 : i32
    return %c0_i32, %c0_i32_0 : i32, i32
  }
  func.func @transform_18(%arg0: i32) -> (i32, i32) {
    %c0_i32 = arith.constant 0 : i32
    %c0_i32_0 = arith.constant 0 : i32
    %c0_i32_1 = arith.constant 0 : i32
    return %c0_i32, %c0_i32_0 : i32, i32
  }
}

</mosaic_0001>

<bundles_post_ra>
// kernel: vqvae_forward.1
= control target key start
LH: loop header
LB: loop body
LE: loop exit
PB: predicated region body
PF: predicated region fallthrough
CT: control target
= control target key end

     0   :  { %s8945_s0 = inlined_call_operand.vmem [shape: f32[128,32], index: 0, kind: input, shape index: {}]   ;;  %s8946_s1 = inlined_call_operand.vmem [shape: f32[32,16], index: 1, kind: input, shape index: {}]   ;;  %s8947_s2 = inlined_call_operand.vmem [shape: f32[2,16], index: 2, kind: input, shape index: {}]   ;;  %s8948_s3 = inlined_call_operand.vmem [shape: f32[288,128], index: 3, kind: input, shape index: {}]   ;;  %s8949_s4 = inlined_call_operand.vmem [shape: f32[9,16,32], index: 4, kind: input, shape index: {}]   ;;  %s8950_s5 = inlined_call_operand.vmem [shape: f32[2,32], index: 5, kind: input, shape index: {}]   ;;  %s8951_s6 = inlined_call_operand.vmem [shape: f32[32,32], index: 6, kind: input, shape index: {}]   ;;  %s8952_s7 = inlined_call_operand.vmem [shape: f32[1,32], index: 7, kind: input, shape index: {}]   ;;  %s8953_s8 = inlined_call_operand.vmem [shape: f32[32,128], index: 8, kind: input, shape index: {}]   ;;  %s8954_s9 = inlined_call_operand.vmem [shape: f32[128,32], index: 9, kind: input, shape index: {}]   ;;  %s8955_s10 = inlined_call_operand.vmem [shape: f32[1,128], index: 10, kind: input, shape index: {}]   ;;  %s8956_s11 = inlined_call_operand.vmem [shape: f32[1152,32], index: 11, kind: input, shape index: {}]   ;;  %s8957_s12 = inlined_call_operand.vmem [shape: f32[9,32,32], index: 12, kind: input, shape index: {}]   ;;  %s8958_s13 = inlined_call_operand.vmem [shape: f32[2,32], index: 13, kind: input, shape index: {}]   ;;  %s8959_s14 = inlined_call_operand.vmem [shape: f32[4,32,12], index: 14, kind: input, shape index: {}]   ;;  %s8960_s15 = inlined_call_operand.vmem [shape: f32[1,12], index: 15, kind: input, shape index: {}]   ;;  %s8961_s16 = inlined_call_operand.vmem [shape: f32[128,12], index: 16, kind: output, shape index: {0}]   ;;  %s8962_s17 = inlined_call_operand.vmem [shape: f32[64,32], index: 17, kind: output, shape index: {1}]   ;;  %s8963_s18 = inlined_call_operand.hbm [shape: f32[1,1], index: 18, kind: output, shape index: {2}]  }
   0x1   :  { %8970 = sst [smem:[#allocation132_spill]] %s8945_s0 }
   0x2   :  { %8971 = sst [smem:[#allocation133_spill]] %s8946_s1 }
   0x3   :  { %8972 = sst [smem:[#allocation134_spill]] %s8947_s2 }
   0x4   :  { %24 = vsyncpa [#allocation6], 0  ;;  %v5613_v0 = vld [vmem:[%s8956_s11] sm:$0xff]  ;;  %v5618_v1 = vld [vmem:[%s8956_s11 + $0x8] sm:$0xff] }
   0x5   :  { %v5623_v2 = vld [vmem:[%s8956_s11 + $0x10] sm:$0xff]  ;;  %v5628_v3 = vld [vmem:[%s8956_s11 + $0x18] sm:$0xff]  ;;  %v5633_v4 = vld [vmem:[%s8956_s11 + $0x20] sm:$0xff] }
   0x6   :  { %v5638_v5 = vld [vmem:[%s8956_s11 + $0x28] sm:$0xff]  ;;  %v5643_v6 = vld [vmem:[%s8956_s11 + $0x30] sm:$0xff]  ;;  %v5648_v7 = vld [vmem:[%s8956_s11 + $0x38] sm:$0xff] }
   0x7   :  { %8973 = vst [vmem:[#allocation10_spill] sm:$0xff] %v5648_v7  ;;  %v5653_v8 = vld [vmem:[%s8956_s11 + $0x40] sm:$0xff]  ;;  %v5658_v9 = vld [vmem:[%s8956_s11 + $0x48] sm:$0xff]  ;;  %v5663_v10 = vld [vmem:[%s8956_s11 + $0x50] sm:$0xff] }
   0x8   :  { %v5668_v11 = vld [vmem:[%s8956_s11 + $0x58] sm:$0xff]  ;;  %v5673_v12 = vld [vmem:[%s8956_s11 + $0x60] sm:$0xff]  ;;  %v5678_v13 = vld [vmem:[%s8956_s11 + $0x68] sm:$0xff] }
   0x9   :  { %v5683_v14 = vld [vmem:[%s8956_s11 + $0x70] sm:$0xff]  ;;  %v5688_v15 = vld [vmem:[%s8956_s11 + $0x78] sm:$0xff]  ;;  %v5693_v16 = vld [vmem:[%s8956_s11 + $0x80] sm:$0xff] }
   0xa   :  { %8974 = vst [vmem:[#allocation11_spill] sm:$0xff] %v5693_v16  ;;  %v5698_v17 = vld [vmem:[%s8956_s11 + $0x88] sm:$0xff]  ;;  %v5703_v18 = vld [vmem:[%s8956_s11 + $0x90] sm:$0xff]  ;;  %v5708_v19 = vld [vmem:[%s8956_s11 + $0x98] sm:$0xff] }
   0xb   :  { %8975 = vst [vmem:[#allocation12_spill] sm:$0xff] %v5698_v17  ;;  %v5713_v20 = vld [vmem:[%s8956_s11 + $0xa0] sm:$0xff]  ;;  %v5718_v21 = vld [vmem:[%s8956_s11 + $0xa8] sm:$0xff]  ;;  %v5723_v22 = vld [vmem:[%s8956_s11 + $0xb0] sm:$0xff] }
   0xc   :  { %8976 = vst [vmem:[#allocation13_spill] sm:$0xff] %v5703_v18  ;;  %v5728_v23 = vld [vmem:[%s8956_s11 + $0xb8] sm:$0xff]  ;;  %v5733_v24 = vld [vmem:[%s8956_s11 + $0xc0] sm:$0xff]  ;;  %v5738_v25 = vld [vmem:[%s8956_s11 + $0xc8] sm:$0xff] }
   0xd   :  { %8977 = vst [vmem:[#allocation14_spill] sm:$0xff] %v5708_v19  ;;  %v5743_v26 = vld [vmem:[%s8956_s11 + $0xd0] sm:$0xff]  ;;  %v5748_v27 = vld [vmem:[%s8956_s11 + $0xd8] sm:$0xff]  ;;  %v5753_v28 = vld [vmem:[%s8956_s11 + $0xe0] sm:$0xff] }
   0xe   :  { %8978 = vst [vmem:[#allocation15_spill] sm:$0xff] %v5713_v20  ;;  %v5758_v29 = vld [vmem:[%s8956_s11 + $0xe8] sm:$0xff]  ;;  %v5763_v30 = vld [vmem:[%s8956_s11 + $0xf0] sm:$0xff]  ;;  %v5768_v31 = vld [vmem:[%s8956_s11 + $0xf8] sm:$0xff] }
   0xf   :  { %8979 = vst [vmem:[#allocation16_spill] sm:$0xff] %v5718_v21  ;;  %v5773_v32 = vld [vmem:[%s8956_s11 + $0x100] sm:$0xff]  ;;  %v5778_v33 = vld [vmem:[%s8956_s11 + $0x108] sm:$0xff]  ;;  %v5783_v34 = vld [vmem:[%s8956_s11 + $0x110] sm:$0xff] }
  0x10   :  { %8980 = vst [vmem:[#allocation17_spill] sm:$0xff] %v5723_v22  ;;  %v5788_v35 = vld [vmem:[%s8956_s11 + $0x118] sm:$0xff]  ;;  %v5793_v36 = vld [vmem:[%s8956_s11 + $0x120] sm:$0xff]  ;;  %v5798_v37 = vld [vmem:[%s8956_s11 + $0x128] sm:$0xff] }
  0x11   :  { %8981 = vst [vmem:[#allocation18_spill] sm:$0xff] %v5728_v23  ;;  %v5803_v38 = vld [vmem:[%s8956_s11 + $0x130] sm:$0xff]  ;;  %v5808_v39 = vld [vmem:[%s8956_s11 + $0x138] sm:$0xff]  ;;  %v5813_v40 = vld [vmem:[%s8956_s11 + $0x140] sm:$0xff] }
  0x12   :  { %8982 = vst [vmem:[#allocation19_spill] sm:$0xff] %v5733_v24  ;;  %v5818_v41 = vld [vmem:[%s8956_s11 + $0x148] sm:$0xff]  ;;  %v5823_v42 = vld [vmem:[%s8956_s11 + $0x150] sm:$0xff]  ;;  %v5828_v43 = vld [vmem:[%s8956_s11 + $0x158] sm:$0xff] }
  0x13   :  { %8983 = vst [vmem:[#allocation20_spill] sm:$0xff] %v5738_v25  ;;  %v5833_v44 = vld [vmem:[%s8956_s11 + $0x160] sm:$0xff]  ;;  %v5838_v45 = vld [vmem:[%s8956_s11 + $0x168] sm:$0xff]  ;;  %v5843_v46 = vld [vmem:[%s8956_s11 + $0x170] sm:$0xff] }
  0x14   :  { %8984 = vst [vmem:[#allocation21_spill] sm:$0xff] %v5743_v26  ;;  %v5848_v47 = vld [vmem:[%s8956_s11 + $0x178] sm:$0xff]  ;;  %v5853_v48 = vld [vmem:[%s8956_s11 + $0x180] sm:$0xff]  ;;  %v5858_v49 = vld [vmem:[%s8956_s11 + $0x188] sm:$0xff] }
  0x15   :  { %8985 = vst [vmem:[#allocation22_spill] sm:$0xff] %v5748_v27  ;;  %v5863_v50 = vld [vmem:[%s8956_s11 + $0x190] sm:$0xff]  ;;  %v5868_v51 = vld [vmem:[%s8956_s11 + $0x198] sm:$0xff]  ;;  %v5873_v52 = vld [vmem:[%s8956_s11 + $0x1a0] sm:$0xff] }
  0x16   :  { %8986 = vst [vmem:[#allocation23_spill] sm:$0xff] %v5753_v28  ;;  %v5878_v53 = vld [vmem:[%s8956_s11 + $0x1a8] sm:$0xff]  ;;  %v5883_v54 = vld [vmem:[%s8956_s11 + $0x1b0] sm:$0xff]  ;;  %v5888_v55 = vld [vmem:[%s8956_s11 + $0x1b8] sm:$0xff] }
  0x17   :  { %8987 = vst [vmem:[#allocation24_spill] sm:$0xff] %v5758_v29  ;;  %v5893_v56 = vld [vmem:[%s8956_s11 + $0x1c0] sm:$0xff]  ;;  %v5898_v57 = vld [vmem:[%s8956_s11 + $0x1c8] sm:$0xff]  ;;  %v5903_v58 = vld [vmem:[%s8956_s11 + $0x1d0] sm:$0xff] }
  0x18   :  { %8988 = vst [vmem:[#allocation25_spill] sm:$0xff] %v5763_v30  ;;  %v5908_v59 = vld [vmem:[%s8956_s11 + $0x1d8] sm:$0xff]  ;;  %v5913_v60 = vld [vmem:[%s8956_s11 + $0x1e0] sm:$0xff]  ;;  %v5918_v61 = vld [vmem:[%s8956_s11 + $0x1e8] sm:$0xff] }
  0x19   :  { %8989 = vst [vmem:[#allocation26_spill] sm:$0xff] %v5768_v31  ;;  %v5923_v62 = vld [vmem:[%s8956_s11 + $0x1f0] sm:$0xff]  ;;  %v5928_v63 = vld [vmem:[%s8956_s11 + $0x1f8] sm:$0xff] }
  0x1a   :  { %8990 = vst [vmem:[#allocation27_spill] sm:$0xff] %v5773_v32 }
  0x1b   :  { %8991 = vst [vmem:[#allocation28_spill] sm:$0xff] %v5778_v33 }
  0x1c   :  { %8992 = vst [vmem:[#allocation29_spill] sm:$0xff] %v5783_v34  ;;  %v6008_v34 = vld [vmem:[%s8956_s11 + $0x278] sm:$0xff] }
  0x1d   :  { %8993 = vst [vmem:[#allocation30_spill] sm:$0xff] %v5788_v35  ;;  %v6003_v35 = vld [vmem:[%s8956_s11 + $0x270] sm:$0xff] }
  0x1e   :  { %8994 = vst [vmem:[#allocation31_spill] sm:$0xff] %v5793_v36  ;;  %v5998_v36 = vld [vmem:[%s8956_s11 + $0x268] sm:$0xff] }
  0x1f   :  { %8995 = vst [vmem:[#allocation32_spill] sm:$0xff] %v5798_v37  ;;  %v5993_v37 = vld [vmem:[%s8956_s11 + $0x260] sm:$0xff] }
  0x20   :  { %8996 = vst [vmem:[#allocation33_spill] sm:$0xff] %v5803_v38  ;;  %v5988_v38 = vld [vmem:[%s8956_s11 + $0x258] sm:$0xff] }
  0x21   :  { %8997 = vst [vmem:[#allocation34_spill] sm:$0xff] %v5808_v39  ;;  %v5983_v39 = vld [vmem:[%s8956_s11 + $0x250] sm:$0xff] }
  0x22   :  { %8998 = vst [vmem:[#allocation35_spill] sm:$0xff] %v5813_v40  ;;  %v5978_v40 = vld [vmem:[%s8956_s11 + $0x248] sm:$0xff] }
  0x23   :  { %8999 = vst [vmem:[#allocation36_spill] sm:$0xff] %v5818_v41  ;;  %v5973_v41 = vld [vmem:[%s8956_s11 + $0x240] sm:$0xff] }
  0x24   :  { %9000 = vst [vmem:[#allocation37_spill] sm:$0xff] %v5823_v42  ;;  %v5968_v42 = vld [vmem:[%s8956_s11 + $0x238] sm:$0xff] }
  0x25   :  { %9001 = vst [vmem:[#allocation38_spill] sm:$0xff] %v5828_v43  ;;  %v5963_v43 = vld [vmem:[%s8956_s11 + $0x230] sm:$0xff] }
  0x26   :  { %9002 = vst [vmem:[#allocation39_spill] sm:$0xff] %v5833_v44  ;;  %v5958_v44 = vld [vmem:[%s8956_s11 + $0x228] sm:$0xff] }
  0x27   :  { %9003 = vst [vmem:[#allocation40_spill] sm:$0xff] %v5838_v45  ;;  %v5953_v45 = vld [vmem:[%s8956_s11 + $0x220] sm:$0xff] }
  0x28   :  { %9004 = vst [vmem:[#allocation41_spill] sm:$0xff] %v5843_v46  ;;  %v5948_v46 = vld [vmem:[%s8956_s11 + $0x218] sm:$0xff] }
  0x29   :  { %9005 = vst [vmem:[#allocation42_spill] sm:$0xff] %v5848_v47  ;;  %v5943_v47 = vld [vmem:[%s8956_s11 + $0x210] sm:$0xff] }
  0x2a   :  { %9006 = vst [vmem:[#allocation43_spill] sm:$0xff] %v5853_v48  ;;  %v5938_v48 = vld [vmem:[%s8956_s11 + $0x208] sm:$0xff] }
  0x2b   :  { %9007 = vst [vmem:[#allocation44_spill] sm:$0xff] %v5858_v49  ;;  %v5933_v49 = vld [vmem:[%s8956_s11 + $0x200] sm:$0xff] }
  0x2c   :  { %9008 = vst [vmem:[#allocation45_spill] sm:$0xff] %v5903_v58 }
  0x2d   :  { %9009 = vst [vmem:[#allocation46_spill] sm:$0xff] %v5908_v59 }
  0x2e   :  { %9010 = vst [vmem:[#allocation47_spill] sm:$0xff] %v5913_v60 }
  0x2f   :  { %9011 = vst [vmem:[#allocation48_spill] sm:$0xff] %v5918_v61 }
  0x30   :  { %9012 = vst [vmem:[#allocation49_spill] sm:$0xff] %v5923_v62 }
  0x31   :  { %9013 = vst [vmem:[#allocation50_spill] sm:$0xff] %v5928_v63 }
  0x32   :  { %9014 = vst [vmem:[#allocation51_spill] sm:$0xff] %v5933_v49 }
  0x33   :  { %9015 = vst [vmem:[#allocation52_spill] sm:$0xff] %v5938_v48 }
  0x34   :  { %9016 = vst [vmem:[#allocation53_spill] sm:$0xff] %v5943_v47 }
  0x35   :  { %9017 = vst [vmem:[#allocation54_spill] sm:$0xff] %v5948_v46 }
  0x36   :  { %9018 = vst [vmem:[#allocation55_spill] sm:$0xff] %v5953_v45 }
  0x37   :  { %9019 = vst [vmem:[#allocation56_spill] sm:$0xff] %v5958_v44 }
  0x38   :  { %9020 = vst [vmem:[#allocation57_spill] sm:$0xff] %v5963_v43 }
  0x39   :  { %9021 = vst [vmem:[#allocation58_spill] sm:$0xff] %v5968_v42 }
  0x3a   :  { %9022 = vst [vmem:[#allocation59_spill] sm:$0xff] %v5973_v41 }
  0x3b   :  { %9023 = vst [vmem:[#allocation60_spill] sm:$0xff] %v5978_v40 }
  0x3c   :  { %9024 = vst [vmem:[#allocation61_spill] sm:$0xff] %v5983_v39 }
  0x3d   :  { %9025 = vst [vmem:[#allocation62_spill] sm:$0xff] %v5988_v38  ;;  %v6013_v38 = vld [vmem:[%s8956_s11 + $0x280] sm:$0xff] }
  0x3e   :  { %9026 = vst [vmem:[#allocation63_spill] sm:$0xff] %v5993_v37  ;;  %v6018_v37 = vld [vmem:[%s8956_s11 + $0x288] sm:$0xff] }
  0x3f   :  { %9027 = vst [vmem:[#allocation64_spill] sm:$0xff] %v5998_v36  ;;  %v6023_v36 = vld [vmem:[%s8956_s11 + $0x290] sm:$0xff] }
  0x40   :  { %9028 = vst [vmem:[#allocation65_spill] sm:$0xff] %v6003_v35  ;;  %v6028_v35 = vld [vmem:[%s8956_s11 + $0x298] sm:$0xff] }
  0x41   :  { %9029 = vst [vmem:[#allocation66_spill] sm:$0xff] %v6008_v34  ;;  %v6033_v34 = vld [vmem:[%s8956_s11 + $0x2a0] sm:$0xff] }
  0x42   :  { %9030 = vst [vmem:[#allocation67_spill] sm:$0xff] %v6013_v38  ;;  %v6038_v38 = vld [vmem:[%s8956_s11 + $0x2a8] sm:$0xff] }
  0x43   :  { %9031 = vst [vmem:[#allocation68_spill] sm:$0xff] %v6018_v37  ;;  %v6043_v37 = vld [vmem:[%s8956_s11 + $0x2b0] sm:$0xff] }
  0x44   :  { %9032 = vst [vmem:[#allocation69_spill] sm:$0xff] %v6023_v36  ;;  %v6048_v36 = vld [vmem:[%s8956_s11 + $0x2b8] sm:$0xff] }
  0x45   :  { %9033 = vst [vmem:[#allocation70_spill] sm:$0xff] %v6028_v35  ;;  %v6053_v35 = vld [vmem:[%s8956_s11 + $0x2c0] sm:$0xff] }
  0x46   :  { %9034 = vst [vmem:[#allocation71_spill] sm:$0xff] %v6033_v34  ;;  %v6058_v34 = vld [vmem:[%s8956_s11 + $0x2c8] sm:$0xff] }
  0x47   :  { %9035 = vst [vmem:[#allocation72_spill] sm:$0xff] %v6038_v38  ;;  %v6063_v38 = vld [vmem:[%s8956_s11 + $0x2d0] sm:$0xff] }
  0x48   :  { %9036 = vst [vmem:[#allocation73_spill] sm:$0xff] %v6043_v37  ;;  %v6068_v37 = vld [vmem:[%s8956_s11 + $0x2d8] sm:$0xff] }
  0x49   :  { %9037 = vst [vmem:[#allocation74_spill] sm:$0xff] %v6048_v36  ;;  %v6073_v36 = vld [vmem:[%s8956_s11 + $0x2e0] sm:$0xff] }
  0x4a   :  { %9038 = vst [vmem:[#allocation75_spill] sm:$0xff] %v6053_v35  ;;  %v6078_v35 = vld [vmem:[%s8956_s11 + $0x2e8] sm:$0xff] }
  0x4b   :  { %9039 = vst [vmem:[#allocation76_spill] sm:$0xff] %v6058_v34  ;;  %v6083_v34 = vld [vmem:[%s8956_s11 + $0x2f0] sm:$0xff] }
  0x4c   :  { %9040 = vst [vmem:[#allocation77_spill] sm:$0xff] %v6063_v38  ;;  %v6088_v38 = vld [vmem:[%s8956_s11 + $0x2f8] sm:$0xff] }
  0x4d   :  { %9041 = vst [vmem:[#allocation78_spill] sm:$0xff] %v6068_v37  ;;  %v6093_v37 = vld [vmem:[%s8956_s11 + $0x300] sm:$0xff] }
  0x4e   :  { %9042 = vst [vmem:[#allocation79_spill] sm:$0xff] %v6073_v36  ;;  %v6098_v36 = vld [vmem:[%s8956_s11 + $0x308] sm:$0xff] }
  0x4f   :  { %9043 = vst [vmem:[#allocation80_spill] sm:$0xff] %v6078_v35  ;;  %v6103_v35 = vld [vmem:[%s8956_s11 + $0x310] sm:$0xff] }
  0x50   :  { %9044 = vst [vmem:[#allocation81_spill] sm:$0xff] %v6083_v34  ;;  %v6108_v34 = vld [vmem:[%s8956_s11 + $0x318] sm:$0xff] }
  0x51   :  { %9045 = vst [vmem:[#allocation82_spill] sm:$0xff] %v6088_v38  ;;  %v6113_v38 = vld [vmem:[%s8956_s11 + $0x320] sm:$0xff] }
  0x52   :  { %9046 = vst [vmem:[#allocation83_spill] sm:$0xff] %v6093_v37  ;;  %v6118_v37 = vld [vmem:[%s8956_s11 + $0x328] sm:$0xff] }
  0x53   :  { %9047 = vst [vmem:[#allocation84_spill] sm:$0xff] %v6098_v36  ;;  %v6123_v36 = vld [vmem:[%s8956_s11 + $0x330] sm:$0xff] }
  0x54   :  { %9048 = vst [vmem:[#allocation85_spill] sm:$0xff] %v6103_v35  ;;  %v6128_v35 = vld [vmem:[%s8956_s11 + $0x338] sm:$0xff] }
  0x55   :  { %9049 = vst [vmem:[#allocation86_spill] sm:$0xff] %v6108_v34  ;;  %v6133_v34 = vld [vmem:[%s8956_s11 + $0x340] sm:$0xff] }
  0x56   :  { %9050 = vst [vmem:[#allocation87_spill] sm:$0xff] %v6113_v38  ;;  %v6138_v38 = vld [vmem:[%s8956_s11 + $0x348] sm:$0xff] }
  0x57   :  { %9051 = vst [vmem:[#allocation88_spill] sm:$0xff] %v6118_v37  ;;  %v6143_v37 = vld [vmem:[%s8956_s11 + $0x350] sm:$0xff] }
  0x58   :  { %9052 = vst [vmem:[#allocation89_spill] sm:$0xff] %v6123_v36  ;;  %v6148_v36 = vld [vmem:[%s8956_s11 + $0x358] sm:$0xff] }
  0x59   :  { %9053 = vst [vmem:[#allocation90_spill] sm:$0xff] %v6128_v35  ;;  %v6153_v35 = vld [vmem:[%s8956_s11 + $0x360] sm:$0xff] }
  0x5a   :  { %9054 = vst [vmem:[#allocation91_spill] sm:$0xff] %v6133_v34  ;;  %v6158_v34 = vld [vmem:[%s8956_s11 + $0x368] sm:$0xff] }
  0x5b   :  { %9055 = vst [vmem:[#allocation92_spill] sm:$0xff] %v6138_v38  ;;  %v6163_v38 = vld [vmem:[%s8956_s11 + $0x370] sm:$0xff] }
  0x5c   :  { %9056 = vst [vmem:[#allocation93_spill] sm:$0xff] %v6143_v37  ;;  %v6168_v37 = vld [vmem:[%s8956_s11 + $0x378] sm:$0xff] }
  0x5d   :  { %9057 = vst [vmem:[#allocation94_spill] sm:$0xff] %v6148_v36  ;;  %v6173_v36 = vld [vmem:[%s8956_s11 + $0x380] sm:$0xff] }
  0x5e   :  { %9058 = vst [vmem:[#allocation95_spill] sm:$0xff] %v6153_v35  ;;  %v6178_v35 = vld [vmem:[%s8956_s11 + $0x388] sm:$0xff] }
  0x5f   :  { %9059 = vst [vmem:[#allocation96_spill] sm:$0xff] %v6158_v34  ;;  %v6183_v34 = vld [vmem:[%s8956_s11 + $0x390] sm:$0xff] }
  0x60   :  { %9060 = vst [vmem:[#allocation97_spill] sm:$0xff] %v6163_v38  ;;  %v6188_v38 = vld [vmem:[%s8956_s11 + $0x398] sm:$0xff] }
  0x61   :  { %9061 = vst [vmem:[#allocation98_spill] sm:$0xff] %v6168_v37  ;;  %v6193_v37 = vld [vmem:[%s8956_s11 + $0x3a0] sm:$0xff] }
  0x62   :  { %9062 = vst [vmem:[#allocation99_spill] sm:$0xff] %v6173_v36  ;;  %v6198_v36 = vld [vmem:[%s8956_s11 + $0x3a8] sm:$0xff] }
  0x63   :  { %9063 = vst [vmem:[#allocation100_spill] sm:$0xff] %v6178_v35  ;;  %v6203_v35 = vld [vmem:[%s8956_s11 + $0x3b0] sm:$0xff] }
  0x64   :  { %9064 = vst [vmem:[#allocation101_spill] sm:$0xff] %v6183_v34  ;;  %v6208_v34 = vld [vmem:[%s8956_s11 + $0x3b8] sm:$0xff] }
  0x65   :  { %9065 = vst [vmem:[#allocation102_spill] sm:$0xff] %v6188_v38  ;;  %v6213_v38 = vld [vmem:[%s8956_s11 + $0x3c0] sm:$0xff] }
  0x66   :  { %9066 = vst [vmem:[#allocation103_spill] sm:$0xff] %v6193_v37  ;;  %v6218_v37 = vld [vmem:[%s8956_s11 + $0x3c8] sm:$0xff] }
  0x67   :  { %9067 = vst [vmem:[#allocation104_spill] sm:$0xff] %v6198_v36  ;;  %v6223_v36 = vld [vmem:[%s8956_s11 + $0x3d0] sm:$0xff] }
  0x68   :  { %9068 = vst [vmem:[#allocation105_spill] sm:$0xff] %v6203_v35  ;;  %v6228_v35 = vld [vmem:[%s8956_s11 + $0x3d8] sm:$0xff] }
  0x69   :  { %9069 = vst [vmem:[#allocation106_spill] sm:$0xff] %v6208_v34  ;;  %v6233_v34 = vld [vmem:[%s8956_s11 + $0x3e0] sm:$0xff] }
  0x6a   :  { %9070 = vst [vmem:[#allocation107_spill] sm:$0xff] %v6213_v38  ;;  %v6238_v38 = vld [vmem:[%s8956_s11 + $0x3e8] sm:$0xff] }
  0x6b   :  { %9071 = vst [vmem:[#allocation108_spill] sm:$0xff] %v6218_v37  ;;  %v6243_v37 = vld [vmem:[%s8956_s11 + $0x3f0] sm:$0xff] }
  0x6c   :  { %9072 = vst [vmem:[#allocation109_spill] sm:$0xff] %v6223_v36  ;;  %v6248_v36 = vld [vmem:[%s8956_s11 + $0x3f8] sm:$0xff] }
  0x6d   :  { %9073 = vst [vmem:[#allocation110_spill] sm:$0xff] %v6228_v35  ;;  %v6253_v35 = vld [vmem:[%s8956_s11 + $0x400] sm:$0xff] }
  0x6e   :  { %9074 = vst [vmem:[#allocation111_spill] sm:$0xff] %v6233_v34  ;;  %v6258_v34 = vld [vmem:[%s8956_s11 + $0x408] sm:$0xff] }
  0x6f   :  { %9075 = vst [vmem:[#allocation112_spill] sm:$0xff] %v6238_v38  ;;  %v6263_v38 = vld [vmem:[%s8956_s11 + $0x410] sm:$0xff] }
  0x70   :  { %9076 = vst [vmem:[#allocation113_spill] sm:$0xff] %v6243_v37  ;;  %v6268_v37 = vld [vmem:[%s8956_s11 + $0x418] sm:$0xff] }
  0x71   :  { %9077 = vst [vmem:[#allocation114_spill] sm:$0xff] %v6248_v36  ;;  %v6273_v36 = vld [vmem:[%s8956_s11 + $0x420] sm:$0xff] }
  0x72   :  { %9078 = vst [vmem:[#allocation115_spill] sm:$0xff] %v6253_v35  ;;  %v6278_v35 = vld [vmem:[%s8956_s11 + $0x428] sm:$0xff] }
  0x73   :  { %9079 = vst [vmem:[#allocation116_spill] sm:$0xff] %v6258_v34  ;;  %v6283_v34 = vld [vmem:[%s8956_s11 + $0x430] sm:$0xff] }
  0x74   :  { %9080 = vst [vmem:[#allocation117_spill] sm:$0xff] %v6263_v38  ;;  %v6288_v38 = vld [vmem:[%s8956_s11 + $0x438] sm:$0xff] }
  0x75   :  { %9081 = vst [vmem:[#allocation118_spill] sm:$0xff] %v6268_v37  ;;  %v6293_v37 = vld [vmem:[%s8956_s11 + $0x440] sm:$0xff] }
  0x76   :  { %9082 = vst [vmem:[#allocation119_spill] sm:$0xff] %v6273_v36  ;;  %v6298_v36 = vld [vmem:[%s8956_s11 + $0x448] sm:$0xff] }
  0x77   :  { %9083 = vst [vmem:[#allocation120_spill] sm:$0xff] %v6278_v35  ;;  %v6303_v35 = vld [vmem:[%s8956_s11 + $0x450] sm:$0xff] }
  0x78   :  { %9084 = vst [vmem:[#allocation121_spill] sm:$0xff] %v6283_v34  ;;  %v6308_v34 = vld [vmem:[%s8956_s11 + $0x458] sm:$0xff] }
  0x79   :  { %9085 = vst [vmem:[#allocation122_spill] sm:$0xff] %v6288_v38  ;;  %v6313_v38 = vld [vmem:[%s8956_s11 + $0x460] sm:$0xff] }
  0x7a   :  { %9086 = vst [vmem:[#allocation123_spill] sm:$0xff] %v6293_v37  ;;  %v6318_v37 = vld [vmem:[%s8956_s11 + $0x468] sm:$0xff] }
  0x7b   :  { %9087 = vst [vmem:[#allocation124_spill] sm:$0xff] %v6298_v36  ;;  %v6323_v36 = vld [vmem:[%s8956_s11 + $0x470] sm:$0xff] }
  0x7c   :  { %9088 = vst [vmem:[#allocation125_spill] sm:$0xff] %v6303_v35  ;;  %v6328_v35 = vld [vmem:[%s8956_s11 + $0x478] sm:$0xff] }
  0x7d   :  { %9089 = vst [vmem:[#allocation126_spill] sm:$0xff] %v6308_v34 }
  0x7e   :  { %9090 = vst [vmem:[#allocation127_spill] sm:$0xff] %v6313_v38 }
  0x7f   :  { %9091 = vst [vmem:[#allocation128_spill] sm:$0xff] %v6318_v37 }
  0x80   :  { %9092 = vst [vmem:[#allocation129_spill] sm:$0xff] %v6323_v36 }
  0x81   :  { %9093 = vst [vmem:[#allocation130_spill] sm:$0xff] %v6328_v35 }
  0x82   :  { %358 = vsyncadd [#allocation3], 18432  ;;  %s9094_s19 = sld [smem:[#allocation133_spill]]  ;;  %vm379_vm0 = vcmask 261120   ;;  %vm495_vm1 = vcmask 130048  }
  0x83   :  { %s9095_s25 = sld [smem:[#allocation132_spill]] }
  0x84   :  { %s9097_s27 = sld [smem:[#allocation134_spill]] }
  0x88   :  { %v378_v38 = vld [vmem:[%s9094_s19 + $0x18] sm:$0xff]  ;;  %v377_v34 = vld [vmem:[%s9094_s19 + $0x10] sm:$0xff]  ;;  %v376_v37 = vld [vmem:[%s9094_s19 + $0x8] sm:$0xff] }
  0x89   :  { %440 = vmatpush.msra.mxu0 %v378_v38  ;;  %v375_v36 = vld [vmem:[%s9094_s19] sm:$0xff]  ;;  %v360_v38 = vld [vmem:[%s9095_s25 + $0x8] sm:$0xff] }
  0x8a   :  { %v359_v35 = vld [vmem:[%s9095_s25] sm:$0xff] }
  0x8b   :  { %441 = vmatpush.msra.mxu0 %v377_v34  ;;  %v361_v34 = vld [vmem:[%s9095_s25 + $0x10] sm:$0xff] }
  0x8d   :  { %442 = vmatpush.msra.mxu0 %v376_v37  ;;  %v362_v37 = vld [vmem:[%s9095_s25 + $0x18] sm:$0xff] }
  0x8f   :  { %443 = vmatpush.msra.mxu0 %v375_v36  ;;  %v364_v36 = vld [vmem:[%s9095_s25 + $0x28] sm:$0xff] }
  0x90   :  { %4943 = vmatmul.msk.f32.vlgmr.msra.gmra.mxu0 %vm379_vm0, %v359_v35  ;;  %v363_v35 = vld [vmem:[%s9095_s25 + $0x20] sm:$0xff] }
  0x98   :  { %4944 = vmatmul.msk.f32.gmra.mxu0 %vm379_vm0, %v360_v38  ;;  %v365_v38 = vld [vmem:[%s9095_s25 + $0x30] sm:$0xff] }
  0xa0   :  { %4945 = vmatmul.msk.f32.gmra.mxu0 %vm379_vm0, %v361_v34  ;;  %v366_v34 = vld [vmem:[%s9095_s25 + $0x38] sm:$0xff] }
  0xa8   :  { %4946 = vmatmul.msk.f32.gmra.mxu0 %vm379_vm0, %v362_v37  ;;  %v367_v37 = vld [vmem:[%s9095_s25 + $0x40] sm:$0xff] }
  0xb0   :  { %4947 = vmatmul.msk.f32.gmra.mxu0 %vm379_vm0, %v363_v35  ;;  %v368_v35 = vld [vmem:[%s9095_s25 + $0x48] sm:$0xff] }
  0xb8   :  { %4948 = vmatmul.msk.f32.gmra.mxu0 %vm379_vm0, %v364_v36  ;;  %v369_v36 = vld [vmem:[%s9095_s25 + $0x50] sm:$0xff] }
  0xc0   :  { %4949 = vmatmul.msk.f32.gmra.mxu0 %vm379_vm0, %v365_v38  ;;  %v370_v38 = vld [vmem:[%s9095_s25 + $0x58] sm:$0xff] }
  0xc8   :  { %4950 = vmatmul.msk.f32.gmra.mxu0 %vm379_vm0, %v366_v34  ;;  %v371_v34 = vld [vmem:[%s9095_s25 + $0x60] sm:$0xff] }
  0xd0   :  { %4951 = vmatmul.msk.f32.gmra.mxu0 %vm379_vm0, %v367_v37  ;;  %v372_v37 = vld [vmem:[%s9095_s25 + $0x68] sm:$0xff] }
  0xd8   :  { %4952 = vmatmul.msk.f32.gmra.mxu0 %vm379_vm0, %v368_v35  ;;  %v373_v35 = vld [vmem:[%s9095_s25 + $0x70] sm:$0xff] }
  0xe0   :  { %4953 = vmatmul.msk.f32.gmra.mxu0 %vm379_vm0, %v369_v36  ;;  %v374_v36 = vld [vmem:[%s9095_s25 + $0x78] sm:$0xff] }
  0xe8   :  { %4954 = vmatmul.msk.f32.gmra.mxu0 %vm379_vm0, %v370_v38 }
  0xf0   :  { %4955 = vmatmul.msk.f32.gmra.mxu0 %vm379_vm0, %v371_v34 }
  0xf8   :  { %4956 = vmatmul.msk.f32.gmra.mxu0 %vm379_vm0, %v372_v37 }
 0x100   :  { %4957 = vmatmul.msk.f32.gmra.mxu0 %vm379_vm0, %v373_v35 }
 0x108   :  { %4958 = vmatmul.msk.f32.gmra.mxu0 %vm379_vm0, %v374_v36 }
 0x10d   :  { %v6406_v38 = vpop.f32.mrf.mxu0 }
 0x10e   :  { %v541_v29 = vmul.f32 %v6406_v38, %v6406_v38  ;;  %v496_v44 = vsel %vm495_vm1, %v6406_v38, 0.0 }
 0x110   :  { %v557_v25 = vsel %vm495_vm1, %v541_v29, 0.0 }
 0x115   :  { %v6408_v34 = vpop.f32.mrf.mxu0 }
 0x116   :  { %v542_v42 = vmul.f32 %v6408_v34, %v6408_v34  ;;  %v497_v43 = vsel %vm495_vm1, %v6408_v34, 0.0 }
 0x117   :  { %v498_v46 = vadd.f32 %v497_v43, %v496_v44 }
 0x118   :  { %v558_v27 = vsel %vm495_vm1, %v542_v42, 0.0 }
 0x119   :  { %v559_v23 = vadd.f32 %v558_v27, %v557_v25 }
 0x11d   :  { %v6410_v33 = vpop.f32.mrf.mxu0 }
 0x11e   :  { %v543_v28 = vmul.f32 %v6410_v33, %v6410_v33  ;;  %v499_v45 = vsel %vm495_vm1, %v6410_v33, 0.0 }
 0x11f   :  { %v500_v49 = vadd.f32 %v499_v45, %v498_v46 }
 0x120   :  { %v560_v47 = vsel %vm495_vm1, %v543_v28, 0.0 }
 0x121   :  { %v561_v43 = vadd.f32 %v560_v47, %v559_v23 }
 0x125   :  { %v6412_v39 = vpop.f32.mrf.mxu0 }
 0x126   :  { %v544_v26 = vmul.f32 %v6412_v39, %v6412_v39  ;;  %v501_v24 = vsel %vm495_vm1, %v6412_v39, 0.0 }
 0x127   :  { %v502_v28 = vadd.f32 %v501_v24, %v500_v49 }
 0x128   :  { %v562_v22 = vsel %vm495_vm1, %v544_v26, 0.0 }
 0x129   :  { %v563_v27 = vadd.f32 %v562_v22, %v561_v43 }
 0x12d   :  { %v6414_v37 = vpop.f32.mrf.mxu0 }
 0x12e   :  { %v545_v48 = vmul.f32 %v6414_v37, %v6414_v37  ;;  %v503_v63 = vsel %vm495_vm1, %v6414_v37, 0.0 }
 0x12f   :  { %v504_v45 = vadd.f32 %v503_v63, %v502_v28 }
 0x130   :  { %v564_v44 = vsel %vm495_vm1, %v545_v48, 0.0 }
 0x131   :  { %v565_v23 = vadd.f32 %v564_v44, %v563_v27 }
 0x135   :  { %v6416_v32 = vpop.f32.mrf.mxu0 }
 0x136   :  { %v546_v29 = vmul.f32 %v6416_v32, %v6416_v32  ;;  %v505_v21 = vsel %vm495_vm1, %v6416_v32, 0.0 }
 0x137   :  { %v506_v24 = vadd.f32 %v505_v21, %v504_v45 }
 0x138   :  { %v566_v26 = vsel %vm495_vm1, %v546_v29, 0.0 }
 0x139   :  { %v567_v22 = vadd.f32 %v566_v26, %v565_v23 }
 0x13d   :  { %v6418_v40 = vpop.f32.mrf.mxu0 }
 0x13e   :  { %v547_v25 = vmul.f32 %v6418_v40, %v6418_v40  ;;  %v507_v46 = vsel %vm495_vm1, %v6418_v40, 0.0 }
 0x13f   :  { %v508_v63 = vadd.f32 %v507_v46, %v506_v24  ;;  %v5510_v24 = vmov 128.0  }
 0x140   :  { %v568_v47 = vsel %vm495_vm1, %v547_v25, 0.0  ;;  %5439 = vrcp.f32 %v5510_v24 }
 0x141   :  { %v569_v44 = vadd.f32 %v568_v47, %v567_v22 }
 0x145   :  { %v6420_v35 = vpop.f32.mrf.mxu0 }
 0x146   :  { %v548_v62 = vmul.f32 %v6420_v35, %v6420_v35  ;;  %v509_v48 = vsel %vm495_vm1, %v6420_v35, 0.0 }
 0x147   :  { %v510_v25 = vadd.f32 %v509_v48, %v508_v63 }
 0x148   :  { %v570_v29 = vsel %vm495_vm1, %v548_v62, 0.0 }
 0x149   :  { %v571_v46 = vadd.f32 %v570_v29, %v569_v44 }
 0x14d   :  { %v6422_v31 = vpop.f32.mrf.mxu0 }
 0x14e   :  { %v549_v49 = vmul.f32 %v6422_v31, %v6422_v31  ;;  %v511_v28 = vsel %vm495_vm1, %v6422_v31, 0.0 }
 0x14f   :  { %v512_v23 = vadd.f32 %v511_v28, %v510_v25 }
 0x150   :  { %v572_v27 = vsel %vm495_vm1, %v549_v49, 0.0 }
 0x151   :  { %v573_v48 = vadd.f32 %v572_v27, %v571_v46 }
 0x155   :  { %v6424_v41 = vpop.f32.mrf.mxu0 }
 0x156   :  { %v550_v21 = vmul.f32 %v6424_v41, %v6424_v41  ;;  %v513_v45 = vsel %vm495_vm1, %v6424_v41, 0.0 }
 0x157   :  { %v514_v49 = vadd.f32 %v513_v45, %v512_v23  ;;  %v5440_v45 = vpop.eup %5439 }
 0x158   :  { %v574_v62 = vsel %vm495_vm1, %v550_v21, 0.0  ;;  %v534_v19 = vmul.f32 128.0, %v5440_v45  ;;  %vm538_vm2 = vweird.f32 %v5440_v45 }
 0x159   :  { %v575_v28 = vadd.f32 %v574_v62, %v573_v48 }
 0x15a   :  { %v535_v59 = vsub.f32 1.0, %v534_v19 }
 0x15d   :  { %v6426_v36 = vpop.f32.mrf.mxu0 }
 0x15e   :  { %v551_v26 = vmul.f32 %v6426_v36, %v6426_v36  ;;  %v515_v20 = vsel %vm495_vm1, %v6426_v36, 0.0 }
 0x15f   :  { %v516_v44 = vadd.f32 %v515_v20, %v514_v49 }
 0x160   :  { %v576_v22 = vsel %vm495_vm1, %v551_v26, 0.0 }
 0x161   :  { %v577_v26 = vadd.f32 %v576_v22, %v575_v28 }
 0x165   :  { %v6428_v30 = vpop.f32.mrf.mxu0 }
 0x166   :  { %v552_v47 = vmul.f32 %v6428_v30, %v6428_v30  ;;  %v517_v63 = vsel %vm495_vm1, %v6428_v30, 0.0 }
 0x167   :  { %v518_v46 = vadd.f32 %v517_v63, %v516_v44 }
 0x168   :  { %v578_v21 = vsel %vm495_vm1, %v552_v47, 0.0 }
 0x169   :  { %v579_v62 = vadd.f32 %v578_v21, %v577_v26 }
 0x16d   :  { %v6451_v42 = vpop.f32.mrf.mxu0 }
 0x16e   :  { %v553_v29 = vmul.f32 %v6451_v42, %v6451_v42  ;;  %v519_v24 = vsel %vm495_vm1, %v6451_v42, 0.0 }
 0x16f   :  { %v520_v48 = vadd.f32 %v519_v24, %v518_v46  ;;  %v536_v46 = vmul.f32 %v5440_v45, %v535_v59 }
 0x170   :  { %v580_v23 = vsel %vm495_vm1, %v553_v29, 0.0 }
 0x171   :  { %v581_v60 = vadd.f32 %v580_v23, %v579_v62  ;;  %v537_v62 = vadd.f32 %v5440_v45, %v536_v46 }
 0x175   :  { %v6473_v43 = vpop.f32.mrf.mxu0 }
 0x176   :  { %v554_v27 = vmul.f32 %v6473_v43, %v6473_v43  ;;  %v521_v61 = vsel %vm495_vm1, %v6473_v43, 0.0 }
 0x177   :  { %v522_v18 = vadd.f32 %v521_v61, %v520_v48 }
 0x178   :  { %v582_v47 = vsel %vm495_vm1, %v554_v27, 0.0 }
 0x179   :  { %v583_v63 = vadd.f32 %v582_v47, %v581_v60  ;;  %v6513_v47 = vsel %vm538_vm2, %v5440_v45, %v537_v62  ;;  %v493_v45 = vld [vmem:[%s9097_s27] sm:$0x1] }
 0x17a   :  { %9096 = vst [vmem:[#allocation131_spill] sm:$0xff] %v6513_v47 }
 0x17d   :  { %v6495_v25 = vpop.f32.mrf.mxu0 }
 0x17e   :  { %v555_v20 = vmul.f32 %v6495_v25, %v6495_v25  ;;  %v523_v49 = vsel %vm495_vm1, %v6495_v25, 0.0 }
 0x17f   :  { %v524_v29 = vadd.f32 %v523_v49, %v522_v18 }
 0x180   :  { %v584_v22 = vsel %vm495_vm1, %v555_v20, 0.0 }
 0x181   :  { %v585_v58 = vadd.f32 %v584_v22, %v583_v63 }
 0x185   :  { %v490_v28 = vpop.f32.mrf.mxu0 }
 0x186   :  { %v525_v44 = vsel %vm495_vm1, %v490_v28, 0.0  ;;  %v556_v17 = vmul.f32 %v490_v28, %v490_v28 }
 0x187   :  { %v526_v21 = vadd.f32 %v525_v44, %v524_v29 }
 0x188   :  { %v586_v24 = vsel %vm495_vm1, %v556_v17, 0.0 }
 0x189   :  { %v527_v27 = vrot.slane %v526_v21, 4  ;;  %v587_v26 = vadd.f32 %v586_v24, %v585_v58 }
 0x18b   :  { %v528_v16 = vadd.f32 %v527_v27, %v526_v21  ;;  %v588_v7 = vrot.slane %v587_v26, 4 }
 0x18d   :  { %v529_v23 = vrot.slane %v528_v16, 2  ;;  %v589_v61 = vadd.f32 %v588_v7, %v587_v26 }
 0x18f   :  { %v530_v20 = vadd.f32 %v529_v23, %v528_v16  ;;  %v590_v18 = vrot.slane %v589_v61, 2  ;;  %v494_v23 = vld [vmem:[%s9097_s27 + $0x1] sm:$0x1] }
 0x191   :  { %v531_v60 = vrot.slane %v530_v20, 1  ;;  %v591_v48 = vadd.f32 %v590_v18, %v589_v61 }
 0x193   :  { %v532_v19 = vadd.f32 %v531_v60, %v530_v20  ;;  %v592_v49 = vrot.slane %v591_v48, 1 }
 0x195   :  { %v540_v22 = vmul.f32 %v6513_v47, %v532_v19  ;;  %v593_v17 = vadd.f32 %v592_v49, %v591_v48 }
 0x197   :  { %v594_v58 = vmul.f32 %v593_v17, %v6513_v47  ;;  %v595_v59 = vmul.f32 %v540_v22, %v540_v22 }
 0x199   :  { %v596_v63 = vsub.f32 %v594_v58, %v595_v59 }
 0x19b   :  { %v597_v29 = vadd.f32 1e-05, %v596_v63 }
 0x19d   :  { %5441 = vrsqrt.f32 %v597_v29  ;;  %vm604_vm4 = vweird.f32 %v597_v29 }
 0x1a3   :  { %v5442_v7 = vpop.eup %5441 }
 0x1a4   :  { %v599_v44 = vmul.f32 %v5442_v7, %v597_v29  ;;  %vm605_vm3 = vweird.f32 %v5442_v7 }
 0x1a5   :  { %vm606_vm5 = vmor %vm604_vm4, %vm605_vm3 }
 0x1a6   :  { %v600_v16 = vmul.f32 %v5442_v7, %v599_v44 }
 0x1a8   :  { %v601_v21 = vmul.f32 0.5, %v600_v16 }
 0x1aa   :  { %v602_v24 = vsub.f32 1.5, %v601_v21 }
 0x1ac   :  { %v603_v27 = vmul.f32 %v5442_v7, %v602_v24 }
 0x1ae   :  { %v607_v26 = vsel %vm606_vm5, %v5442_v7, %v603_v27 }
 0x1af   :  { %v608_v46 = vmul.f32 %v607_v26, %v493_v45 }
 0x1b1   :  { %v609_v61 = vmul.f32 %v608_v46, %v540_v22  ;;  %v6523_v62 = vperm.slane %v608_v46, 0 }
 0x1b3   :  { %v610_v20 = vsub.f32 %v494_v23, %v609_v61  ;;  %v627_v18 = vmul.f32 %v6523_v62, %v490_v28  ;;  %v626_v48 = vmul.f32 %v6523_v62, %v6495_v25  ;;  %v625_v19 = vmul.f32 %v6523_v62, %v6473_v43 }
 0x1b4   :  { %v624_v22 = vmul.f32 %v6523_v62, %v6451_v42  ;;  %v623_v28 = vmul.f32 %v6523_v62, %v6428_v30  ;;  %v622_v44 = vmul.f32 %v6523_v62, %v6426_v36  ;;  %v621_v30 = vmul.f32 %v6523_v62, %v6424_v41 }
 0x1b5   :  { %v6526_v60 = vperm.slane %v610_v20, 0  ;;  %v620_v26 = vmul.f32 %v6523_v62, %v6422_v31  ;;  %v619_v61 = vmul.f32 %v6523_v62, %v6420_v35 }
 0x1b7   :  { %v644_v49 = vadd.f32 %v6526_v60, %v627_v18  ;;  %v643_v17 = vadd.f32 %v6526_v60, %v626_v48  ;;  %v642_v58 = vadd.f32 %v6526_v60, %v625_v19  ;;  %v641_v25 = vadd.f32 %v6526_v60, %v624_v22 }
 0x1b8   :  { %v640_v7 = vadd.f32 %v6526_v60, %v623_v28  ;;  %v639_v21 = vadd.f32 %v6526_v60, %v622_v44  ;;  %v638_v27 = vadd.f32 %v6526_v60, %v621_v30  ;;  %v637_v23 = vadd.f32 %v6526_v60, %v620_v26 }
 0x1b9   :  { %vm660_vm6 = vcmp.ge.f32.partialorder %v644_v49, 0.0  ;;  %v676_v59 = vmul.f32 0.01, %v644_v49  ;;  %v675_v63 = vmul.f32 0.01, %v643_v17  ;;  %vm659_vm7 = vcmp.ge.f32.partialorder %v643_v17, 0.0 }
 0x1ba   :  { %v674_v43 = vmul.f32 0.01, %v642_v58  ;;  %vm658_vm8 = vcmp.ge.f32.partialorder %v642_v58, 0.0  ;;  %v673_v42 = vmul.f32 0.01, %v641_v25  ;;  %vm657_vm9 = vcmp.ge.f32.partialorder %v641_v25, 0.0 }
 0x1bb   :  { %v692_v29 = vsel %vm660_vm6, %v644_v49, %v676_v59  ;;  %v691_v16 = vsel %vm659_vm7, %v643_v17, %v675_v63  ;;  %v672_v45 = vmul.f32 0.01, %v640_v7  ;;  %vm656_vm10 = vcmp.ge.f32.partialorder %v640_v7, 0.0 }
 0x1bc   :  { %729 = vmatpush.msra.mxu1 %v692_v29  ;;  %v690_v24 = vsel %vm658_vm8, %v642_v58, %v674_v43  ;;  %v689_v36 = vsel %vm657_vm9, %v641_v25, %v673_v42  ;;  %v671_v46 = vmul.f32 0.01, %v639_v21  ;;  %vm655_vm11 = vcmp.ge.f32.partialorder %v639_v21, 0.0 }
 0x1bd   :  { %v688_v41 = vsel %vm656_vm10, %v640_v7, %v672_v45  ;;  %v670_v20 = vmul.f32 0.01, %v638_v27  ;;  %v636_v18 = vadd.f32 %v6526_v60, %v619_v61  ;;  %v618_v48 = vmul.f32 %v6523_v62, %v6418_v40  ;;  %v695_v61 = vld [vmem:[%s8948_s3 + $0x10] sm:$0xff] }
 0x1be   :  { %730 = vmatpush.msra.mxu1 %v691_v16  ;;  %vm654_vm12 = vcmp.ge.f32.partialorder %v638_v27, 0.0  ;;  %v687_v31 = vsel %vm655_vm11, %v639_v21, %v671_v46  ;;  %v669_v19 = vmul.f32 0.01, %v637_v23  ;;  %v617_v17 = vmul.f32 %v6523_v62, %v6416_v32 }
 0x1bf   :  { %v635_v49 = vadd.f32 %v6526_v60, %v618_v48  ;;  %vm653_vm13 = vcmp.ge.f32.partialorder %v637_v23, 0.0  ;;  %v686_v35 = vsel %vm654_vm12, %v638_v27, %v670_v20  ;;  %v668_v58 = vmul.f32 0.01, %v636_v18  ;;  %v697_v20 = vld [vmem:[%s8948_s3 + $0x20] sm:$0xff]  ;;  %v699_v48 = vld [vmem:[%s8948_s3 + $0x30] sm:$0xff] }
 0x1c0   :  { %731 = vmatpush.msra.mxu1 %v690_v24  ;;  %v634_v22 = vadd.f32 %v6526_v60, %v617_v17  ;;  %v616_v28 = vmul.f32 %v6523_v62, %v6414_v37  ;;  %vm652_vm14 = vcmp.ge.f32.partialorder %v636_v18, 0.0  ;;  %v685_v40 = vsel %vm653_vm13, %v637_v23, %v669_v19  ;;  %v701_v19 = vld [vmem:[%s8948_s3 + $0x40] sm:$0xff]  ;;  %v703_v17 = vld [vmem:[%s8948_s3 + $0x50] sm:$0xff] }
 0x1c1   :  { %v667_v59 = vmul.f32 0.01, %v635_v49  ;;  %v615_v25 = vmul.f32 %v6523_v62, %v6412_v39  ;;  %vm651_vm15 = vcmp.ge.f32.partialorder %v635_v49, 0.0  ;;  %v684_v32 = vsel %vm652_vm14, %v636_v18, %v668_v58  ;;  %v698_v18 = vld [vmem:[%s8948_s3 + $0x28] sm:$0xff] }
 0x1c2   :  { %732 = vmatpush.msra.mxu1 %v689_v36  ;;  %v633_v63 = vadd.f32 %v6526_v60, %v616_v28  ;;  %v666_v29 = vmul.f32 0.01, %v634_v22  ;;  %v614_v7 = vmul.f32 %v6523_v62, %v6410_v33  ;;  %vm650_vm2 = vcmp.ge.f32.partialorder %v634_v22, 0.0  ;;  %v855_v58 = vld [vmem:[%s8949_s4 + $0x8] sm:$0xff]  ;;  %v854_v28 = vld [vmem:[%s8949_s4] sm:$0xff] }
 0x1c3   :  { %v632_v43 = vadd.f32 %v6526_v60, %v615_v25  ;;  %v683_v37 = vsel %vm651_vm15, %v635_v49, %v667_v59  ;;  %v613_v42 = vmul.f32 %v6523_v62, %v6408_v34  ;;  %v612_v24 = vmul.f32 %v6523_v62, %v6406_v38  ;;  %v693_v38 = vld [vmem:[%s8948_s3] sm:$0xff]  ;;  %v702_v49 = vld [vmem:[%s8948_s3 + $0x48] sm:$0xff]  ;;  %926 = vmatpush.msra.mxu3 %v855_v58  ;;  %v707_v59 = vld [vmem:[%s8948_s3 + $0x70] sm:$0xff] }
 0x1c4   :  { %733 = vmatpush.msra.mxu1 %v688_v41  ;;  %v665_v44 = vmul.f32 0.01, %v633_v63  ;;  %v631_v16 = vadd.f32 %v6526_v60, %v614_v7  ;;  %vm649_vm3 = vcmp.ge.f32.partialorder %v633_v63, 0.0  ;;  %v682_v39 = vsel %vm650_vm2, %v634_v22, %v666_v29  ;;  %v696_v41 = vld [vmem:[%s8948_s3 + $0x18] sm:$0xff]  ;;  %v705_v22 = vld [vmem:[%s8948_s3 + $0x60] sm:$0xff] }
 0x1c5   :  { %v664_v21 = vmul.f32 0.01, %v632_v43  ;;  %v630_v30 = vadd.f32 %v6526_v60, %v613_v42  ;;  %vm648_vm4 = vcmp.ge.f32.partialorder %v632_v43, 0.0  ;;  %v629_v27 = vadd.f32 %v6526_v60, %v612_v24  ;;  %v694_v60 = vld [vmem:[%s8948_s3 + $0x8] sm:$0xff]  ;;  %927 = vmatpush.msra.mxu3 %v854_v28  ;;  %v4960_v25 = vld [vmem:[%s8949_s4 + $0x18] sm:$0xff]  ;;  %v709_v29 = vld [vmem:[%s8948_s3 + $0x80] sm:$0xff] }
 0x1c6   :  { %734 = vmatpush.msra.mxu1 %v687_v31  ;;  %v681_v33 = vsel %vm649_vm3, %v633_v63, %v665_v44  ;;  %v663_v45 = vmul.f32 0.01, %v631_v16  ;;  %vm647_vm5 = vcmp.ge.f32.partialorder %v631_v16, 0.0  ;;  %v700_v31 = vld [vmem:[%s8948_s3 + $0x38] sm:$0xff]  ;;  %885 = vmatpush.msra.mxu2 %v4960_v25  ;;  %v713_v24 = vld [vmem:[%s8948_s3 + $0xa0] sm:$0xff] }
 0x1c7   :  { %v680_v26 = vsel %vm648_vm4, %v632_v43, %v664_v21  ;;  %v662_v36 = vmul.f32 0.01, %v630_v30  ;;  %vm646_vm6 = vcmp.ge.f32.partialorder %v630_v30, 0.0  ;;  %v661_v46 = vmul.f32 0.01, %v629_v27  ;;  %v708_v63 = vld [vmem:[%s8948_s3 + $0x78] sm:$0xff] }
 0x1c8   :  { %735 = vmatpush.msra.mxu1 %v686_v35  ;;  %v679_v34 = vsel %vm647_vm5, %v631_v16, %v663_v45  ;;  %vm645_vm7 = vcmp.ge.f32.partialorder %v629_v27, 0.0  ;;  %v704_v35 = vld [vmem:[%s8948_s3 + $0x58] sm:$0xff]  ;;  %v4959_v43 = vld [vmem:[%s8949_s4 + $0x10] sm:$0xff]  ;;  %v4970_v21 = vld [vmem:[%s8949_s4 + $0x28] sm:$0xff] }
 0x1c9   :  { %v678_v23 = vsel %vm646_vm6, %v630_v30, %v662_v36  ;;  %v677_v62 = vsel %vm645_vm7, %v629_v27, %v661_v46  ;;  %886 = vmatpush.msra.mxu2 %v4959_v43  ;;  %v711_v16 = vld [vmem:[%s8948_s3 + $0x90] sm:$0xff]  ;;  %v714_v27 = vld [vmem:[%s8948_s3 + $0xa8] sm:$0xff]  ;;  %v716_v46 = vld [vmem:[%s8948_s3 + $0xb8] sm:$0xff] }
 0x1ca   :  { %736 = vmatpush.msra.mxu1 %v685_v40  ;;  %v706_v40 = vld [vmem:[%s8948_s3 + $0x68] sm:$0xff]  ;;  %v715_v36 = vld [vmem:[%s8948_s3 + $0xb0] sm:$0xff]  ;;  %v4988_v25 = vld [vmem:[%s8949_s4 + $0x58] sm:$0xff] }
 0x1cb   :  { %970 = vmatpush.msrb.mxu2 %v4970_v21  ;;  %v4987_v43 = vld [vmem:[%s8949_s4 + $0x50] sm:$0xff]  ;;  %v4994_v21 = vld [vmem:[%s8949_s4 + $0x68] sm:$0xff] }
 0x1cc   :  { %737 = vmatpush.msra.mxu1 %v684_v32 }
 0x1ce   :  { %738 = vmatpush.msra.mxu1 %v683_v37  ;;  %v710_v37 = vld [vmem:[%s8948_s3 + $0x88] sm:$0xff] }
 0x1d0   :  { %739 = vmatpush.msra.mxu1 %v682_v39  ;;  %v712_v39 = vld [vmem:[%s8948_s3 + $0x98] sm:$0xff] }
 0x1d2   :  { %740 = vmatpush.msra.mxu1 %v681_v33  ;;  %v4969_v33 = vld [vmem:[%s8949_s4 + $0x20] sm:$0xff] }
 0x1d3   :  { %971 = vmatpush.msrb.mxu2 %v4969_v33  ;;  %v4993_v33 = vld [vmem:[%s8949_s4 + $0x60] sm:$0xff] }
 0x1d4   :  { %741 = vmatpush.msra.mxu1 %v680_v26 }
 0x1d6   :  { %742 = vmatpush.msra.mxu1 %v679_v34 }
 0x1d8   :  { %743 = vmatpush.msra.mxu1 %v678_v23  ;;  %v4976_v23 = vld [vmem:[%s8949_s4 + $0x38] sm:$0xff] }
 0x1d9   :  { %1018 = vmatpush.msrb.mxu3 %v4976_v23 }
 0x1da   :  { %744 = vmatpush.msra.mxu1 %v677_v62  ;;  %v717_v62 = vld [vmem:[%s8948_s3 + $0xc0] sm:$0xff] }
 0x1db   :  { %745 = vmatmul.f32.vlgmr.msra.gmra.mxu1 %v693_v38 }
 0x1e3   :  { %748 = vmatmul.f32.gmra.mxu1 %v694_v60  ;;  %v4975_v60 = vld [vmem:[%s8949_s4 + $0x30] sm:$0xff] }
 0x1e4   :  { %1019 = vmatpush.msrb.mxu3 %v4975_v60 }
 0x1eb   :  { %751 = vmatmul.f32.gmra.mxu1 %v695_v61 }
 0x1f3   :  { %754 = vmatmul.f32.gmra.mxu1 %v696_v41  ;;  %v718_v41 = vld [vmem:[%s8948_s3 + $0xc8] sm:$0xff] }
 0x1fb   :  { %757 = vmatmul.f32.gmra.mxu1 %v697_v20 }
 0x203   :  { %760 = vmatmul.f32.gmra.mxu1 %v698_v18  ;;  %v719_v18 = vld [vmem:[%s8948_s3 + $0xd0] sm:$0xff] }
 0x20b   :  { %763 = vmatmul.f32.gmra.mxu1 %v699_v48 }
 0x213   :  { %766 = vmatmul.f32.gmra.mxu1 %v700_v31  ;;  %v720_v31 = vld [vmem:[%s8948_s3 + $0xd8] sm:$0xff] }
 0x21b   :  { %769 = vmatmul.f32.gmra.mxu1 %v701_v19  ;;  %v4982_v19 = vld [vmem:[%s8949_s4 + $0x48] sm:$0xff] }
 0x223   :  { %772 = vmatmul.f32.gmra.mxu1 %v702_v49 }
 0x22b   :  { %775 = vmatmul.f32.gmra.mxu1 %v703_v17  ;;  %v721_v17 = vld [vmem:[%s8948_s3 + $0xe0] sm:$0xff] }
 0x233   :  { %778 = vmatmul.f32.gmra.mxu1 %v704_v35  ;;  %v4981_v35 = vld [vmem:[%s8949_s4 + $0x40] sm:$0xff] }
 0x23b   :  { %781 = vmatmul.f32.gmra.mxu1 %v705_v22  ;;  %v722_v22 = vld [vmem:[%s8948_s3 + $0xe8] sm:$0xff] }
 0x243   :  { %784 = vmatmul.f32.gmra.mxu1 %v706_v40  ;;  %v723_v40 = vld [vmem:[%s8948_s3 + $0xf0] sm:$0xff] }
 0x24b   :  { %787 = vmatmul.f32.gmra.mxu1 %v707_v59 }
 0x253   :  { %790 = vmatmul.f32.gmra.mxu1 %v708_v63  ;;  %v724_v63 = vld [vmem:[%s8948_s3 + $0xf8] sm:$0xff] }
 0x258   :  { %v746_v32 = vpop.f32.mrf.mxu1 }
 0x259   :  { %4965 = vmatmul.msk.f32.vlgmr.msra.gmra.mxu3 %vm495_vm1, %v746_v32 }
 0x25a   :  { %1114 = vmatpush.msra.mxu3 %v4988_v25 }
 0x25b   :  { %793 = vmatmul.f32.gmra.mxu1 %v709_v29  ;;  %v725_v29 = vld [vmem:[%s8948_s3 + $0x100] sm:$0xff] }
 0x25c   :  { %1115 = vmatpush.msra.mxu3 %v4987_v43 }
 0x260   :  { %v749_v7 = vpop.f32.mrf.mxu1 }
 0x261   :  { %4966 = vmatmul.msk.f32.gmra.mxu3 %vm495_vm1, %v749_v7 }
 0x263   :  { %796 = vmatmul.f32.gmra.mxu1 %v710_v37  ;;  %v726_v37 = vld [vmem:[%s8948_s3 + $0x108] sm:$0xff] }
 0x268   :  { %v752_v44 = vpop.f32.mrf.mxu1 }
 0x269   :  { %4967 = vmatmul.msk.f32.gmra.mxu3 %vm495_vm1, %v752_v44 }
 0x26b   :  { %799 = vmatmul.f32.gmra.mxu1 %v711_v16  ;;  %v727_v16 = vld [vmem:[%s8948_s3 + $0x110] sm:$0xff] }
 0x270   :  { %v755_v42 = vpop.f32.mrf.mxu1 }
 0x271   :  { %4968 = vmatmul.msk.f32.gmra.mxu3 %vm495_vm1, %v755_v42 }
 0x273   :  { %802 = vmatmul.f32.gmra.mxu1 %v712_v39  ;;  %v728_v39 = vld [vmem:[%s8948_s3 + $0x118] sm:$0xff] }
 0x278   :  { %v758_v30 = vpop.f32.mrf.mxu1 }
 0x279   :  { %4961 = vmatmul.msk.f32.vlgmr.msra.gmra.mxu2 %vm495_vm1, %v758_v30 }
 0x27a   :  { %1066 = vmatpush.msra.mxu2 %v4982_v19  ;;  %v4999_v19 = vld [vmem:[%s8949_s4 + $0x70] sm:$0xff] }
 0x27b   :  { %805 = vmatmul.f32.gmra.mxu1 %v713_v24 }
 0x27c   :  { %1067 = vmatpush.msra.mxu2 %v4981_v35 }
 0x280   :  { %v761_v45 = vpop.f32.mrf.mxu1 }
 0x281   :  { %4962 = vmatmul.msk.f32.gmra.mxu2 %vm495_vm1, %v761_v45 }
 0x283   :  { %808 = vmatmul.f32.gmra.mxu1 %v714_v27 }
 0x288   :  { %v764_v26 = vpop.f32.mrf.mxu1 }
 0x289   :  { %4963 = vmatmul.msk.f32.gmra.mxu2 %vm495_vm1, %v764_v26 }
 0x28b   :  { %811 = vmatmul.f32.gmra.mxu1 %v715_v36 }
 0x290   :  { %v767_v34 = vpop.f32.mrf.mxu1 }
 0x291   :  { %4964 = vmatmul.msk.f32.gmra.mxu2 %vm495_vm1, %v767_v34 }
 0x293   :  { %814 = vmatmul.f32.gmra.mxu1 %v716_v46 }
 0x298   :  { %v770_v38 = vpop.f32.mrf.mxu1 }
 0x299   :  { %4971 = vmatmul.msk.f32.vlgmr.msrb.gmra.mxu2 %vm495_vm1, %v770_v38 }
 0x29a   :  { %1162 = vmatpush.msrb.mxu2 %v4994_v21 }
 0x29b   :  { %817 = vmatmul.f32.gmra.mxu1 %v717_v62 }
 0x29c   :  { %1163 = vmatpush.msrb.mxu2 %v4993_v33 }
 0x2a0   :  { %v773_v61 = vpop.f32.mrf.mxu1 }
 0x2a1   :  { %4972 = vmatmul.msk.f32.gmra.mxu2 %vm495_vm1, %v773_v61 }
 0x2a3   :  { %820 = vmatmul.f32.gmra.mxu1 %v718_v41 }
 0x2a8   :  { %v776_v20 = vpop.f32.mrf.mxu1 }
 0x2a9   :  { %4973 = vmatmul.msk.f32.gmra.mxu2 %vm495_vm1, %v776_v20 }
 0x2ab   :  { %823 = vmatmul.f32.gmra.mxu1 %v719_v18 }
 0x2b0   :  { %v779_v48 = vpop.f32.mrf.mxu1 }
 0x2b1   :  { %4974 = vmatmul.msk.f32.gmra.mxu2 %vm495_vm1, %v779_v48  ;;  %v5000_v48 = vld [vmem:[%s8949_s4 + $0x78] sm:$0xff] }
 0x2b3   :  { %826 = vmatmul.f32.gmra.mxu1 %v720_v31 }
 0x2b8   :  { %v782_v49 = vpop.f32.mrf.mxu1 }
 0x2b9   :  { %4977 = vmatmul.msk.f32.vlgmr.msrb.gmra.mxu3 %vm495_vm1, %v782_v49  ;;  %v5006_v49 = vld [vmem:[%s8949_s4 + $0x88] sm:$0xff] }
 0x2ba   :  { %1210 = vmatpush.msrb.mxu3 %v5000_v48 }
 0x2bb   :  { %829 = vmatmul.f32.gmra.mxu1 %v721_v17 }
 0x2bc   :  { %1211 = vmatpush.msrb.mxu3 %v4999_v19  ;;  %v1435_v19 = vld [vmem:[%s8953_s8 + $0x10] sm:$0xff] }
 0x2c0   :  { %v785_v58 = vpop.f32.mrf.mxu1 }
 0x2c1   :  { %4978 = vmatmul.msk.f32.gmra.mxu3 %vm495_vm1, %v785_v58 }
 0x2c3   :  { %832 = vmatmul.f32.gmra.mxu1 %v722_v22 }
 0x2c8   :  { %v788_v28 = vpop.f32.mrf.mxu1 }
 0x2c9   :  { %4979 = vmatmul.msk.f32.gmra.mxu3 %vm495_vm1, %v788_v28 }
 0x2cb   :  { %835 = vmatmul.f32.gmra.mxu1 %v723_v40 }
 0x2d0   :  { %v791_v59 = vpop.f32.mrf.mxu1 }
 0x2d1   :  { %4980 = vmatmul.msk.f32.gmra.mxu3 %vm495_vm1, %v791_v59  ;;  %v5005_v59 = vld [vmem:[%s8949_s4 + $0x80] sm:$0xff] }
 0x2d3   :  { %838 = vmatmul.f32.gmra.mxu1 %v724_v63 }
 0x2d8   :  { %v794_v32 = vpop.f32.mrf.mxu1 }
 0x2d9   :  { %4983 = vmatmul.msk.f32.vlgmr.msra.gmra.mxu2 %vm495_vm1, %v794_v32 }
 0x2da   :  { %1258 = vmatpush.msra.mxu2 %v5006_v49 }
 0x2db   :  { %841 = vmatmul.f32.gmra.mxu1 %v725_v29 }
 0x2dc   :  { %v929_v30 = vpop.f32.mrf.mxu3  ;;  %1259 = vmatpush.msra.mxu2 %v5005_v59 }
 0x2e0   :  { %v797_v7 = vpop.f32.mrf.mxu1 }
 0x2e1   :  { %4984 = vmatmul.msk.f32.gmra.mxu2 %vm495_vm1, %v797_v7 }
 0x2e3   :  { %844 = vmatmul.f32.gmra.mxu1 %v726_v37 }
 0x2e4   :  { %v932_v26 = vpop.f32.mrf.mxu3 }
 0x2e8   :  { %v800_v44 = vpop.f32.mrf.mxu1 }
 0x2e9   :  { %4985 = vmatmul.msk.f32.gmra.mxu2 %vm495_vm1, %v800_v44 }
 0x2eb   :  { %847 = vmatmul.f32.gmra.mxu1 %v727_v16 }
 0x2ec   :  { %v935_v38 = vpop.f32.mrf.mxu3 }
 0x2f0   :  { %v803_v42 = vpop.f32.mrf.mxu1 }
 0x2f1   :  { %4986 = vmatmul.msk.f32.gmra.mxu2 %vm495_vm1, %v803_v42 }
 0x2f3   :  { %850 = vmatmul.f32.gmra.mxu1 %v728_v39 }
 0x2f4   :  { %v938_v41 = vpop.f32.mrf.mxu3 }
 0x2f8   :  { %v806_v24 = vpop.f32.mrf.mxu1 }
 0x2f9   :  { %4989 = vmatmul.msk.f32.vlgmr.msra.gmra.mxu3 %vm495_vm1, %v806_v24 }
 0x2fc   :  { %v888_v45 = vpop.f32.mrf.mxu2 }
 0x2fd   :  { %v930_v27 = vadd.f32 %v929_v30, %v888_v45 }
 0x300   :  { %v809_v36 = vpop.f32.mrf.mxu1 }
 0x301   :  { %4990 = vmatmul.msk.f32.gmra.mxu3 %vm495_vm1, %v809_v36 }
 0x304   :  { %v891_v34 = vpop.f32.mrf.mxu2 }
 0x305   :  { %v933_v46 = vadd.f32 %v932_v26, %v891_v34 }
 0x308   :  { %v812_v23 = vpop.f32.mrf.mxu1 }
 0x309   :  { %4991 = vmatmul.msk.f32.gmra.mxu3 %vm495_vm1, %v812_v23  ;;  %v1436_v23 = vld [vmem:[%s8953_s8 + $0x18] sm:$0xff] }
 0x30a   :  { %5420 = vmatpush.msrb.mxu1 %v1436_v23  ;;  %1461 = vmatpush.msrb.mxu0 %v1436_v23  ;;  %v5511_v23 = vmov 32.0  }
 0x30b   :  { %5443 = vrcp.f32 %v5511_v23 }
 0x30c   :  { %v894_v62 = vpop.f32.mrf.mxu2  ;;  %5421 = vmatpush.msrb.mxu1 %v1435_v19  ;;  %1462 = vmatpush.msrb.mxu0 %v1435_v19 }
 0x30d   :  { %v936_v60 = vadd.f32 %v935_v38, %v894_v62 }
 0x310   :  { %v815_v61 = vpop.f32.mrf.mxu1 }
 0x311   :  { %4992 = vmatmul.msk.f32.gmra.mxu3 %vm495_vm1, %v815_v61 }
 0x314   :  { %v897_v20 = vpop.f32.mrf.mxu2 }
 0x315   :  { %v939_v18 = vadd.f32 %v938_v41, %v897_v20 }
 0x318   :  { %v818_v31 = vpop.f32.mrf.mxu1 }
 0x319   :  { %4995 = vmatmul.msk.f32.vlgmr.msrb.gmra.mxu2 %vm495_vm1, %v818_v31 }
 0x31c   :  { %v973_v17 = vpop.f32.mrf.mxu2 }
 0x31d   :  { %v985_v35 = vadd.f32 %v973_v17, %v930_v27 }
 0x320   :  { %v821_v58 = vpop.f32.mrf.mxu1 }
 0x321   :  { %4996 = vmatmul.msk.f32.gmra.mxu2 %vm495_vm1, %v821_v58 }
 0x324   :  { %v976_v22 = vpop.f32.mrf.mxu2 }
 0x325   :  { %v986_v28 = vadd.f32 %v976_v22, %v933_v46 }
 0x328   :  { %v824_v40 = vpop.f32.mrf.mxu1 }
 0x329   :  { %4997 = vmatmul.msk.f32.gmra.mxu2 %vm495_vm1, %v824_v40 }
 0x32c   :  { %v979_v63 = vpop.f32.mrf.mxu2 }
 0x32d   :  { %v987_v25 = vadd.f32 %v979_v63, %v936_v60 }
 0x330   :  { %v827_v32 = vpop.f32.mrf.mxu1 }
 0x331   :  { %4998 = vmatmul.msk.f32.gmra.mxu2 %vm495_vm1, %v827_v32 }
 0x334   :  { %v982_v29 = vpop.f32.mrf.mxu2 }
 0x335   :  { %v6764_v43 = vadd.f32 %v982_v29, %v939_v18 }
 0x338   :  { %v830_v7 = vpop.f32.mrf.mxu1 }
 0x339   :  { %5001 = vmatmul.msk.f32.vlgmr.msrb.gmra.mxu3 %vm495_vm1, %v830_v7 }
 0x33c   :  { %v1021_v37 = vpop.f32.mrf.mxu3 }
 0x33d   :  { %v1033_v44 = vadd.f32 %v1021_v37, %v985_v35 }
 0x340   :  { %v833_v16 = vpop.f32.mrf.mxu1 }
 0x341   :  { %5002 = vmatmul.msk.f32.gmra.mxu3 %vm495_vm1, %v833_v16 }
 0x344   :  { %v1024_v42 = vpop.f32.mrf.mxu3 }
 0x345   :  { %v1034_v39 = vadd.f32 %v1024_v42, %v986_v28 }
 0x348   :  { %v836_v21 = vpop.f32.mrf.mxu1 }
 0x349   :  { %5003 = vmatmul.msk.f32.gmra.mxu3 %vm495_vm1, %v836_v21 }
 0x34c   :  { %v1027_v38 = vpop.f32.mrf.mxu3 }
 0x34d   :  { %v1035_v37 = vadd.f32 %v1027_v38, %v987_v25 }
 0x350   :  { %v839_v30 = vpop.f32.mrf.mxu1 }
 0x351   :  { %5004 = vmatmul.msk.f32.gmra.mxu3 %vm495_vm1, %v839_v30 }
 0x354   :  { %v1030_v62 = vpop.f32.mrf.mxu3 }
 0x355   :  { %v1036_v38 = vadd.f32 %v1030_v62, %v6764_v43 }
 0x358   :  { %v842_v24 = vpop.f32.mrf.mxu1 }
 0x359   :  { %5007 = vmatmul.msk.f32.vlgmr.msra.gmra.mxu2 %vm495_vm1, %v842_v24 }
 0x35c   :  { %v1069_v33 = vpop.f32.mrf.mxu2 }
 0x35d   :  { %v1081_v45 = vadd.f32 %v1069_v33, %v1033_v44 }
 0x360   :  { %v845_v27 = vpop.f32.mrf.mxu1 }
 0x361   :  { %5008 = vmatmul.msk.f32.gmra.mxu2 %vm495_vm1, %v845_v27 }
 0x364   :  { %v1072_v26 = vpop.f32.mrf.mxu2 }
 0x365   :  { %v1082_v36 = vadd.f32 %v1072_v26, %v1034_v39 }
 0x368   :  { %v848_v34 = vpop.f32.mrf.mxu1 }
 0x369   :  { %5009 = vmatmul.msk.f32.gmra.mxu2 %vm495_vm1, %v848_v34 }
 0x36c   :  { %v1075_v60 = vpop.f32.mrf.mxu2 }
 0x36d   :  { %v1083_v16 = vadd.f32 %v1075_v60, %v1035_v37 }
 0x370   :  { %v851_v46 = vpop.f32.mrf.mxu1 }
 0x371   :  { %5010 = vmatmul.msk.f32.gmra.mxu2 %vm495_vm1, %v851_v46 }
 0x374   :  { %v1078_v41 = vpop.f32.mrf.mxu2 }
 0x37c   :  { %v1117_v61 = vpop.f32.mrf.mxu3 }
 0x37d   :  { %v1129_v22 = vadd.f32 %v1117_v61, %v1081_v45 }
 0x384   :  { %v1120_v20 = vpop.f32.mrf.mxu3 }
 0x385   :  { %v1130_v63 = vadd.f32 %v1120_v20, %v1082_v36  ;;  %v1084_v20 = vadd.f32 %v1078_v41, %v1036_v38  ;;  %v1359_v38 = vld [vmem:[%s8951_s6 + $0x18] sm:$0xff] }
 0x386   :  { %1388 = vmatpush.msra.mxu3 %v1359_v38 }
 0x38c   :  { %v1123_v48 = vpop.f32.mrf.mxu3 }
 0x38d   :  { %v1131_v30 = vadd.f32 %v1123_v48, %v1083_v16 }
 0x394   :  { %v1126_v49 = vpop.f32.mrf.mxu3 }
 0x395   :  { %v1132_v48 = vadd.f32 %v1126_v49, %v1084_v20 }
 0x39c   :  { %v1165_v18 = vpop.f32.mrf.mxu2 }
 0x39d   :  { %v1177_v59 = vadd.f32 %v1165_v18, %v1129_v22 }
 0x3a4   :  { %v1168_v31 = vpop.f32.mrf.mxu2 }
 0x3a5   :  { %v1178_v29 = vadd.f32 %v1168_v31, %v1130_v63 }
 0x3ac   :  { %v1171_v17 = vpop.f32.mrf.mxu2 }
 0x3ad   :  { %v1179_v26 = vadd.f32 %v1171_v17, %v1131_v30  ;;  %v5444_v17 = vpop.eup %5443 }
 0x3ae   :  { %v1293_v62 = vmul.f32 32.0, %v5444_v17  ;;  %vm1297_vm1 = vweird.f32 %v5444_v17 }
 0x3b0   :  { %v1294_v49 = vsub.f32 1.0, %v1293_v62 }
 0x3b4   :  { %v1174_v58 = vpop.f32.mrf.mxu2 }
 0x3bc   :  { %v1213_v35 = vpop.f32.mrf.mxu3 }
 0x3bd   :  { %v1225_v32 = vadd.f32 %v1213_v35, %v1177_v59 }
 0x3c4   :  { %v1216_v28 = vpop.f32.mrf.mxu3 }
 0x3c5   :  { %v1226_v44 = vadd.f32 %v1216_v28, %v1178_v29  ;;  %v1180_v28 = vadd.f32 %v1174_v58, %v1132_v48 }
 0x3cc   :  { %v1219_v24 = vpop.f32.mrf.mxu3 }
 0x3cd   :  { %v1227_v60 = vadd.f32 %v1219_v24, %v1179_v26 }
 0x3d4   :  { %v1222_v35 = vpop.f32.mrf.mxu3 }
 0x3d5   :  { %v1228_v43 = vadd.f32 %v1222_v35, %v1180_v28  ;;  %v1356_v35 = vld [vmem:[%s8951_s6] sm:$0xff] }
 0x3dc   :  { %v1261_v40 = vpop.f32.mrf.mxu2 }
 0x3dd   :  { %v6780_v7 = vadd.f32 %v1261_v40, %v1225_v32 }
 0x3df   :  { %v1300_v39 = vmul.f32 %v6780_v7, %v6780_v7  ;;  %v1279_v33 = vsel %vm379_vm0, %v6780_v7, 0.0 }
 0x3e1   :  { %v1304_v36 = vsel %vm379_vm0, %v1300_v39, 0.0  ;;  %v1295_v39 = vmul.f32 %v5444_v17, %v1294_v49 }
 0x3e4   :  { %v1264_v42 = vpop.f32.mrf.mxu2 }
 0x3e5   :  { %v6784_v21 = vadd.f32 %v1264_v42, %v1226_v44 }
 0x3e7   :  { %v1280_v45 = vsel %vm379_vm0, %v6784_v21, 0.0  ;;  %v1301_v27 = vmul.f32 %v6784_v21, %v6784_v21 }
 0x3e8   :  { %v1281_v25 = vadd.f32 %v1280_v45, %v1279_v33  ;;  %v1296_v45 = vadd.f32 %v5444_v17, %v1295_v39 }
 0x3e9   :  { %v1305_v34 = vsel %vm379_vm0, %v1301_v27, 0.0 }
 0x3ea   :  { %v1306_v46 = vadd.f32 %v1305_v34, %v1304_v36  ;;  %v1298_v34 = vsel %vm1297_vm1, %v5444_v17, %v1296_v45  ;;  %v1433_v45 = vld [vmem:[%s8953_s8] sm:$0xff] }
 0x3ec   :  { %v1267_v61 = vpop.f32.mrf.mxu2 }
 0x3ed   :  { %v6795_v18 = vadd.f32 %v1267_v61, %v1227_v60  ;;  %v1358_v60 = vld [vmem:[%s8951_s6 + $0x10] sm:$0xff]  ;;  %v1434_v61 = vld [vmem:[%s8953_s8 + $0x8] sm:$0xff] }
 0x3ee   :  { %5422 = vmatpush.msrb.mxu1 %v1434_v61  ;;  %1463 = vmatpush.msrb.mxu0 %v1434_v61  ;;  %v5437_v61 = vld [vmem:[%s8952_s7] ss:$0 sm:$0xff] }
 0x3ef   :  { %v1282_v31 = vsel %vm379_vm0, %v6795_v18, 0.0  ;;  %v1302_v19 = vmul.f32 %v6795_v18, %v6795_v18  ;;  %1389 = vmatpush.msra.mxu3 %v1358_v60 }
 0x3f0   :  { %v1283_v22 = vadd.f32 %v1282_v31, %v1281_v25  ;;  %v1357_v31 = vld [vmem:[%s8951_s6 + $0x8] sm:$0xff]  ;;  %5423 = vmatpush.msrb.mxu1 %v1433_v45  ;;  %1464 = vmatpush.msrb.mxu0 %v1433_v45 }
 0x3f1   :  { %v1307_v40 = vsel %vm379_vm0, %v1302_v19, 0.0  ;;  %1390 = vmatpush.msra.mxu3 %v1357_v31 }
 0x3f2   :  { %v1308_v59 = vadd.f32 %v1307_v40, %v1306_v46 }
 0x3f3   :  { %1391 = vmatpush.msra.mxu3 %v1356_v35 }
 0x3f4   :  { %v1270_v63 = vpop.f32.mrf.mxu2 }
 0x3f5   :  { %v1276_v41 = vadd.f32 %v1270_v63, %v1228_v43 }
 0x3f7   :  { %v1284_v32 = vsel %vm379_vm0, %v1276_v41, 0.0  ;;  %v1303_v29 = vmul.f32 %v1276_v41, %v1276_v41 }
 0x3f8   :  { %v1285_v37 = vadd.f32 %v1284_v32, %v1283_v22  ;;  %v1277_v32 = vld [vmem:[%s8950_s5] sm:$0x1] }
 0x3f9   :  { %v1309_v44 = vsel %vm379_vm0, %v1303_v29, 0.0 }
 0x3fa   :  { %v1286_v16 = vrot.slane %v1285_v37, 4  ;;  %v1310_v42 = vadd.f32 %v1309_v44, %v1308_v59  ;;  %v1278_v44 = vld [vmem:[%s8950_s5 + $0x1] sm:$0x1] }
 0x3fc   :  { %v1287_v30 = vadd.f32 %v1286_v16, %v1285_v37  ;;  %v1311_v24 = vrot.slane %v1310_v42, 4 }
 0x3fe   :  { %v1288_v58 = vrot.slane %v1287_v30, 2  ;;  %v1312_v33 = vadd.f32 %v1311_v24, %v1310_v42 }
 0x400   :  { %v1289_v27 = vadd.f32 %v1288_v58, %v1287_v30  ;;  %v1313_v25 = vrot.slane %v1312_v33, 2 }
 0x402   :  { %v1290_v26 = vrot.slane %v1289_v27, 1  ;;  %v1314_v36 = vadd.f32 %v1313_v25, %v1312_v33 }
 0x404   :  { %v1291_v46 = vadd.f32 %v1290_v26, %v1289_v27  ;;  %v1315_v23 = vrot.slane %v1314_v36, 1 }
 0x406   :  { %v1299_v20 = vmul.f32 %v1298_v34, %v1291_v46  ;;  %v1316_v48 = vadd.f32 %v1315_v23, %v1314_v36 }
 0x408   :  { %v1317_v19 = vmul.f32 %v1316_v48, %v1298_v34  ;;  %v1318_v17 = vmul.f32 %v1299_v20, %v1299_v20 }
 0x40a   :  { %v1319_v22 = vsub.f32 %v1317_v19, %v1318_v17 }
 0x40c   :  { %v1320_v28 = vadd.f32 1e-05, %v1319_v22 }
 0x40e   :  { %5445 = vrsqrt.f32 %v1320_v28  ;;  %vm1327_vm9 = vweird.f32 %v1320_v28 }
 0x414   :  { %v5446_v40 = vpop.eup %5445 }
 0x415   :  { %v1322_v59 = vmul.f32 %v5446_v40, %v1320_v28  ;;  %vm1328_vm8 = vweird.f32 %v5446_v40 }
 0x416   :  { %vm1329_vm10 = vmor %vm1327_vm9, %vm1328_vm8 }
 0x417   :  { %v1323_v43 = vmul.f32 %v5446_v40, %v1322_v59 }
 0x419   :  { %v1324_v62 = vmul.f32 0.5, %v1323_v43 }
 0x41b   :  { %v1325_v63 = vsub.f32 1.5, %v1324_v62 }
 0x41d   :  { %v1326_v49 = vmul.f32 %v5446_v40, %v1325_v63 }
 0x41f   :  { %v1330_v29 = vsel %vm1329_vm10, %v5446_v40, %v1326_v49 }
 0x420   :  { %v1331_v37 = vmul.f32 %v1330_v29, %v1277_v32 }
 0x422   :  { %v1332_v16 = vmul.f32 %v1331_v37, %v1299_v20  ;;  %v1334_v42 = vperm.slane %v1331_v37, 0 }
 0x424   :  { %v1333_v39 = vsub.f32 %v1278_v44, %v1332_v16  ;;  %v1338_v30 = vmul.f32 %v1334_v42, %v1276_v41  ;;  %v1335_v24 = vmul.f32 %v1334_v42, %v6780_v7  ;;  %v1336_v58 = vmul.f32 %v1334_v42, %v6784_v21  ;;  %v5438_v44 = vld [vmem:[%s8955_s10] ss:$0 sm:$0xff] }
 0x425   :  { %v1337_v33 = vmul.f32 %v1334_v42, %v6795_v18 }
 0x426   :  { %v1339_v27 = vperm.slane %v1333_v39, 0 }
 0x428   :  { %v1340_v25 = vadd.f32 %v1339_v27, %v1335_v24  ;;  %v1341_v26 = vadd.f32 %v1339_v27, %v1336_v58  ;;  %v1342_v36 = vadd.f32 %v1339_v27, %v1337_v33  ;;  %v1343_v34 = vadd.f32 %v1339_v27, %v1338_v30 }
 0x42a   :  { %vm1344_vm11 = vcmp.ge.f32.partialorder %v1340_v25, 0.0  ;;  %v1348_v46 = vmul.f32 0.01, %v1340_v25  ;;  %v1349_v7 = vmul.f32 0.01, %v1341_v26  ;;  %vm1345_vm12 = vcmp.ge.f32.partialorder %v1341_v26, 0.0 }
 0x42b   :  { %v1350_v18 = vmul.f32 0.01, %v1342_v36  ;;  %vm1346_vm13 = vcmp.ge.f32.partialorder %v1342_v36, 0.0  ;;  %v1351_v38 = vmul.f32 0.01, %v1343_v34  ;;  %vm1347_vm14 = vcmp.ge.f32.partialorder %v1343_v34, 0.0 }
 0x42c   :  { %v1352_v41 = vsel %vm1344_vm11, %v1340_v25, %v1348_v46  ;;  %v1353_v21 = vsel %vm1345_vm12, %v1341_v26, %v1349_v7  ;;  %vm1651_vm12 = vcmask 0  }
 0x42d   :  { %5011 = vmatmul.msk.f32.vlgmr.msra.gmra.mxu3 %vm379_vm0, %v1352_v41  ;;  %v1354_v23 = vsel %vm1346_vm13, %v1342_v36, %v1350_v18  ;;  %v1355_v60 = vsel %vm1347_vm14, %v1343_v34, %v1351_v38  ;;  %v8967_v38 = vlaneseq }
 0x435   :  { %5012 = vmatmul.msk.f32.gmra.mxu3 %vm379_vm0, %v1353_v21 }
 0x43d   :  { %5013 = vmatmul.msk.f32.gmra.mxu3 %vm379_vm0, %v1354_v23 }
 0x445   :  { %5014 = vmatmul.msk.f32.gmra.mxu3 %vm379_vm0, %v1355_v60  ;;  %v6890_v60 = vand.u32 127, %v8967_v38 }
 0x4b0   :  { %v1393_v20 = vpop.f32.mrf.mxu3 }
 0x4b1   :  { %v6838_v48 = vadd.f32 %v5437_v61, %v1393_v20 }
 0x4b3   :  { %1405 = vst.msk [vmem:[%s8962_s17] sm:$0xff] %vm379_vm0, %v6838_v48  ;;  %5015 = vmatmul.msk.f32.vlgmr.msrb.gmra.mxu0 %vm379_vm0, %v6838_v48  ;;  %v1409_v31 = vmul.f32 %v6838_v48, %v6838_v48 }
 0x4b5   :  { %v1413_v19 = vsel %vm379_vm0, %v1409_v31, 0.0 }
 0x4b6   :  { %1414 = vadd.xlane.f32.xlu0 %v1413_v19 }
 0x4b8   :  { %v1396_v17 = vpop.f32.mrf.mxu3 }
 0x4b9   :  { %v6850_v35 = vadd.f32 %v5437_v61, %v1396_v17 }
 0x4bb   :  { %1406 = vst.msk [vmem:[%s8962_s17 + $0x8] sm:$0xff] %vm379_vm0, %v6850_v35  ;;  %5016 = vmatmul.msk.f32.vlgmr.msrb.gmra.mxu1 %vm379_vm0, %v6850_v35  ;;  %v1410_v22 = vmul.f32 %v6850_v35, %v6850_v35 }
 0x4bd   :  { %v1416_v28 = vsel %vm379_vm0, %v1410_v22, 0.0 }
 0x4be   :  { %1417 = vadd.xlane.f32.xlu0 %v1416_v28 }
 0x4c0   :  { %v1399_v40 = vpop.f32.mrf.mxu3 }
 0x4c1   :  { %v6862_v59 = vadd.f32 %v5437_v61, %v1399_v40 }
 0x4c3   :  { %1407 = vst.msk [vmem:[%s8962_s17 + $0x10] sm:$0xff] %vm379_vm0, %v6862_v59  ;;  %5017 = vmatmul.msk.f32.gmra.mxu1 %vm379_vm0, %v6862_v59  ;;  %v1411_v43 = vmul.f32 %v6862_v59, %v6862_v59 }
 0x4c5   :  { %v1419_v62 = vsel %vm379_vm0, %v1411_v43, 0.0 }
 0x4c6   :  { %1420 = vadd.xlane.f32.xlu1 %v1419_v62 }
 0x4c8   :  { %v1402_v63 = vpop.f32.mrf.mxu3 }
 0x4c9   :  { %v6874_v32 = vadd.f32 %v5437_v61, %v1402_v63 }
 0x4cb   :  { %1408 = vst.msk [vmem:[%s8962_s17 + $0x18] sm:$0xff] %vm379_vm0, %v6874_v32  ;;  %5018 = vmatmul.msk.f32.gmra.mxu1 %vm379_vm0, %v6874_v32  ;;  %v1412_v49 = vmul.f32 %v6874_v32, %v6874_v32 }
 0x4cd   :  { %v1422_v29 = vsel %vm379_vm0, %v1412_v49, 0.0 }
 0x4ce   :  { %1423 = vadd.xlane.f32.xlu1 %v1422_v29 }
 0x529   :  { %v1415_v37 = vpop.xlane.xlu0 %1414 }
 0x52a   :  { %v1429_v42 = vadd.f32 %v5438_v44, %v1415_v37 }
 0x530   :  { %v1466_v16 = vpop.f32.mrf.mxu0 }
 0x531   :  { %v1478_v39 = vmul.f32 2.0, %v1466_v16  ;;  %v1418_v24 = vpop.xlane.xlu0 %1417 }
 0x532   :  { %v1430_v33 = vadd.f32 %v5438_v44, %v1418_v24  ;;  %v1585_v24 = vld [vmem:[%s8954_s9 + $0x68] sm:$0xff] }
 0x533   :  { %v1482_v30 = vsub.f32 %v1429_v42, %v1478_v39  ;;  %v1587_v42 = vld [vmem:[%s8954_s9 + $0x78] sm:$0xff]  ;;  %v1586_v39 = vld [vmem:[%s8954_s9 + $0x70] sm:$0xff] }
 0x534   :  { %1588 = vmatpush.msrb.mxu2 %v1587_v42 }
 0x535   :  { %1486 = vmin.xlane.f32.xlu2 %v1482_v30 }
 0x536   :  { %1589 = vmatpush.msrb.mxu2 %v1586_v39 }
 0x538   :  { %v1469_v58 = vpop.f32.mrf.mxu1  ;;  %1590 = vmatpush.msrb.mxu2 %v1585_v24 }
 0x539   :  { %v1479_v45 = vmul.f32 2.0, %v1469_v58  ;;  %v1421_v25 = vpop.xlane.xlu1 %1420  ;;  %v1584_v58 = vld [vmem:[%s8954_s9 + $0x60] sm:$0xff] }
 0x53a   :  { %v1431_v36 = vadd.f32 %v5438_v44, %v1421_v25  ;;  %1591 = vmatpush.msrb.mxu2 %v1584_v58 }
 0x53b   :  { %v1483_v27 = vsub.f32 %v1430_v33, %v1479_v45 }
 0x53d   :  { %1488 = vmin.xlane.f32.xlu2 %v1483_v27 }
 0x540   :  { %v1472_v26 = vpop.f32.mrf.mxu1 }
 0x541   :  { %v1480_v34 = vmul.f32 2.0, %v1472_v26  ;;  %v1424_v41 = vpop.xlane.xlu1 %1423  ;;  %v1582_v26 = vld [vmem:[%s8954_s9 + $0x50] sm:$0xff] }
 0x542   :  { %v1432_v21 = vadd.f32 %v5438_v44, %v1424_v41 }
 0x543   :  { %v1484_v46 = vsub.f32 %v1431_v36, %v1480_v34  ;;  %v1581_v34 = vld [vmem:[%s8954_s9 + $0x48] sm:$0xff] }
 0x545   :  { %1490 = vmin.xlane.f32.xlu0 %v1484_v46 }
 0x548   :  { %v1475_v7 = vpop.f32.mrf.mxu1 }
 0x549   :  { %v1481_v18 = vmul.f32 2.0, %v1475_v7 }
 0x54b   :  { %v1485_v23 = vsub.f32 %v1432_v21, %v1481_v18  ;;  %v1579_v21 = vld [vmem:[%s8954_s9 + $0x38] sm:$0xff] }
 0x54d   :  { %1492 = vmin.xlane.f32.xlu1 %v1485_v23 }
 0x5a8   :  { %v1487_v61 = vpop.xlane.xlu2 %1486 }
 0x5a9   :  { %vm1496_vm15 = vcmp.le.f32.partialorder %v1482_v30, %v1487_v61 }
 0x5aa   :  { %v1500_v20 = vsel %vm1496_vm15, %v6890_v60, 128 }
 0x5ab   :  { %v1505_v31 = vshra.s32 %v1500_v20, 16  ;;  %v1504_v30 = vand.u32 65535, %v1500_v20  ;;  %v1577_v20 = vld [vmem:[%s8954_s9 + $0x28] sm:$0xff] }
 0x5ad   :  { %v1507_v19 = vcvt.s32.f32 %v1505_v31  ;;  %v1506_v45 = vcvt.s32.f32 %v1504_v30  ;;  %v1576_v31 = vld [vmem:[%s8954_s9 + $0x20] sm:$0xff] }
 0x5af   :  { %1508 = vmin.xlane.f32.xlu2 %v1507_v19 }
 0x5b0   :  { %v1489_v17 = vpop.xlane.xlu2 %1488 }
 0x5b1   :  { %vm1497_vm2 = vcmp.le.f32.partialorder %v1483_v27, %v1489_v17  ;;  %v1583_v27 = vld [vmem:[%s8954_s9 + $0x58] sm:$0xff] }
 0x5b2   :  { %v1501_v22 = vsel %vm1497_vm2, %v6890_v60, 128  ;;  %1592 = vmatpush.msrb.mxu2 %v1583_v27 }
 0x5b3   :  { %v1519_v28 = vshra.s32 %v1501_v22, 16  ;;  %v1518_v36 = vand.u32 65535, %v1501_v22  ;;  %v1575_v22 = vld [vmem:[%s8954_s9 + $0x18] sm:$0xff] }
 0x5b4   :  { %1593 = vmatpush.msrb.mxu2 %v1582_v26 }
 0x5b5   :  { %v1521_v40 = vcvt.s32.f32 %v1519_v28  ;;  %v1520_v7 = vcvt.s32.f32 %v1518_v36 }
 0x5b6   :  { %1594 = vmatpush.msrb.mxu2 %v1581_v34 }
 0x5b7   :  { %1522 = vmin.xlane.f32.xlu0 %v1521_v40 }
 0x5b8   :  { %v1491_v43 = vpop.xlane.xlu0 %1490 }
 0x5b9   :  { %vm1498_vm3 = vcmp.le.f32.partialorder %v1484_v46, %v1491_v43  ;;  %v1580_v46 = vld [vmem:[%s8954_s9 + $0x40] sm:$0xff] }
 0x5ba   :  { %v1502_v62 = vsel %vm1498_vm3, %v6890_v60, 128  ;;  %1595 = vmatpush.msrb.mxu2 %v1580_v46 }
 0x5bb   :  { %v1533_v63 = vshra.s32 %v1502_v62, 16  ;;  %v1532_v61 = vand.u32 65535, %v1502_v62 }
 0x5bc   :  { %1596 = vmatpush.msrb.mxu2 %v1579_v21 }
 0x5bd   :  { %v1535_v49 = vcvt.s32.f32 %v1533_v63  ;;  %v1534_v17 = vcvt.s32.f32 %v1532_v61 }
 0x5bf   :  { %1536 = vmin.xlane.f32.xlu1 %v1535_v49 }
 0x5c0   :  { %v1493_v29 = vpop.xlane.xlu1 %1492 }
 0x5c1   :  { %vm1499_vm4 = vcmp.le.f32.partialorder %v1485_v23, %v1493_v29  ;;  %v1578_v23 = vld [vmem:[%s8954_s9 + $0x30] sm:$0xff] }
 0x5c2   :  { %v1503_v37 = vsel %vm1499_vm4, %v6890_v60, 128  ;;  %1597 = vmatpush.msrb.mxu2 %v1578_v23 }
 0x5c3   :  { %v1547_v44 = vshra.s32 %v1503_v37, 16  ;;  %v1546_v43 = vand.u32 65535, %v1503_v37 }
 0x5c4   :  { %1598 = vmatpush.msrb.mxu2 %v1577_v20 }
 0x5c5   :  { %v1549_v16 = vcvt.s32.f32 %v1547_v44  ;;  %v1548_v63 = vcvt.s32.f32 %v1546_v43  ;;  %v1572_v44 = vld [vmem:[%s8954_s9] sm:$0xff] }
 0x5c6   :  { %1599 = vmatpush.msrb.mxu2 %v1576_v31 }
 0x5c7   :  { %1550 = vmin.xlane.f32.xlu2 %v1549_v16 }
 0x5c8   :  { %1600 = vmatpush.msrb.mxu2 %v1575_v22 }
 0x622   :  { %v1509_v33 = vpop.xlane.xlu2 %1508 }
 0x623   :  { %vm1510_vm5 = vcmp.eq.f32.partialorder %v1507_v19, %v1509_v33  ;;  %v1515_v42 = vcvt.f32.s32 %v1509_v33 }
 0x624   :  { %v1511_v25 = vsel %vm1510_vm5, %v1506_v45, inf }
 0x625   :  { %1512 = vmin.xlane.f32.xlu0 %v1511_v25  ;;  %v1516_v37 = vshll.u32 %v1515_v42, 16 }
 0x62a   :  { %v1523_v41 = vpop.xlane.xlu0 %1522 }
 0x62b   :  { %vm1524_vm6 = vcmp.eq.f32.partialorder %v1521_v40, %v1523_v41  ;;  %v1574_v40 = vld [vmem:[%s8954_s9 + $0x10] sm:$0xff]  ;;  %v1529_v58 = vcvt.f32.s32 %v1523_v41 }
 0x62c   :  { %v1525_v18 = vsel %vm1524_vm6, %v1520_v7, inf  ;;  %1601 = vmatpush.msrb.mxu2 %v1574_v40 }
 0x62d   :  { %1526 = vmin.xlane.f32.xlu1 %v1525_v18  ;;  %v1530_v27 = vshll.u32 %v1529_v58, 16 }
 0x632   :  { %v1537_v19 = vpop.xlane.xlu1 %1536 }
 0x633   :  { %vm1538_vm7 = vcmp.eq.f32.partialorder %v1535_v49, %v1537_v19  ;;  %v1573_v49 = vld [vmem:[%s8954_s9 + $0x8] sm:$0xff]  ;;  %v1543_v36 = vcvt.f32.s32 %v1537_v19 }
 0x634   :  { %v1539_v28 = vsel %vm1538_vm7, %v1534_v17, inf  ;;  %1602 = vmatpush.msrb.mxu2 %v1573_v49 }
 0x635   :  { %1540 = vmin.xlane.f32.xlu2 %v1539_v28  ;;  %v1544_v46 = vshll.u32 %v1543_v36, 16 }
 0x636   :  { %1603 = vmatpush.msrb.mxu2 %v1572_v44 }
 0x63a   :  { %v1551_v62 = vpop.xlane.xlu2 %1550 }
 0x63b   :  { %vm1552_vm1 = vcmp.eq.f32.partialorder %v1549_v16, %v1551_v62  ;;  %v5512_v16 = vmov 1.0   ;;  %v1557_v21 = vcvt.f32.s32 %v1551_v62 }
 0x63c   :  { %v1553_v29 = vsel %vm1552_vm1, %v1548_v63, inf }
 0x63d   :  { %1554 = vmin.xlane.f32.xlu0 %v1553_v29  ;;  %v1558_v18 = vshll.u32 %v1557_v21, 16 }
 0x698   :  { %v1513_v39 = vpop.xlane.xlu0 %1512 }
 0x699   :  { %v1514_v30 = vcvt.f32.s32 %v1513_v39 }
 0x69b   :  { %v1517_v24 = vadd.s32 %v1516_v37, %v1514_v30 }
 0x69d   :  { %vm1560_vm8 = vcmp.eq.s32.totalorder %v6890_v60, %v1517_v24 }
 0x69e   :  { %5023 = vmatmul.msk.f32.vlgmr.msrb.gmra.mxu2 %vm1560_vm8, %v5512_v16 }
 0x6a0   :  { %v1527_v45 = vpop.xlane.xlu1 %1526 }
 0x6a1   :  { %v1528_v25 = vcvt.f32.s32 %v1527_v45 }
 0x6a3   :  { %v1531_v26 = vadd.s32 %v1530_v27, %v1528_v25 }
 0x6a5   :  { %vm1561_vm9 = vcmp.eq.s32.totalorder %v6890_v60, %v1531_v26 }
 0x6a6   :  { %5024 = vmatmul.msk.f32.gmra.mxu2 %vm1561_vm9, %v5512_v16 }
 0x6a8   :  { %v1541_v34 = vpop.xlane.xlu2 %1540 }
 0x6a9   :  { %v1542_v33 = vcvt.f32.s32 %v1541_v34 }
 0x6ab   :  { %v1545_v7 = vadd.s32 %v1544_v46, %v1542_v33 }
 0x6ad   :  { %vm1562_vm10 = vcmp.eq.s32.totalorder %v6890_v60, %v1545_v7 }
 0x6ae   :  { %5025 = vmatmul.msk.f32.gmra.mxu2 %vm1562_vm10, %v5512_v16 }
 0x6b0   :  { %v1555_v41 = vpop.xlane.xlu0 %1554 }
 0x6b1   :  { %v1556_v23 = vcvt.f32.s32 %v1555_v41 }
 0x6b3   :  { %v1559_v61 = vadd.s32 %v1558_v18, %v1556_v23 }
 0x6b5   :  { %vm1563_vm11 = vcmp.eq.s32.totalorder %v6890_v60, %v1559_v61 }
 0x6b6   :  { %5026 = vmatmul.msk.f32.gmra.mxu2 %vm1563_vm11, %v5512_v16 }
 0x721   :  { %v1605_v20 = vpop.f32.mrf.mxu2 }
 0x722   :  { %1617 = vst.msk [vmem:[%s8962_s17 + $0x20] sm:$0xff] %vm379_vm0, %v1605_v20  ;;  %v1621_v31 = vsub.f32 %v1605_v20, %v6838_v48 }
 0x724   :  { %v1625_v19 = vmul.f32 %v1621_v31, %v1621_v31 }
 0x726   :  { %v1629_v17 = vsel %vm379_vm0, %v1625_v19, 0.0 }
 0x727   :  { %1630 = vadd.xlane.f32.xlu1 %v1629_v17 }
 0x729   :  { %v1608_v22 = vpop.f32.mrf.mxu2 }
 0x72a   :  { %1618 = vst.msk [vmem:[%s8962_s17 + $0x28] sm:$0xff] %vm379_vm0, %v1608_v22  ;;  %v1622_v60 = vsub.f32 %v1608_v22, %v6850_v35 }
 0x72c   :  { %v1626_v28 = vmul.f32 %v1622_v60, %v1622_v60 }
 0x72e   :  { %v1632_v40 = vsel %vm379_vm0, %v1626_v28, 0.0 }
 0x72f   :  { %1633 = vadd.xlane.f32.xlu2 %v1632_v40 }
 0x731   :  { %v1611_v43 = vpop.f32.mrf.mxu2 }
 0x732   :  { %1619 = vst.msk [vmem:[%s8962_s17 + $0x30] sm:$0xff] %vm379_vm0, %v1611_v43  ;;  %v1623_v48 = vsub.f32 %v1611_v43, %v6862_v59 }
 0x734   :  { %v1627_v62 = vmul.f32 %v1623_v48, %v1623_v48 }
 0x736   :  { %v1635_v63 = vsel %vm379_vm0, %v1627_v62, 0.0 }
 0x737   :  { %1636 = vadd.xlane.f32.xlu0 %v1635_v63 }
 0x739   :  { %v1614_v29 = vpop.f32.mrf.mxu2 }
 0x73a   :  { %1620 = vst.msk [vmem:[%s8962_s17 + $0x38] sm:$0xff] %vm379_vm0, %v1614_v29  ;;  %v1624_v35 = vsub.f32 %v1614_v29, %v6874_v32  ;;  %5424 = vmatpush.msra.mxu2 %v1614_v29  ;;  %5425 = vmatpush.msrb.mxu3 %v1614_v29 }
 0x73c   :  { %v1628_v49 = vmul.f32 %v1624_v35, %v1624_v35 }
 0x73e   :  { %v1638_v44 = vsel %vm379_vm0, %v1628_v49, 0.0 }
 0x73f   :  { %1639 = vadd.xlane.f32.xlu1 %v1638_v44 }
 0x79a   :  { %v1631_v42 = vpop.xlane.xlu1 %1630 }
 0x7a2   :  { %v1634_v39 = vpop.xlane.xlu2 %1633 }
 0x7a3   :  { %v1641_v59 = vadd.f32 %v1634_v39, %v1631_v42 }
 0x7aa   :  { %v1637_v37 = vpop.xlane.xlu0 %1636 }
 0x7ab   :  { %v1642_v30 = vadd.f32 %v1641_v59, %v1637_v37 }
 0x7b2   :  { %v1640_v24 = vpop.xlane.xlu1 %1639 }
 0x7b3   :  { %v1643_v58 = vadd.f32 %v1642_v30, %v1640_v24 }
 0x7b5   :  { %v1644_v16 = vrot.slane %v1643_v58, 4 }
 0x7b7   :  { %v1645_v45 = vadd.f32 %v1644_v16, %v1643_v58 }
 0x7b9   :  { %v1646_v27 = vrot.slane %v1645_v45, 2 }
 0x7bb   :  { %v1647_v25 = vadd.f32 %v1646_v27, %v1645_v45 }
 0x7bd   :  { %v1648_v26 = vrot.slane %v1647_v25, 1 }
 0x7bf   :  { %v1649_v36 = vadd.f32 %v1648_v26, %v1647_v25 }
 0x7c1   :  { %v1650_v34 = vmul.f32 0.0012207031, %v1649_v36 }
 0x7c3   :  { %1652 = vst.msk [vmem:[#allocation5] sm:$0x1] %vm1651_vm12, %v1650_v34 }
 0x7c4   :  { %5506 = dma.done.wait [#allocation3], 18432 }
 0x7c5   :  { %5507 = vsyncadd [#allocation3], 4294948864  ;;  %2244 = vmatpush.msra.mxu1 %v1614_v29  ;;  %5426 = vmatpush.msra.mxu2 %v1611_v43  ;;  %v9119_v33 = vld [vmem:[#allocation21_spill] sm:$0xff]  ;;  %v9120_v7 = vld [vmem:[#allocation55_spill] sm:$0xff]  ;;  %s5514_s10 = smov [#allocation5]  }
 0x7c6   :  { %5427 = vmatpush.msrb.mxu3 %v1611_v43  ;;  %v9121_v18 = vld [vmem:[#allocation22_spill] sm:$0xff]  ;;  %v9122_v23 = vld [vmem:[#allocation56_spill] sm:$0xff]  ;;  %v9123_v17 = vld [vmem:[#allocation23_spill] sm:$0xff]  ;;  %s4918_s3 = sshll.u32 %s5514_s10, 4  ;;  %s4919_s3 = int_to_ptr.vmem [resolvable:$true] %s4918_s3 }
 0x7c7   :  { %2245 = vmatpush.msra.mxu1 %v1611_v43  ;;  %5428 = vmatpush.msra.mxu2 %v1608_v22  ;;  %v5174_v31 = vld [vmem:[%s8957_s12 + $0x38] sm:$0xff]  ;;  %v5173_v19 = vld [vmem:[%s8957_s12 + $0x30] sm:$0xff]  ;;  %v5172_v60 = vld [vmem:[%s8957_s12 + $0x28] sm:$0xff] }
 0x7c8   :  { %5429 = vmatpush.msrb.mxu3 %v1608_v22  ;;  %2750 = vmatpush.msra.mxu0 %v5174_v31  ;;  %v5171_v28 = vld [vmem:[%s8957_s12 + $0x20] sm:$0xff]  ;;  %v9126_v62 = vld [vmem:[#allocation58_spill] sm:$0xff]  ;;  %v9127_v35 = vld [vmem:[#allocation25_spill] sm:$0xff] }
 0x7c9   :  { %2246 = vmatpush.msra.mxu1 %v1608_v22  ;;  %5430 = vmatpush.msra.mxu2 %v1605_v20  ;;  %v9124_v22 = vld [vmem:[#allocation57_spill] sm:$0xff]  ;;  %v9125_v48 = vld [vmem:[#allocation24_spill] sm:$0xff]  ;;  %v9128_v49 = vld [vmem:[#allocation59_spill] sm:$0xff] }
 0x7ca   :  { %5431 = vmatpush.msrb.mxu3 %v1605_v20  ;;  %5035 = vmatmul.msk.f32.vlgmr.msra.gmra.mxu2 %vm379_vm0, %v5653_v8  ;;  %v9105_v8 = vld [vmem:[#allocation14_spill] sm:$0xff]  ;;  %v9130_v37 = vld [vmem:[#allocation60_spill] sm:$0xff]  ;;  %v9131_v24 = vld [vmem:[#allocation27_spill] sm:$0xff] }
 0x7cb   :  { %5077 = vmatmul.msk.f32.vlgmr.msrb.gmra.mxu3 %vm379_vm0, %v5863_v50  ;;  %2247 = vmatpush.msra.mxu1 %v1605_v20  ;;  %v9113_v50 = vld [vmem:[#allocation18_spill] sm:$0xff]  ;;  %v9132_v58 = vld [vmem:[#allocation61_spill] sm:$0xff]  ;;  %v9133_v27 = vld [vmem:[#allocation28_spill] sm:$0xff] }
 0x7cc   :  { %5027 = vmatmul.msk.f32.vlgmr.msra.gmra.mxu1 %vm379_vm0, %v5613_v0  ;;  %v9098_v0 = vld [vmem:[#allocation10_spill] sm:$0xff]  ;;  %2751 = vmatpush.msra.mxu0 %v5173_v19  ;;  %v9135_v34 = vld [vmem:[#allocation29_spill] sm:$0xff]  ;;  %v9147_v19 = vld [vmem:[#allocation35_spill] sm:$0xff] }
 0x7cd   :  { %v9129_v39 = vld [vmem:[#allocation26_spill] sm:$0xff]  ;;  %v9182_v38 = vld [vmem:[#allocation93_spill] sm:$0xff] }
 0x7ce   :  { %2752 = vmatpush.msra.mxu0 %v5172_v60  ;;  %v9134_v25 = vld [vmem:[#allocation62_spill] sm:$0xff] }
 0x7cf   :  { %v5250_v31 = vld [vmem:[%s8957_s12 + $0x98] sm:$0xff] }
 0x7d0   :  { %2753 = vmatpush.msra.mxu0 %v5171_v28  ;;  %3249 = vmatpush.msrb.mxu2 %v5250_v31  ;;  %v9149_v28 = vld [vmem:[#allocation36_spill] sm:$0xff] }
 0x7d2   :  { %5036 = vmatmul.msk.f32.gmra.mxu2 %vm379_vm0, %v5658_v9  ;;  %v9106_v9 = vld [vmem:[#allocation48_spill] sm:$0xff] }
 0x7d3   :  { %5078 = vmatmul.msk.f32.gmra.mxu3 %vm379_vm0, %v5868_v51  ;;  %v9114_v51 = vld [vmem:[#allocation52_spill] sm:$0xff] }
 0x7d4   :  { %5028 = vmatmul.msk.f32.gmra.mxu1 %vm379_vm0, %v5618_v1  ;;  %v9099_v1 = vld [vmem:[#allocation11_spill] sm:$0xff] }
 0x7da   :  { %5037 = vmatmul.msk.f32.gmra.mxu2 %vm379_vm0, %v5663_v10  ;;  %v9107_v10 = vld [vmem:[#allocation15_spill] sm:$0xff] }
 0x7db   :  { %5079 = vmatmul.msk.f32.gmra.mxu3 %vm379_vm0, %v5873_v52  ;;  %v9115_v52 = vld [vmem:[#allocation19_spill] sm:$0xff] }
 0x7dc   :  { %5029 = vmatmul.msk.f32.gmra.mxu1 %vm379_vm0, %v5623_v2  ;;  %v9100_v2 = vld [vmem:[#allocation45_spill] sm:$0xff] }
 0x7e2   :  { %5038 = vmatmul.msk.f32.gmra.mxu2 %vm379_vm0, %v5668_v11  ;;  %v9108_v11 = vld [vmem:[#allocation49_spill] sm:$0xff] }
 0x7e3   :  { %5080 = vmatmul.msk.f32.gmra.mxu3 %vm379_vm0, %v5878_v53  ;;  %v9116_v53 = vld [vmem:[#allocation53_spill] sm:$0xff] }
 0x7e4   :  { %5030 = vmatmul.msk.f32.gmra.mxu1 %vm379_vm0, %v5628_v3  ;;  %v9101_v3 = vld [vmem:[#allocation12_spill] sm:$0xff] }
 0x7ea   :  { %5039 = vmatmul.msk.f32.gmra.mxu2 %vm379_vm0, %v5673_v12  ;;  %v9109_v12 = vld [vmem:[#allocation16_spill] sm:$0xff] }
 0x7eb   :  { %5081 = vmatmul.msk.f32.gmra.mxu3 %vm379_vm0, %v5883_v54 }
 0x7ec   :  { %5031 = vmatmul.msk.f32.gmra.mxu1 %vm379_vm0, %v5633_v4  ;;  %v9102_v4 = vld [vmem:[#allocation46_spill] sm:$0xff] }
 0x7f2   :  { %5040 = vmatmul.msk.f32.gmra.mxu2 %vm379_vm0, %v5678_v13  ;;  %v9110_v13 = vld [vmem:[#allocation50_spill] sm:$0xff] }
 0x7f3   :  { %5082 = vmatmul.msk.f32.gmra.mxu3 %vm379_vm0, %v5888_v55 }
 0x7f4   :  { %5032 = vmatmul.msk.f32.gmra.mxu1 %vm379_vm0, %v5638_v5  ;;  %v9103_v5 = vld [vmem:[#allocation13_spill] sm:$0xff] }
 0x7fa   :  { %5041 = vmatmul.msk.f32.gmra.mxu2 %vm379_vm0, %v5683_v14  ;;  %v9111_v14 = vld [vmem:[#allocation17_spill] sm:$0xff] }
 0x7fb   :  { %5083 = vmatmul.msk.f32.gmra.mxu3 %vm379_vm0, %v5893_v56  ;;  %v9117_v56 = vld [vmem:[#allocation20_spill] sm:$0xff] }
 0x7fc   :  { %5033 = vmatmul.msk.f32.gmra.mxu1 %vm379_vm0, %v5643_v6  ;;  %v9104_v6 = vld [vmem:[#allocation47_spill] sm:$0xff] }
 0x802   :  { %5042 = vmatmul.msk.f32.gmra.mxu2 %vm379_vm0, %v5688_v15  ;;  %v9112_v15 = vld [vmem:[#allocation51_spill] sm:$0xff] }
 0x803   :  { %5084 = vmatmul.msk.f32.gmra.mxu3 %vm379_vm0, %v5898_v57  ;;  %v9118_v57 = vld [vmem:[#allocation54_spill] sm:$0xff] }
 0x804   :  { %5034 = vmatmul.msk.f32.gmra.mxu1 %vm379_vm0, %v9098_v0  ;;  %v9136_v0 = vld [vmem:[#allocation63_spill] sm:$0xff] }
 0x80a   :  { %5043 = vmatmul.msk.f32.gmra.mxu2 %vm379_vm0, %v9099_v1 }
 0x80b   :  { %5085 = vmatmul.msk.f32.gmra.mxu3 %vm379_vm0, %v9100_v2 }
 0x812   :  { %5044 = vmatmul.msk.f32.gmra.mxu2 %vm379_vm0, %v9101_v3  ;;  %v2684_v3 = vld [vmem:[%s8957_s12 + $0x18] sm:$0xff] }
 0x813   :  { %5086 = vmatmul.msk.f32.gmra.mxu3 %vm379_vm0, %v9102_v4  ;;  %2863 = vmatpush.msrb.mxu0 %v2684_v3  ;;  %v9137_v4 = vld [vmem:[#allocation30_spill] sm:$0xff] }
 0x81a   :  { %5045 = vmatmul.msk.f32.gmra.mxu2 %vm379_vm0, %v9103_v5  ;;  %v9138_v5 = vld [vmem:[#allocation64_spill] sm:$0xff] }
 0x81b   :  { %5087 = vmatmul.msk.f32.gmra.mxu3 %vm379_vm0, %v9104_v6 }
 0x822   :  { %5046 = vmatmul.msk.f32.gmra.mxu2 %vm379_vm0, %v9105_v8 }
 0x823   :  { %5088 = vmatmul.msk.f32.gmra.mxu3 %vm379_vm0, %v9106_v9  ;;  %v9139_v9 = vld [vmem:[#allocation31_spill] sm:$0xff] }
 0x82a   :  { %5047 = vmatmul.msk.f32.gmra.mxu2 %vm379_vm0, %v9107_v10  ;;  %v9140_v10 = vld [vmem:[#allocation65_spill] sm:$0xff] }
 0x82b   :  { %5089 = vmatmul.msk.f32.gmra.mxu3 %vm379_vm0, %v9108_v11 }
 0x832   :  { %5048 = vmatmul.msk.f32.gmra.mxu2 %vm379_vm0, %v9109_v12 }
 0x833   :  { %5090 = vmatmul.msk.f32.gmra.mxu3 %vm379_vm0, %v9110_v13  ;;  %v9141_v13 = vld [vmem:[#allocation32_spill] sm:$0xff] }
 0x83a   :  { %5049 = vmatmul.msk.f32.gmra.mxu2 %vm379_vm0, %v9111_v14  ;;  %v9142_v14 = vld [vmem:[#allocation66_spill] sm:$0xff] }
 0x83b   :  { %5091 = vmatmul.msk.f32.gmra.mxu3 %vm379_vm0, %v9112_v15 }
 0x842   :  { %5050 = vmatmul.msk.f32.gmra.mxu2 %vm379_vm0, %v9113_v50 }
 0x843   :  { %5092 = vmatmul.msk.f32.gmra.mxu3 %vm379_vm0, %v9114_v51  ;;  %v9143_v51 = vld [vmem:[#allocation33_spill] sm:$0xff] }
 0x84a   :  { %5051 = vmatmul.msk.f32.gmra.mxu2 %vm379_vm0, %v9115_v52  ;;  %v9144_v52 = vld [vmem:[#allocation67_spill] sm:$0xff] }
 0x84b   :  { %5093 = vmatmul.msk.f32.gmra.mxu3 %vm379_vm0, %v9116_v53 }
 0x84d   :  { %v7056_v54 = vpop.f32.mrf.mxu2 }
 0x84e   :  { %v7058_v55 = vpop.f32.mrf.mxu3 }
 0x852   :  { %5052 = vmatmul.msk.f32.gmra.mxu2 %vm379_vm0, %v9117_v56 }
 0x853   :  { %5094 = vmatmul.msk.f32.gmra.mxu3 %vm379_vm0, %v9118_v57  ;;  %v2683_v57 = vld [vmem:[%s8957_s12 + $0x10] sm:$0xff] }
 0x854   :  { %2864 = vmatpush.msrb.mxu0 %v2683_v57 }
 0x855   :  { %v7064_v32 = vpop.f32.mrf.mxu2 }
 0x856   :  { %v7066_v46 = vpop.f32.mrf.mxu3 }
 0x85a   :  { %5053 = vmatmul.msk.f32.gmra.mxu2 %vm379_vm0, %v9119_v33  ;;  %v9145_v33 = vld [vmem:[#allocation34_spill] sm:$0xff] }
 0x85b   :  { %5095 = vmatmul.msk.f32.gmra.mxu3 %vm379_vm0, %v9120_v7  ;;  %v9146_v7 = vld [vmem:[#allocation68_spill] sm:$0xff] }
 0x85d   :  { %v7072_v21 = vpop.f32.mrf.mxu2 }
 0x85e   :  { %v7074_v41 = vpop.f32.mrf.mxu3 }
 0x862   :  { %5054 = vmatmul.msk.f32.gmra.mxu2 %vm379_vm0, %v9121_v18 }
 0x863   :  { %5096 = vmatmul.msk.f32.gmra.mxu3 %vm379_vm0, %v9122_v23 }
 0x865   :  { %v7080_v61 = vpop.f32.mrf.mxu2 }
 0x866   :  { %v7082_v20 = vpop.f32.mrf.mxu3 }
 0x86a   :  { %5055 = vmatmul.msk.f32.gmra.mxu2 %vm379_vm0, %v9123_v17  ;;  %v9148_v17 = vld [vmem:[#allocation69_spill] sm:$0xff] }
 0x86b   :  { %5097 = vmatmul.msk.f32.gmra.mxu3 %vm379_vm0, %v9124_v22 }
 0x86d   :  { %v7100_v40 = vpop.f32.mrf.mxu2 }
 0x86e   :  { %v7102_v43 = vpop.f32.mrf.mxu3 }
 0x872   :  { %5056 = vmatmul.msk.f32.gmra.mxu2 %vm379_vm0, %v9125_v48  ;;  %v9150_v48 = vld [vmem:[#allocation70_spill] sm:$0xff] }
 0x873   :  { %5098 = vmatmul.msk.f32.gmra.mxu3 %vm379_vm0, %v9126_v62 }
 0x875   :  { %v7108_v63 = vpop.f32.mrf.mxu2 }
 0x876   :  { %v7110_v29 = vpop.f32.mrf.mxu3 }
 0x87a   :  { %5057 = vmatmul.msk.f32.gmra.mxu2 %vm379_vm0, %v9127_v35 }
 0x87b   :  { %5099 = vmatmul.msk.f32.gmra.mxu3 %vm379_vm0, %v9128_v49  ;;  %v9151_v49 = vld [vmem:[#allocation37_spill] sm:$0xff] }
 0x87d   :  { %v7116_v44 = vpop.f32.mrf.mxu2 }
 0x87e   :  { %v7118_v42 = vpop.f32.mrf.mxu3 }
 0x882   :  { %5058 = vmatmul.msk.f32.gmra.mxu2 %vm379_vm0, %v9129_v39  ;;  %v9152_v39 = vld [vmem:[#allocation71_spill] sm:$0xff] }
 0x883   :  { %5100 = vmatmul.msk.f32.gmra.mxu3 %vm379_vm0, %v9130_v37 }
 0x885   :  { %v7124_v59 = vpop.f32.mrf.mxu2 }
 0x886   :  { %v7126_v30 = vpop.f32.mrf.mxu3 }
 0x88a   :  { %5059 = vmatmul.msk.f32.gmra.mxu2 %vm379_vm0, %v9131_v24 }
 0x88b   :  { %5101 = vmatmul.msk.f32.gmra.mxu3 %vm379_vm0, %v9132_v58  ;;  %v2682_v58 = vld [vmem:[%s8957_s12 + $0x8] sm:$0xff] }
 0x88c   :  { %2865 = vmatpush.msrb.mxu0 %v2682_v58 }
 0x88d   :  { %v2297_v16 = vpop.f32.mrf.mxu2 }
 0x88e   :  { %v7132_v45 = vpop.f32.mrf.mxu3  ;;  %5175 = vmatmul.msk.f32.vlgmr.msra.gmra.mxu0 %vm379_vm0, %v2297_v16  ;;  %v9153_v16 = vld [vmem:[#allocation38_spill] sm:$0xff] }
 0x892   :  { %5060 = vmatmul.msk.f32.gmra.mxu2 %vm379_vm0, %v9133_v27  ;;  %v9154_v27 = vld [vmem:[#allocation72_spill] sm:$0xff] }
 0x893   :  { %5102 = vmatmul.msk.f32.gmra.mxu3 %vm379_vm0, %v9134_v25 }
 0x895   :  { %v2300_v26 = vpop.f32.mrf.mxu2 }
 0x896   :  { %v7139_v36 = vpop.f32.mrf.mxu3  ;;  %5176 = vmatmul.msk.f32.gmra.mxu0 %vm379_vm0, %v2300_v26 }
 0x89a   :  { %5061 = vmatmul.msk.f32.gmra.mxu2 %vm379_vm0, %v9135_v34  ;;  %v9155_v34 = vld [vmem:[#allocation39_spill] sm:$0xff] }
 0x89b   :  { %5103 = vmatmul.msk.f32.gmra.mxu3 %vm379_vm0, %v9136_v0  ;;  %v9156_v0 = vld [vmem:[#allocation73_spill] sm:$0xff] }
 0x89d   :  { %v2303_v1 = vpop.f32.mrf.mxu2 }
 0x89e   :  { %v7146_v2 = vpop.f32.mrf.mxu3  ;;  %5177 = vmatmul.msk.f32.gmra.mxu0 %vm379_vm0, %v2303_v1  ;;  %v2681_v1 = vld [vmem:[%s8957_s12] sm:$0xff] }
 0x89f   :  { %2866 = vmatpush.msrb.mxu0 %v2681_v1 }
 0x8a2   :  { %5062 = vmatmul.msk.f32.gmra.mxu2 %vm379_vm0, %v9137_v4 }
 0x8a3   :  { %5104 = vmatmul.msk.f32.gmra.mxu3 %vm379_vm0, %v9138_v5  ;;  %v9157_v5 = vld [vmem:[#allocation40_spill] sm:$0xff] }
 0x8a5   :  { %v2306_v6 = vpop.f32.mrf.mxu2 }
 0x8a6   :  { %v7156_v8 = vpop.f32.mrf.mxu3  ;;  %5178 = vmatmul.msk.f32.gmra.mxu0 %vm379_vm0, %v2306_v6  ;;  %v9158_v6 = vld [vmem:[#allocation74_spill] sm:$0xff] }
 0x8aa   :  { %5063 = vmatmul.msk.f32.gmra.mxu2 %vm379_vm0, %v9139_v9  ;;  %v5249_v9 = vld [vmem:[%s8957_s12 + $0x90] sm:$0xff] }
 0x8ab   :  { %5105 = vmatmul.msk.f32.gmra.mxu3 %vm379_vm0, %v9140_v10  ;;  %3250 = vmatpush.msrb.mxu2 %v5249_v9 }
 0x8ad   :  { %v2309_v11 = vpop.f32.mrf.mxu2 }
 0x8ae   :  { %v7163_v12 = vpop.f32.mrf.mxu3  ;;  %5179 = vmatmul.msk.f32.gmra.mxu0 %vm379_vm0, %v2309_v11 }
 0x8b2   :  { %5064 = vmatmul.msk.f32.gmra.mxu2 %vm379_vm0, %v9141_v13  ;;  %v5248_v13 = vld [vmem:[%s8957_s12 + $0x88] sm:$0xff] }
 0x8b3   :  { %5106 = vmatmul.msk.f32.gmra.mxu3 %vm379_vm0, %v9142_v14  ;;  %v5247_v14 = vld [vmem:[%s8957_s12 + $0x80] sm:$0xff]  ;;  %3251 = vmatpush.msrb.mxu2 %v5248_v13 }
 0x8b5   :  { %v2312_v15 = vpop.f32.mrf.mxu2  ;;  %3252 = vmatpush.msrb.mxu2 %v5247_v14  ;;  %v9169_v14 = vld [vmem:[#allocation81_spill] sm:$0xff] }
 0x8b6   :  { %v7170_v50 = vpop.f32.mrf.mxu3  ;;  %5180 = vmatmul.msk.f32.gmra.mxu0 %vm379_vm0, %v2312_v15  ;;  %v9159_v15 = vld [vmem:[#allocation41_spill] sm:$0xff] }
 0x8ba   :  { %5065 = vmatmul.msk.f32.gmra.mxu2 %vm379_vm0, %v9143_v51  ;;  %v9160_v51 = vld [vmem:[#allocation75_spill] sm:$0xff] }
 0x8bb   :  { %5107 = vmatmul.msk.f32.gmra.mxu3 %vm379_vm0, %v9144_v52  ;;  %v2249_v52 = vpop.f32.mrf.mxu1 }
 0x8bd   :  { %v2315_v53 = vpop.f32.mrf.mxu2 }
 0x8be   :  { %v7177_v56 = vpop.f32.mrf.mxu3  ;;  %5181 = vmatmul.msk.f32.gmra.mxu0 %vm379_vm0, %v2315_v53 }
 0x8c2   :  { %5066 = vmatmul.msk.f32.gmra.mxu2 %vm379_vm0, %v9145_v33  ;;  %v9161_v33 = vld [vmem:[#allocation42_spill] sm:$0xff] }
 0x8c3   :  { %5108 = vmatmul.msk.f32.gmra.mxu3 %vm379_vm0, %v9146_v7  ;;  %v9162_v7 = vld [vmem:[#allocation76_spill] sm:$0xff] }
 0x8c5   :  { %v2318_v18 = vpop.f32.mrf.mxu2 }
 0x8c6   :  { %v7187_v23 = vpop.f32.mrf.mxu3  ;;  %5182 = vmatmul.msk.f32.gmra.mxu0 %vm379_vm0, %v2318_v18 }
 0x8ca   :  { %5067 = vmatmul.msk.f32.gmra.mxu2 %vm379_vm0, %v9147_v19  ;;  %v2252_v19 = vpop.f32.mrf.mxu1 }
 0x8cb   :  { %5109 = vmatmul.msk.f32.gmra.mxu3 %vm379_vm0, %v9148_v17  ;;  %v9163_v17 = vld [vmem:[#allocation43_spill] sm:$0xff] }
 0x8cd   :  { %v2321_v22 = vpop.f32.mrf.mxu2 }
 0x8ce   :  { %v7197_v60 = vpop.f32.mrf.mxu3  ;;  %5183 = vmatmul.msk.f32.gmra.mxu0 %vm379_vm0, %v2321_v22  ;;  %v9164_v22 = vld [vmem:[#allocation77_spill] sm:$0xff] }
 0x8d2   :  { %5068 = vmatmul.msk.f32.gmra.mxu2 %vm379_vm0, %v9149_v28 }
 0x8d3   :  { %5110 = vmatmul.msk.f32.gmra.mxu3 %vm379_vm0, %v9150_v48 }
 0x8d5   :  { %v2324_v62 = vpop.f32.mrf.mxu2 }
 0x8d6   :  { %v7204_v35 = vpop.f32.mrf.mxu3  ;;  %5184 = vmatmul.msk.f32.gmra.mxu0 %vm379_vm0, %v2324_v62 }
 0x8da   :  { %5069 = vmatmul.msk.f32.gmra.mxu2 %vm379_vm0, %v9151_v49  ;;  %v2255_v49 = vpop.f32.mrf.mxu1 }
 0x8db   :  { %5111 = vmatmul.msk.f32.gmra.mxu3 %vm379_vm0, %v9152_v39  ;;  %v9165_v39 = vld [vmem:[#allocation44_spill] sm:$0xff] }
 0x8dd   :  { %v2327_v37 = vpop.f32.mrf.mxu2 }
 0x8de   :  { %v7211_v24 = vpop.f32.mrf.mxu3  ;;  %5185 = vmatmul.msk.f32.gmra.mxu0 %vm379_vm0, %v2327_v37  ;;  %v9166_v37 = vld [vmem:[#allocation78_spill] sm:$0xff] }
 0x8e2   :  { %5070 = vmatmul.msk.f32.gmra.mxu2 %vm379_vm0, %v9153_v16 }
 0x8e3   :  { %5112 = vmatmul.msk.f32.gmra.mxu3 %vm379_vm0, %v9154_v27 }
 0x8e5   :  { %v2330_v25 = vpop.f32.mrf.mxu2 }
 0x8e6   :  { %v7221_v26 = vpop.f32.mrf.mxu3  ;;  %5186 = vmatmul.msk.f32.gmra.mxu0 %vm379_vm0, %v2330_v25  ;;  %v9167_v25 = vld [vmem:[#allocation79_spill] sm:$0xff] }
 0x8ea   :  { %5071 = vmatmul.msk.f32.gmra.mxu2 %vm379_vm0, %v9155_v34  ;;  %v2258_v34 = vpop.f32.mrf.mxu1 }
 0x8eb   :  { %5113 = vmatmul.msk.f32.gmra.mxu3 %vm379_vm0, %v9156_v0 }
 0x8ed   :  { %v2333_v3 = vpop.f32.mrf.mxu2 }
 0x8ee   :  { %v7231_v4 = vpop.f32.mrf.mxu3  ;;  %5187 = vmatmul.msk.f32.gmra.mxu0 %vm379_vm0, %v2333_v3 }
 0x8f2   :  { %5072 = vmatmul.msk.f32.gmra.mxu2 %vm379_vm0, %v9157_v5  ;;  %v5210_v5 = vld [vmem:[%s8957_s12 + $0x58] sm:$0xff]  ;;  %v2261_v9 = vpop.f32.mrf.mxu1 }
 0x8f3   :  { %5114 = vmatmul.msk.f32.gmra.mxu3 %vm379_vm0, %v9158_v6  ;;  %2981 = vmatpush.msra.mxu0 %v5210_v5  ;;  %v9168_v6 = vld [vmem:[#allocation80_spill] sm:$0xff]  ;;  %v9173_v5 = vld [vmem:[#allocation85_spill] sm:$0xff] }
 0x8f5   :  { %v2336_v10 = vpop.f32.mrf.mxu2 }
 0x8f6   :  { %v7241_v11 = vpop.f32.mrf.mxu3  ;;  %5188 = vmatmul.msk.f32.gmra.mxu0 %vm379_vm0, %v2336_v10 }
 0x8fa   :  { %5073 = vmatmul.msk.f32.gmra.mxu2 %vm379_vm0, %v9159_v15 }
 0x8fb   :  { %5115 = vmatmul.msk.f32.gmra.mxu3 %vm379_vm0, %v9160_v51 }
 0x8fd   :  { %v2339_v53 = vpop.f32.mrf.mxu2 }
 0x8fe   :  { %v7254_v57 = vpop.f32.mrf.mxu3  ;;  %5189 = vmatmul.msk.f32.gmra.mxu0 %vm379_vm0, %v2339_v53  ;;  %v9170_v53 = vld [vmem:[#allocation82_spill] sm:$0xff] }
 0x902   :  { %5074 = vmatmul.msk.f32.gmra.mxu2 %vm379_vm0, %v9161_v33 }
 0x903   :  { %5116 = vmatmul.msk.f32.gmra.mxu3 %vm379_vm0, %v9162_v7 }
 0x905   :  { %v2342_v18 = vpop.f32.mrf.mxu2 }
 0x906   :  { %v7261_v31 = vpop.f32.mrf.mxu3  ;;  %5190 = vmatmul.msk.f32.gmra.mxu0 %vm379_vm0, %v2342_v18 }
 0x90a   :  { %5075 = vmatmul.msk.f32.gmra.mxu2 %vm379_vm0, %v9163_v17 }
 0x90b   :  { %5117 = vmatmul.msk.f32.gmra.mxu3 %vm379_vm0, %v9164_v22  ;;  %v7268_v28 = vpop.f32.mrf.mxu0 }
 0x90d   :  { %v7270_v48 = vpop.f32.mrf.mxu2 }
 0x90e   :  { %v7272_v62 = vpop.f32.mrf.mxu3  ;;  %5191 = vmatmul.msk.f32.vlgmr.msrb.gmra.mxu0 %vm379_vm0, %v2249_v52  ;;  %v2264_v52 = vpop.f32.mrf.mxu1 }
 0x912   :  { %5076 = vmatmul.msk.f32.gmra.mxu2 %vm379_vm0, %v9165_v39  ;;  %v9172_v39 = vld [vmem:[#allocation84_spill] sm:$0xff] }
 0x913   :  { %5118 = vmatmul.msk.f32.gmra.mxu3 %vm379_vm0, %v9166_v37  ;;  %v7279_v58 = vpop.f32.mrf.mxu0 }
 0x915   :  { %v7281_v16 = vpop.f32.mrf.mxu2 }
 0x916   :  { %v7283_v27 = vpop.f32.mrf.mxu3  ;;  %5192 = vmatmul.msk.f32.gmra.mxu0 %vm379_vm0, %v2252_v19  ;;  %v2267_v18 = vpop.f32.mrf.mxu1  ;;  %v9171_v19 = vld [vmem:[#allocation83_spill] sm:$0xff] }
 0x91a   :  { %5251 = vmatmul.msk.f32.vlgmr.msrb.gmra.mxu2 %vm379_vm0, %v7177_v56 }
 0x91b   :  { %5119 = vmatmul.msk.f32.gmra.mxu3 %vm379_vm0, %v9167_v25  ;;  %v7290_v0 = vpop.f32.mrf.mxu0 }
 0x91d   :  { %v7292_v1 = vpop.f32.mrf.mxu2 }
 0x91e   :  { %v7294_v3 = vpop.f32.mrf.mxu3  ;;  %5193 = vmatmul.msk.f32.gmra.mxu0 %vm379_vm0, %v2255_v49  ;;  %v5209_v49 = vld [vmem:[%s8957_s12 + $0x50] sm:$0xff]  ;;  %v2270_v37 = vpop.f32.mrf.mxu1 }
 0x91f   :  { %2982 = vmatpush.msra.mxu0 %v5209_v49  ;;  %v5208_v49 = vld [vmem:[%s8957_s12 + $0x48] sm:$0xff] }
 0x921   :  { %2983 = vmatpush.msra.mxu0 %v5208_v49  ;;  %v5227_v49 = vld [vmem:[%s8957_s12 + $0x60] sm:$0xff] }
 0x922   :  { %5252 = vmatmul.msk.f32.gmra.mxu2 %vm379_vm0, %v7187_v23 }
 0x923   :  { %5120 = vmatmul.msk.f32.gmra.mxu3 %vm379_vm0, %v9168_v6  ;;  %v7304_v56 = vpop.f32.mrf.mxu0 }
 0x925   :  { %v7306_v10 = vpop.f32.mrf.mxu2 }
 0x926   :  { %v7308_v13 = vpop.f32.mrf.mxu3  ;;  %5194 = vmatmul.msk.f32.gmra.mxu0 %vm379_vm0, %v2258_v34 }
 0x92a   :  { %5253 = vmatmul.msk.f32.gmra.mxu2 %vm379_vm0, %v7197_v60 }
 0x92b   :  { %5121 = vmatmul.msk.f32.gmra.mxu3 %vm379_vm0, %v9169_v14  ;;  %v7315_v15 = vpop.f32.mrf.mxu0  ;;  %v9174_v14 = vld [vmem:[#allocation86_spill] sm:$0xff] }
 0x92d   :  { %v7317_v51 = vpop.f32.mrf.mxu2 }
 0x92e   :  { %v7319_v23 = vpop.f32.mrf.mxu3  ;;  %5195 = vmatmul.msk.f32.gmra.mxu0 %vm379_vm0, %v2261_v9 }
 0x932   :  { %5254 = vmatmul.msk.f32.gmra.mxu2 %vm379_vm0, %v7204_v35 }
 0x933   :  { %5122 = vmatmul.msk.f32.gmra.mxu3 %vm379_vm0, %v9170_v53  ;;  %v7326_v33 = vpop.f32.mrf.mxu0 }
 0x935   :  { %v7328_v7 = vpop.f32.mrf.mxu2 }
 0x936   :  { %v7330_v60 = vpop.f32.mrf.mxu3  ;;  %5196 = vmatmul.msk.f32.gmra.mxu0 %vm379_vm0, %v2264_v52 }
 0x93a   :  { %5255 = vmatmul.msk.f32.gmra.mxu2 %vm379_vm0, %v7211_v24 }
 0x93b   :  { %5123 = vmatmul.msk.f32.gmra.mxu3 %vm379_vm0, %v9171_v19  ;;  %v7337_v17 = vpop.f32.mrf.mxu0 }
 0x93d   :  { %v7339_v22 = vpop.f32.mrf.mxu2 }
 0x93e   :  { %v7341_v35 = vpop.f32.mrf.mxu3  ;;  %5197 = vmatmul.msk.f32.gmra.mxu0 %vm379_vm0, %v2267_v18  ;;  %v9175_v18 = vld [vmem:[#allocation87_spill] sm:$0xff] }
 0x942   :  { %5256 = vmatmul.msk.f32.gmra.mxu2 %vm379_vm0, %v7221_v26 }
 0x943   :  { %5124 = vmatmul.msk.f32.gmra.mxu3 %vm379_vm0, %v9172_v39  ;;  %v7351_v24 = vpop.f32.mrf.mxu0 }
 0x945   :  { %v7353_v25 = vpop.f32.mrf.mxu2 }
 0x946   :  { %v7355_v34 = vpop.f32.mrf.mxu3  ;;  %5198 = vmatmul.msk.f32.gmra.mxu0 %vm379_vm0, %v2270_v37 }
 0x94a   :  { %5257 = vmatmul.msk.f32.gmra.mxu2 %vm379_vm0, %v7231_v4 }
 0x94b   :  { %5125 = vmatmul.msk.f32.gmra.mxu3 %vm379_vm0, %v9173_v5  ;;  %v7362_v6 = vpop.f32.mrf.mxu0  ;;  %v5229_v5 = vld [vmem:[%s8957_s12 + $0x70] sm:$0xff] }
 0x94d   :  { %v7364_v9 = vpop.f32.mrf.mxu2 }
 0x94e   :  { %v7366_v26 = vpop.f32.mrf.mxu3  ;;  %5199 = vmatmul.msk.f32.gmra.mxu0 %vm379_vm0, %v7056_v54 }
 0x952   :  { %5258 = vmatmul.msk.f32.gmra.mxu2 %vm379_vm0, %v7241_v11 }
 0x953   :  { %5126 = vmatmul.msk.f32.gmra.mxu3 %vm379_vm0, %v9174_v14  ;;  %v7374_v52 = vpop.f32.mrf.mxu0 }
 0x955   :  { %v7376_v53 = vpop.f32.mrf.mxu2 }
 0x956   :  { %v7378_v4 = vpop.f32.mrf.mxu3  ;;  %5200 = vmatmul.msk.f32.gmra.mxu0 %vm379_vm0, %v7064_v32  ;;  %v9176_v32 = vld [vmem:[#allocation88_spill] sm:$0xff] }
 0x95a   :  { %5259 = vmatmul.msk.f32.gmra.mxu2 %vm379_vm0, %v7254_v57 }
 0x95b   :  { %5127 = vmatmul.msk.f32.gmra.mxu3 %vm379_vm0, %v9175_v18  ;;  %v7386_v54 = vpop.f32.mrf.mxu0  ;;  %v5207_v18 = vld [vmem:[%s8957_s12 + $0x40] sm:$0xff] }
 0x95c   :  { %2984 = vmatpush.msra.mxu0 %v5207_v18  ;;  %v9179_v18 = vld [vmem:[#allocation91_spill] sm:$0xff] }
 0x95d   :  { %v7388_v19 = vpop.f32.mrf.mxu2 }
 0x95e   :  { %v7390_v11 = vpop.f32.mrf.mxu3  ;;  %5201 = vmatmul.msk.f32.gmra.mxu0 %vm379_vm0, %v7072_v21  ;;  %v5230_v21 = vld [vmem:[%s8957_s12 + $0x78] sm:$0xff] }
 0x95f   :  { %3115 = vmatpush.msrb.mxu1 %v5230_v21 }
 0x961   :  { %3116 = vmatpush.msrb.mxu1 %v5229_v5 }
 0x962   :  { %5260 = vmatmul.msk.f32.gmra.mxu2 %vm379_vm0, %v7261_v31  ;;  %v9177_v31 = vld [vmem:[#allocation89_spill] sm:$0xff] }
 0x963   :  { %5128 = vmatmul.msk.f32.gmra.mxu3 %vm379_vm0, %v9176_v32  ;;  %v7401_v57 = vpop.f32.mrf.mxu0 }
 0x965   :  { %v7403_v39 = vpop.f32.mrf.mxu2 }
 0x966   :  { %v7405_v37 = vpop.f32.mrf.mxu3  ;;  %5202 = vmatmul.msk.f32.gmra.mxu0 %vm379_vm0, %v7080_v61  ;;  %v5228_v61 = vld [vmem:[%s8957_s12 + $0x68] sm:$0xff] }
 0x967   :  { %3117 = vmatpush.msrb.mxu1 %v5228_v61 }
 0x969   :  { %3118 = vmatpush.msrb.mxu1 %v5227_v49 }
 0x96a   :  { %5261 = vmatmul.msk.f32.gmra.mxu2 %vm379_vm0, %v7272_v62  ;;  %v9178_v62 = vld [vmem:[#allocation90_spill] sm:$0xff] }
 0x96b   :  { %5129 = vmatmul.msk.f32.gmra.mxu3 %vm379_vm0, %v9177_v31  ;;  %v7422_v14 = vpop.f32.mrf.mxu0 }
 0x96d   :  { %v7430_v32 = vpop.f32.mrf.mxu2 }
 0x96e   :  { %v7432_v21 = vpop.f32.mrf.mxu3  ;;  %5203 = vmatmul.msk.f32.gmra.mxu0 %vm379_vm0, %v7100_v40 }
 0x972   :  { %5262 = vmatmul.msk.f32.gmra.mxu2 %vm379_vm0, %v7283_v27 }
 0x973   :  { %5130 = vmatmul.msk.f32.gmra.mxu3 %vm379_vm0, %v9178_v62  ;;  %v7440_v5 = vpop.f32.mrf.mxu0  ;;  %v9180_v62 = vld [vmem:[#allocation92_spill] sm:$0xff] }
 0x975   :  { %v7442_v31 = vpop.f32.mrf.mxu2 }
 0x976   :  { %v7444_v61 = vpop.f32.mrf.mxu3  ;;  %5204 = vmatmul.msk.f32.gmra.mxu0 %vm379_vm0, %v7108_v63 }
 0x97a   :  { %5263 = vmatmul.msk.f32.gmra.mxu2 %vm379_vm0, %v7294_v3 }
 0x97b   :  { %5131 = vmatmul.msk.f32.gmra.mxu3 %vm379_vm0, %v9179_v18  ;;  %v7452_v40 = vpop.f32.mrf.mxu0 }
 0x97d   :  { %v7454_v49 = vpop.f32.mrf.mxu2 }
 0x97e   :  { %v7456_v27 = vpop.f32.mrf.mxu3  ;;  %5205 = vmatmul.msk.f32.gmra.mxu0 %vm379_vm0, %v7116_v44 }
 0x982   :  { %5264 = vmatmul.msk.f32.gmra.mxu2 %vm379_vm0, %v7308_v13  ;;  %v9183_v13 = vld [vmem:[#allocation94_spill] sm:$0xff] }
 0x983   :  { %5132 = vmatmul.msk.f32.gmra.mxu3 %vm379_vm0, %v9180_v62  ;;  %v7464_v63 = vpop.f32.mrf.mxu0 }
 0x984   :  { %9181 = vst [vmem:[#allocation10_spill] sm:$0xff] %v7464_v63  ;;  %v9184_v63 = vld [vmem:[#allocation95_spill] sm:$0xff] }
 0x985   :  { %v7466_v18 = vpop.f32.mrf.mxu2 }
 0x986   :  { %v7468_v3 = vpop.f32.mrf.mxu3  ;;  %5206 = vmatmul.msk.f32.gmra.mxu0 %vm379_vm0, %v7124_v59 }
 0x98a   :  { %5265 = vmatmul.msk.f32.gmra.mxu2 %vm379_vm0, %v7319_v23 }
 0x98b   :  { %5133 = vmatmul.msk.f32.gmra.mxu3 %vm379_vm0, %v9182_v38  ;;  %v7476_v44 = vpop.f32.mrf.mxu0 }
 0x98d   :  { %v2393_v62 = vpop.f32.mrf.mxu2 }
 0x98e   :  { %v7478_v47 = vpop.f32.mrf.mxu3  ;;  %5211 = vmatmul.msk.f32.vlgmr.msra.gmra.mxu0 %vm379_vm0, %v7270_v48  ;;  %5231 = vmatmul.msk.f32.vlgmr.msrb.gmra.mxu1 %vm379_vm0, %v2393_v62 }
 0x992   :  { %5266 = vmatmul.msk.f32.gmra.mxu2 %vm379_vm0, %v7330_v60  ;;  %v5270_v60 = vld [vmem:[%s8957_s12 + $0xb8] sm:$0xff] }
 0x993   :  { %5134 = vmatmul.msk.f32.gmra.mxu3 %vm379_vm0, %v9183_v13  ;;  %v7487_v38 = vpop.f32.mrf.mxu0  ;;  %3383 = vmatpush.msrb.mxu0 %v5270_v60  ;;  %v9187_v60 = vld [vmem:[#allocation98_spill] sm:$0xff] }
 0x995   :  { %v2396_v59 = vpop.f32.mrf.mxu2 }
 0x996   :  { %v7489_v23 = vpop.f32.mrf.mxu3  ;;  %5212 = vmatmul.msk.f32.gmra.mxu0 %vm379_vm0, %v7281_v16  ;;  %5232 = vmatmul.msk.f32.gmra.mxu1 %vm379_vm0, %v2396_v59  ;;  %v9185_v16 = vld [vmem:[#allocation96_spill] sm:$0xff] }
 0x99b   :  { %5135 = vmatmul.msk.f32.gmra.mxu3 %vm379_vm0, %v9184_v63  ;;  %v7496_v48 = vpop.f32.mrf.mxu0 }
 0x99e   :  { %v7498_v62 = vpop.f32.mrf.mxu3  ;;  %5213 = vmatmul.msk.f32.gmra.mxu0 %vm379_vm0, %v7292_v1  ;;  %5233 = vmatmul.msk.f32.gmra.mxu1 %vm379_vm0, %v7058_v55  ;;  %v9186_v1 = vld [vmem:[#allocation97_spill] sm:$0xff] }
 0x9a3   :  { %5136 = vmatmul.msk.f32.gmra.mxu3 %vm379_vm0, %v9185_v16  ;;  %v7509_v13 = vpop.f32.mrf.mxu0 }
 0x9a6   :  { %v7511_v63 = vpop.f32.mrf.mxu3  ;;  %5214 = vmatmul.msk.f32.gmra.mxu0 %vm379_vm0, %v7306_v10  ;;  %5234 = vmatmul.msk.f32.gmra.mxu1 %vm379_vm0, %v7066_v46  ;;  %v9188_v46 = vld [vmem:[#allocation99_spill] sm:$0xff] }
 0x9ab   :  { %5137 = vmatmul.msk.f32.gmra.mxu3 %vm379_vm0, %v9186_v1  ;;  %v7519_v55 = vpop.f32.mrf.mxu0 }
 0x9ae   :  { %v7521_v59 = vpop.f32.mrf.mxu3  ;;  %5215 = vmatmul.msk.f32.gmra.mxu0 %vm379_vm0, %v7317_v51  ;;  %5235 = vmatmul.msk.f32.gmra.mxu1 %vm379_vm0, %v7074_v41  ;;  %v5269_v41 = vld [vmem:[%s8957_s12 + $0xb0] sm:$0xff] }
 0x9af   :  { %3384 = vmatpush.msrb.mxu0 %v5269_v41  ;;  %v9191_v41 = vld [vmem:[#allocation102_spill] sm:$0xff] }
 0x9b3   :  { %5138 = vmatmul.msk.f32.gmra.mxu3 %vm379_vm0, %v9187_v60  ;;  %v7529_v10 = vpop.f32.mrf.mxu0 }
 0x9b6   :  { %v7531_v16 = vpop.f32.mrf.mxu3  ;;  %5216 = vmatmul.msk.f32.gmra.mxu0 %vm379_vm0, %v7328_v7  ;;  %5236 = vmatmul.msk.f32.gmra.mxu1 %vm379_vm0, %v7082_v20  ;;  %v9189_v7 = vld [vmem:[#allocation100_spill] sm:$0xff] }
 0x9bb   :  { %5139 = vmatmul.msk.f32.gmra.mxu3 %vm379_vm0, %v9188_v46  ;;  %v7539_v51 = vpop.f32.mrf.mxu0 }
 0x9be   :  { %v7541_v1 = vpop.f32.mrf.mxu3  ;;  %5217 = vmatmul.msk.f32.gmra.mxu0 %vm379_vm0, %v7339_v22  ;;  %5237 = vmatmul.msk.f32.gmra.mxu1 %vm379_vm0, %v7102_v43  ;;  %v9190_v22 = vld [vmem:[#allocation101_spill] sm:$0xff] }
 0x9c3   :  { %5140 = vmatmul.msk.f32.gmra.mxu3 %vm379_vm0, %v9189_v7  ;;  %v7552_v20 = vpop.f32.mrf.mxu0 }
 0x9c6   :  { %v7554_v60 = vpop.f32.mrf.mxu3  ;;  %5218 = vmatmul.msk.f32.gmra.mxu0 %vm379_vm0, %v7353_v25  ;;  %5238 = vmatmul.msk.f32.gmra.mxu1 %vm379_vm0, %v7110_v29  ;;  %v9192_v29 = vld [vmem:[#allocation103_spill] sm:$0xff] }
 0x9cb   :  { %5141 = vmatmul.msk.f32.gmra.mxu3 %vm379_vm0, %v9190_v22  ;;  %v7562_v43 = vpop.f32.mrf.mxu0 }
 0x9ce   :  { %v7564_v46 = vpop.f32.mrf.mxu3  ;;  %5219 = vmatmul.msk.f32.gmra.mxu0 %vm379_vm0, %v7364_v9  ;;  %5239 = vmatmul.msk.f32.gmra.mxu1 %vm379_vm0, %v7118_v42  ;;  %v5268_v42 = vld [vmem:[%s8957_s12 + $0xa8] sm:$0xff] }
 0x9cf   :  { %3385 = vmatpush.msrb.mxu0 %v5268_v42 }
 0x9d3   :  { %5142 = vmatmul.msk.f32.gmra.mxu3 %vm379_vm0, %v9191_v41  ;;  %v7572_v25 = vpop.f32.mrf.mxu0 }
 0x9d6   :  { %v7574_v7 = vpop.f32.mrf.mxu3  ;;  %5220 = vmatmul.msk.f32.gmra.mxu0 %vm379_vm0, %v7376_v53  ;;  %5240 = vmatmul.msk.f32.gmra.mxu1 %vm379_vm0, %v7126_v30  ;;  %v9193_v53 = vld [vmem:[#allocation104_spill] sm:$0xff] }
 0x9db   :  { %5143 = vmatmul.msk.f32.gmra.mxu3 %vm379_vm0, %v9192_v29  ;;  %v7582_v9 = vpop.f32.mrf.mxu0  ;;  %v9194_v29 = vld [vmem:[#allocation105_spill] sm:$0xff] }
 0x9de   :  { %v7584_v22 = vpop.f32.mrf.mxu3  ;;  %5221 = vmatmul.msk.f32.gmra.mxu0 %vm379_vm0, %v7388_v19  ;;  %5241 = vmatmul.msk.f32.gmra.mxu1 %vm379_vm0, %v7132_v45  ;;  %v5290_v45 = vld [vmem:[%s8957_s12 + $0xd8] sm:$0xff]  ;;  %v5289_v19 = vld [vmem:[%s8957_s12 + $0xd0] sm:$0xff] }
 0x9df   :  { %3517 = vmatpush.msra.mxu1 %v5290_v45 }
 0x9e1   :  { %3518 = vmatpush.msra.mxu1 %v5289_v19  ;;  %v9195_v19 = vld [vmem:[#allocation106_spill] sm:$0xff] }
 0x9e3   :  { %5144 = vmatmul.msk.f32.gmra.mxu3 %vm379_vm0, %v9193_v53  ;;  %v7595_v30 = vpop.f32.mrf.mxu0  ;;  %v5287_v53 = vld [vmem:[%s8957_s12 + $0xc0] sm:$0xff] }
 0x9e6   :  { %v7597_v41 = vpop.f32.mrf.mxu3  ;;  %5222 = vmatmul.msk.f32.gmra.mxu0 %vm379_vm0, %v7403_v39  ;;  %5242 = vmatmul.msk.f32.gmra.mxu1 %vm379_vm0, %v7139_v36  ;;  %v5288_v39 = vld [vmem:[%s8957_s12 + $0xc8] sm:$0xff]  ;;  %v5267_v36 = vld [vmem:[%s8957_s12 + $0xa0] sm:$0xff] }
 0x9e7   :  { %3519 = vmatpush.msra.mxu1 %v5288_v39  ;;  %3386 = vmatpush.msrb.mxu0 %v5267_v36  ;;  %v9196_v36 = vld [vmem:[#allocation107_spill] sm:$0xff] }
 0x9e9   :  { %3520 = vmatpush.msra.mxu1 %v5287_v53 }
 0x9eb   :  { %5145 = vmatmul.msk.f32.gmra.mxu3 %vm379_vm0, %v9194_v29  ;;  %v7614_v42 = vpop.f32.mrf.mxu0 }
 0x9ee   :  { %v7622_v45 = vpop.f32.mrf.mxu3  ;;  %5223 = vmatmul.msk.f32.gmra.mxu0 %vm379_vm0, %v7430_v32  ;;  %5243 = vmatmul.msk.f32.gmra.mxu1 %vm379_vm0, %v7146_v2  ;;  %v9197_v2 = vld [vmem:[#allocation108_spill] sm:$0xff] }
 0x9f3   :  { %5146 = vmatmul.msk.f32.gmra.mxu3 %vm379_vm0, %v9195_v19  ;;  %v7630_v29 = vpop.f32.mrf.mxu0 }
 0x9f6   :  { %v7632_v39 = vpop.f32.mrf.mxu3  ;;  %5224 = vmatmul.msk.f32.gmra.mxu0 %vm379_vm0, %v7442_v31  ;;  %5244 = vmatmul.msk.f32.gmra.mxu1 %vm379_vm0, %v7156_v8  ;;  %v9198_v8 = vld [vmem:[#allocation109_spill] sm:$0xff] }
 0x9fb   :  { %5147 = vmatmul.msk.f32.gmra.mxu3 %vm379_vm0, %v9196_v36  ;;  %v7640_v32 = vpop.f32.mrf.mxu0 }
 0x9fe   :  { %v7642_v53 = vpop.f32.mrf.mxu3  ;;  %5225 = vmatmul.msk.f32.gmra.mxu0 %vm379_vm0, %v7454_v49  ;;  %5245 = vmatmul.msk.f32.gmra.mxu1 %vm379_vm0, %v7163_v12  ;;  %v9199_v12 = vld [vmem:[#allocation110_spill] sm:$0xff] }
 0xa03   :  { %5148 = vmatmul.msk.f32.gmra.mxu3 %vm379_vm0, %v9197_v2  ;;  %v7650_v31 = vpop.f32.mrf.mxu0 }
 0xa06   :  { %v7652_v19 = vpop.f32.mrf.mxu3  ;;  %5226 = vmatmul.msk.f32.gmra.mxu0 %vm379_vm0, %v7466_v18  ;;  %5246 = vmatmul.msk.f32.gmra.mxu1 %vm379_vm0, %v7170_v50  ;;  %v5310_v50 = vld [vmem:[%s8957_s12 + $0xf8] sm:$0xff] }
 0xa07   :  { %3651 = vmatpush.msra.mxu2 %v5310_v50  ;;  %v5330_v50 = vld [vmem:[%s8957_s12 + $0x118] sm:$0xff] }
 0xa08   :  { %3785 = vmatpush.msra.mxu0 %v5330_v50  ;;  %v9203_v50 = vld [vmem:[#allocation114_spill] sm:$0xff] }
 0xa0b   :  { %5149 = vmatmul.msk.f32.gmra.mxu3 %vm379_vm0, %v9198_v8  ;;  %v7660_v49 = vpop.f32.mrf.mxu0 }
 0xa0e   :  { %v7662_v36 = vpop.f32.mrf.mxu3  ;;  %5271 = vmatmul.msk.f32.vlgmr.msrb.gmra.mxu0 %vm379_vm0, %v7341_v35  ;;  %5291 = vmatmul.msk.f32.vlgmr.msra.gmra.mxu1 %vm379_vm0, %v7541_v1  ;;  %v5309_v35 = vld [vmem:[%s8957_s12 + $0xf0] sm:$0xff]  ;;  %v9200_v1 = vld [vmem:[#allocation111_spill] sm:$0xff] }
 0xa0f   :  { %3652 = vmatpush.msra.mxu2 %v5309_v35  ;;  %v9201_v35 = vld [vmem:[#allocation112_spill] sm:$0xff] }
 0xa13   :  { %5150 = vmatmul.msk.f32.gmra.mxu3 %vm379_vm0, %v9199_v12  ;;  %v7670_v18 = vpop.f32.mrf.mxu0 }
 0xa16   :  { %v7672_v2 = vpop.f32.mrf.mxu3  ;;  %5272 = vmatmul.msk.f32.gmra.mxu0 %vm379_vm0, %v7355_v34  ;;  %5292 = vmatmul.msk.f32.gmra.mxu1 %vm379_vm0, %v7554_v60  ;;  %v5308_v34 = vld [vmem:[%s8957_s12 + $0xe8] sm:$0xff]  ;;  %v5307_v60 = vld [vmem:[%s8957_s12 + $0xe0] sm:$0xff] }
 0xa17   :  { %3653 = vmatpush.msra.mxu2 %v5308_v34 }
 0xa19   :  { %3654 = vmatpush.msra.mxu2 %v5307_v60 }
 0xa1b   :  { %5151 = vmatmul.msk.f32.gmra.mxu3 %vm379_vm0, %v9200_v1  ;;  %v7689_v8 = vpop.f32.mrf.mxu0 }
 0xa1e   :  { %v7694_v12 = vpop.f32.mrf.mxu3  ;;  %5273 = vmatmul.msk.f32.gmra.mxu0 %vm379_vm0, %v7366_v26  ;;  %5293 = vmatmul.msk.f32.gmra.mxu1 %vm379_vm0, %v7564_v46  ;;  %v9202_v26 = vld [vmem:[#allocation113_spill] sm:$0xff] }
 0xa23   :  { %5152 = vmatmul.msk.f32.gmra.mxu3 %vm379_vm0, %v9201_v35  ;;  %v7705_v1 = vpop.f32.mrf.mxu0 }
 0xa26   :  { %v7707_v34 = vpop.f32.mrf.mxu3  ;;  %5274 = vmatmul.msk.f32.gmra.mxu0 %vm379_vm0, %v7378_v4  ;;  %5294 = vmatmul.msk.f32.gmra.mxu1 %vm379_vm0, %v7574_v7  ;;  %v9204_v7 = vld [vmem:[#allocation115_spill] sm:$0xff] }
 0xa2b   :  { %5153 = vmatmul.msk.f32.gmra.mxu3 %vm379_vm0, %v9202_v26  ;;  %v7715_v46 = vpop.f32.mrf.mxu0 }
 0xa2e   :  { %v7717_v60 = vpop.f32.mrf.mxu3  ;;  %5275 = vmatmul.msk.f32.gmra.mxu0 %vm379_vm0, %v7390_v11  ;;  %5295 = vmatmul.msk.f32.gmra.mxu1 %vm379_vm0, %v7584_v22  ;;  %v7745_v22 = vpop.f32.mrf.mxu1 }
 0xa33   :  { %5154 = vmatmul.msk.f32.gmra.mxu3 %vm379_vm0, %v9203_v50  ;;  %v7725_v4 = vpop.f32.mrf.mxu0 }
 0xa36   :  { %v7727_v35 = vpop.f32.mrf.mxu3  ;;  %5276 = vmatmul.msk.f32.gmra.mxu0 %vm379_vm0, %v7405_v37  ;;  %5296 = vmatmul.msk.f32.gmra.mxu1 %vm379_vm0, %v7597_v41  ;;  %v5329_v37 = vld [vmem:[%s8957_s12 + $0x110] sm:$0xff]  ;;  %v9205_v41 = vld [vmem:[#allocation116_spill] sm:$0xff] }
 0xa37   :  { %3786 = vmatpush.msra.mxu0 %v5329_v37 }
 0xa3b   :  { %5155 = vmatmul.msk.f32.gmra.mxu3 %vm379_vm0, %v9204_v7  ;;  %v7735_v11 = vpop.f32.mrf.mxu0 }
 0xa3e   :  { %v2585_v26 = vpop.f32.mrf.mxu3  ;;  %5277 = vmatmul.msk.f32.gmra.mxu0 %vm379_vm0, %v7432_v21  ;;  %5297 = vmatmul.msk.f32.gmra.mxu1 %vm379_vm0, %v7622_v45  ;;  %v7756_v21 = vpop.f32.mrf.mxu1  ;;  %v9206_v45 = vld [vmem:[#allocation117_spill] sm:$0xff] }
 0xa3f   :  { %5311 = vmatmul.msk.f32.vlgmr.msra.gmra.mxu2 %vm379_vm0, %v2585_v26 }
 0xa43   :  { %5156 = vmatmul.msk.f32.gmra.mxu3 %vm379_vm0, %v9205_v41  ;;  %v7749_v50 = vpop.f32.mrf.mxu0 }
 0xa46   :  { %v2588_v7 = vpop.f32.mrf.mxu3  ;;  %5278 = vmatmul.msk.f32.gmra.mxu0 %vm379_vm0, %v7444_v61  ;;  %5298 = vmatmul.msk.f32.gmra.mxu1 %vm379_vm0, %v7632_v39  ;;  %v9207_v61 = vld [vmem:[#allocation118_spill] sm:$0xff]  ;;  %v7769_v39 = vpop.f32.mrf.mxu1 }
 0xa47   :  { %5312 = vmatmul.msk.f32.gmra.mxu2 %vm379_vm0, %v2588_v7 }
 0xa4b   :  { %5157 = vmatmul.msk.f32.gmra.mxu3 %vm379_vm0, %v9206_v45  ;;  %v7760_v26 = vpop.f32.mrf.mxu0 }
 0xa4e   :  { %v2591_v37 = vpop.f32.mrf.mxu3  ;;  %5279 = vmatmul.msk.f32.gmra.mxu0 %vm379_vm0, %v7456_v27  ;;  %5299 = vmatmul.msk.f32.gmra.mxu1 %vm379_vm0, %v7642_v53  ;;  %v9208_v27 = vld [vmem:[#allocation119_spill] sm:$0xff]  ;;  %v7780_v45 = vpop.f32.mrf.mxu1 }
 0xa4f   :  { %5313 = vmatmul.msk.f32.gmra.mxu2 %vm379_vm0, %v2591_v37  ;;  %v9209_v37 = vld [vmem:[#allocation120_spill] sm:$0xff] }
 0xa53   :  { %5158 = vmatmul.msk.f32.gmra.mxu3 %vm379_vm0, %v9207_v61  ;;  %v7775_v7 = vpop.f32.mrf.mxu0 }
 0xa56   :  { %v2594_v41 = vpop.f32.mrf.mxu3  ;;  %5280 = vmatmul.msk.f32.gmra.mxu0 %vm379_vm0, %v7468_v3  ;;  %5300 = vmatmul.msk.f32.gmra.mxu1 %vm379_vm0, %v7652_v19  ;;  %v5328_v3 = vld [vmem:[%s8957_s12 + $0x108] sm:$0xff] }
 0xa57   :  { %5314 = vmatmul.msk.f32.gmra.mxu2 %vm379_vm0, %v2594_v41  ;;  %3787 = vmatpush.msra.mxu0 %v5328_v3 }
 0xa5b   :  { %5159 = vmatmul.msk.f32.gmra.mxu3 %vm379_vm0, %v9208_v27  ;;  %v7790_v19 = vpop.f32.mrf.mxu0 }
 0xa5e   :  { %v2597_v53 = vpop.f32.mrf.mxu3  ;;  %5281 = vmatmul.msk.f32.gmra.mxu0 %vm379_vm0, %v7478_v47  ;;  %5301 = vmatmul.msk.f32.gmra.mxu1 %vm379_vm0, %v7662_v36  ;;  %v7799_v47 = vpop.f32.mrf.mxu1  ;;  %v9210_v36 = vld [vmem:[#allocation121_spill] sm:$0xff] }
 0xa5f   :  { %5315 = vmatmul.msk.f32.gmra.mxu2 %vm379_vm0, %v2597_v53  ;;  %v9212_v53 = vld [vmem:[#allocation122_spill] sm:$0xff] }
 0xa63   :  { %5160 = vmatmul.msk.f32.gmra.mxu3 %vm379_vm0, %v9209_v37  ;;  %v7803_v41 = vpop.f32.mrf.mxu0 }
 0xa66   :  { %v2600_v61 = vpop.f32.mrf.mxu3  ;;  %5282 = vmatmul.msk.f32.gmra.mxu0 %vm379_vm0, %v7489_v23  ;;  %5302 = vmatmul.msk.f32.gmra.mxu1 %vm379_vm0, %v7672_v2  ;;  %v7810_v23 = vpop.f32.mrf.mxu2 }
 0xa67   :  { %5316 = vmatmul.msk.f32.gmra.mxu2 %vm379_vm0, %v2600_v61  ;;  %9211 = vst [vmem:[#allocation11_spill] sm:$0xff] %v7810_v23  ;;  %v7812_v2 = vpop.f32.mrf.mxu1 }
 0xa6b   :  { %5161 = vmatmul.msk.f32.gmra.mxu3 %vm379_vm0, %v9210_v36  ;;  %v7816_v3 = vpop.f32.mrf.mxu0 }
 0xa6e   :  { %v2603_v27 = vpop.f32.mrf.mxu3  ;;  %5283 = vmatmul.msk.f32.gmra.mxu0 %vm379_vm0, %v7498_v62  ;;  %5303 = vmatmul.msk.f32.gmra.mxu1 %vm379_vm0, %v7694_v12  ;;  %v9213_v62 = vld [vmem:[#allocation123_spill] sm:$0xff]  ;;  %v7825_v12 = vpop.f32.mrf.mxu2 }
 0xa6f   :  { %5317 = vmatmul.msk.f32.gmra.mxu2 %vm379_vm0, %v2603_v27  ;;  %v7827_v61 = vpop.f32.mrf.mxu1  ;;  %v9215_v27 = vld [vmem:[#allocation124_spill] sm:$0xff] }
 0xa73   :  { %5162 = vmatmul.msk.f32.gmra.mxu3 %vm379_vm0, %v9212_v53 }
 0xa76   :  { %v2606_v37 = vpop.f32.mrf.mxu3  ;;  %5284 = vmatmul.msk.f32.gmra.mxu0 %vm379_vm0, %v7511_v63  ;;  %5304 = vmatmul.msk.f32.gmra.mxu1 %vm379_vm0, %v7707_v34  ;;  %v7833_v63 = vpop.f32.mrf.mxu0  ;;  %v5327_v34 = vld [vmem:[%s8957_s12 + $0x100] sm:$0xff] }
 0xa77   :  { %5318 = vmatmul.msk.f32.gmra.mxu2 %vm379_vm0, %v2606_v37  ;;  %9214 = vst [vmem:[#allocation45_spill] sm:$0xff] %v7833_v63  ;;  %3788 = vmatpush.msra.mxu0 %v5327_v34  ;;  %v7841_v53 = vpop.f32.mrf.mxu2 }
 0xa78   :  { %9216 = vst [vmem:[#allocation12_spill] sm:$0xff] %v7841_v53 }
 0xa7b   :  { %5163 = vmatmul.msk.f32.gmra.mxu3 %vm379_vm0, %v9213_v62  ;;  %v7843_v62 = vpop.f32.mrf.mxu1 }
 0xa7e   :  { %v2609_v36 = vpop.f32.mrf.mxu3  ;;  %5285 = vmatmul.msk.f32.gmra.mxu0 %vm379_vm0, %v7521_v59  ;;  %5305 = vmatmul.msk.f32.gmra.mxu1 %vm379_vm0, %v7717_v60  ;;  %v7850_v59 = vpop.f32.mrf.mxu0  ;;  %v9218_v60 = vld [vmem:[#allocation125_spill] sm:$0xff] }
 0xa7f   :  { %5319 = vmatmul.msk.f32.gmra.mxu2 %vm379_vm0, %v2609_v36  ;;  %9217 = vst [vmem:[#allocation46_spill] sm:$0xff] %v7850_v59  ;;  %v7854_v34 = vpop.f32.mrf.mxu2 }
 0xa80   :  { %9219 = vst [vmem:[#allocation13_spill] sm:$0xff] %v7854_v34  ;;  %v9225_v34 = vld [vmem:[#allocation128_spill] sm:$0xff] }
 0xa83   :  { %5164 = vmatmul.msk.f32.gmra.mxu3 %vm379_vm0, %v9215_v27  ;;  %v9220_v27 = vld [vmem:[#allocation126_spill] sm:$0xff] }
 0xa86   :  { %v2612_v37 = vpop.f32.mrf.mxu3  ;;  %5286 = vmatmul.msk.f32.gmra.mxu0 %vm379_vm0, %v7531_v16  ;;  %5306 = vmatmul.msk.f32.gmra.mxu1 %vm379_vm0, %v7727_v35  ;;  %v7859_v63 = vpop.f32.mrf.mxu0 }
 0xa87   :  { %5320 = vmatmul.msk.f32.gmra.mxu2 %vm379_vm0, %v2612_v37  ;;  %9221 = vst [vmem:[#allocation47_spill] sm:$0xff] %v7859_v63  ;;  %v7862_v35 = vpop.f32.mrf.mxu2  ;;  %v9223_v37 = vld [vmem:[#allocation127_spill] sm:$0xff] }
 0xa88   :  { %9222 = vst [vmem:[#allocation14_spill] sm:$0xff] %v7862_v35 }
 0xa8b   :  { %5165 = vmatmul.msk.f32.gmra.mxu3 %vm379_vm0, %v9218_v60 }
 0xa8e   :  { %v2615_v36 = vpop.f32.mrf.mxu3  ;;  %v7866_v59 = vpop.f32.mrf.mxu0 }
 0xa8f   :  { %5321 = vmatmul.msk.f32.gmra.mxu2 %vm379_vm0, %v2615_v36  ;;  %9224 = vst [vmem:[#allocation48_spill] sm:$0xff] %v7866_v59  ;;  %v7871_v36 = vpop.f32.mrf.mxu2 }
 0xa90   :  { %9226 = vst [vmem:[#allocation15_spill] sm:$0xff] %v7871_v36 }
 0xa93   :  { %5166 = vmatmul.msk.f32.gmra.mxu3 %vm379_vm0, %v9220_v27 }
 0xa96   :  { %v2618_v16 = vpop.f32.mrf.mxu3  ;;  %v7873_v63 = vpop.f32.mrf.mxu0 }
 0xa97   :  { %5322 = vmatmul.msk.f32.gmra.mxu2 %vm379_vm0, %v2618_v16  ;;  %9227 = vst [vmem:[#allocation49_spill] sm:$0xff] %v7873_v63  ;;  %v9228_v16 = vld [vmem:[#allocation129_spill] sm:$0xff]  ;;  %v7878_v35 = vpop.f32.mrf.mxu2 }
 0xa98   :  { %9229 = vst [vmem:[#allocation16_spill] sm:$0xff] %v7878_v35 }
 0xa9b   :  { %5167 = vmatmul.msk.f32.gmra.mxu3 %vm379_vm0, %v9223_v37 }
 0xa9e   :  { %v2621_v60 = vpop.f32.mrf.mxu3  ;;  %v7881_v59 = vpop.f32.mrf.mxu0 }
 0xa9f   :  { %5323 = vmatmul.msk.f32.gmra.mxu2 %vm379_vm0, %v2621_v60  ;;  %9230 = vst [vmem:[#allocation50_spill] sm:$0xff] %v7881_v59  ;;  %v9231_v60 = vld [vmem:[#allocation130_spill] sm:$0xff]  ;;  %v7885_v36 = vpop.f32.mrf.mxu2 }
 0xaa0   :  { %9232 = vst [vmem:[#allocation17_spill] sm:$0xff] %v7885_v36 }
 0xaa3   :  { %5168 = vmatmul.msk.f32.gmra.mxu3 %vm379_vm0, %v9225_v34 }
 0xaa6   :  { %v2624_v27 = vpop.f32.mrf.mxu3  ;;  %v7888_v53 = vpop.f32.mrf.mxu0 }
 0xaa7   :  { %5324 = vmatmul.msk.f32.gmra.mxu2 %vm379_vm0, %v2624_v27  ;;  %9233 = vst [vmem:[#allocation51_spill] sm:$0xff] %v7888_v53  ;;  %v7896_v59 = vpop.f32.mrf.mxu2 }
 0xaa8   :  { %9236 = vst [vmem:[#allocation19_spill] sm:$0xff] %v7896_v59 }
 0xaab   :  { %5169 = vmatmul.msk.f32.gmra.mxu3 %vm379_vm0, %v9228_v16 }
 0xaae   :  { %v2627_v37 = vpop.f32.mrf.mxu3  ;;  %v7891_v16 = vpop.f32.mrf.mxu0 }
 0xaaf   :  { %5325 = vmatmul.msk.f32.gmra.mxu2 %vm379_vm0, %v2627_v37  ;;  %9234 = vst [vmem:[#allocation18_spill] sm:$0xff] %v7891_v16  ;;  %v7894_v37 = vpop.f32.mrf.mxu1  ;;  %v7903_v53 = vpop.f32.mrf.mxu2 }
 0xab0   :  { %9235 = vst [vmem:[#allocation52_spill] sm:$0xff] %v7894_v37 }
 0xab1   :  { %9239 = vst [vmem:[#allocation54_spill] sm:$0xff] %v7903_v53 }
 0xab3   :  { %5170 = vmatmul.msk.f32.gmra.mxu3 %vm379_vm0, %v9231_v60 }
 0xab6   :  { %v2630_v34 = vpop.f32.mrf.mxu3  ;;  %v7899_v36 = vpop.f32.mrf.mxu0 }
 0xab7   :  { %5326 = vmatmul.msk.f32.gmra.mxu2 %vm379_vm0, %v2630_v34  ;;  %9237 = vst [vmem:[#allocation53_spill] sm:$0xff] %v7899_v36  ;;  %v7901_v34 = vpop.f32.mrf.mxu1  ;;  %v7911_v59 = vpop.f32.mrf.mxu2 }
 0xab8   :  { %9238 = vst [vmem:[#allocation20_spill] sm:$0xff] %v7901_v34 }
 0xab9   :  { %9242 = vst [vmem:[#allocation22_spill] sm:$0xff] %v7911_v59 }
 0xabe   :  { %v2633_v27 = vpop.f32.mrf.mxu3 }
 0xabf   :  { %5331 = vmatmul.msk.f32.vlgmr.msra.gmra.mxu0 %vm379_vm0, %v2633_v27  ;;  %v7906_v27 = vpop.f32.mrf.mxu0  ;;  %v7908_v16 = vpop.f32.mrf.mxu1 }
 0xac0   :  { %9240 = vst [vmem:[#allocation21_spill] sm:$0xff] %v7906_v27  ;;  %v7918_v53 = vpop.f32.mrf.mxu2 }
 0xac1   :  { %9241 = vst [vmem:[#allocation55_spill] sm:$0xff] %v7908_v16 }
 0xac2   :  { %9245 = vst [vmem:[#allocation57_spill] sm:$0xff] %v7918_v53 }
 0xac6   :  { %v2636_v35 = vpop.f32.mrf.mxu3 }
 0xac7   :  { %5332 = vmatmul.msk.f32.gmra.mxu0 %vm379_vm0, %v2636_v35  ;;  %v7913_v37 = vpop.f32.mrf.mxu0  ;;  %v7915_v36 = vpop.f32.mrf.mxu1 }
 0xac8   :  { %9243 = vst [vmem:[#allocation56_spill] sm:$0xff] %v7913_v37  ;;  %v7925_v16 = vpop.f32.mrf.mxu2 }
 0xac9   :  { %9244 = vst [vmem:[#allocation23_spill] sm:$0xff] %v7915_v36 }
 0xaca   :  { %9248 = vst [vmem:[#allocation25_spill] sm:$0xff] %v7925_v16 }
 0xace   :  { %v2639_v60 = vpop.f32.mrf.mxu3 }
 0xacf   :  { %5333 = vmatmul.msk.f32.gmra.mxu0 %vm379_vm0, %v2639_v60  ;;  %v7920_v34 = vpop.f32.mrf.mxu0  ;;  %v7923_v27 = vpop.f32.mrf.mxu1 }
 0xad0   :  { %9246 = vst [vmem:[#allocation24_spill] sm:$0xff] %v7920_v34  ;;  %v7932_v36 = vpop.f32.mrf.mxu2 }
 0xad1   :  { %9247 = vst [vmem:[#allocation58_spill] sm:$0xff] %v7923_v27 }
 0xad2   :  { %9251 = vst [vmem:[#allocation60_spill] sm:$0xff] %v7932_v36 }
 0xad6   :  { %v2642_v63 = vpop.f32.mrf.mxu3 }
 0xad7   :  { %5334 = vmatmul.msk.f32.gmra.mxu0 %vm379_vm0, %v2642_v63  ;;  %v7928_v37 = vpop.f32.mrf.mxu0  ;;  %v7930_v59 = vpop.f32.mrf.mxu1 }
 0xad8   :  { %9249 = vst [vmem:[#allocation59_spill] sm:$0xff] %v7928_v37  ;;  %v7940_v16 = vpop.f32.mrf.mxu2 }
 0xad9   :  { %9250 = vst [vmem:[#allocation26_spill] sm:$0xff] %v7930_v59 }
 0xada   :  { %9254 = vst [vmem:[#allocation28_spill] sm:$0xff] %v7940_v16 }
 0xade   :  { %v2645_v35 = vpop.f32.mrf.mxu3 }
 0xadf   :  { %5335 = vmatmul.msk.f32.gmra.mxu0 %vm379_vm0, %v2645_v35  ;;  %v7935_v34 = vpop.f32.mrf.mxu0  ;;  %v7937_v53 = vpop.f32.mrf.mxu1 }
 0xae0   :  { %9252 = vst [vmem:[#allocation27_spill] sm:$0xff] %v7935_v34  ;;  %v7947_v36 = vpop.f32.mrf.mxu2 }
 0xae1   :  { %9253 = vst [vmem:[#allocation61_spill] sm:$0xff] %v7937_v53 }
 0xae2   :  { %9257 = vst [vmem:[#allocation63_spill] sm:$0xff] %v7947_v36 }
 0xae6   :  { %v2648_v60 = vpop.f32.mrf.mxu3 }
 0xae7   :  { %5336 = vmatmul.msk.f32.gmra.mxu0 %vm379_vm0, %v2648_v60  ;;  %v7942_v27 = vpop.f32.mrf.mxu0  ;;  %v7944_v37 = vpop.f32.mrf.mxu1 }
 0xae8   :  { %9255 = vst [vmem:[#allocation62_spill] sm:$0xff] %v7942_v27  ;;  %v7954_v53 = vpop.f32.mrf.mxu2 }
 0xae9   :  { %9256 = vst [vmem:[#allocation29_spill] sm:$0xff] %v7944_v37 }
 0xaea   :  { %9260 = vst [vmem:[#allocation31_spill] sm:$0xff] %v7954_v53 }
 0xaee   :  { %v2651_v63 = vpop.f32.mrf.mxu3 }
 0xaef   :  { %5337 = vmatmul.msk.f32.gmra.mxu0 %vm379_vm0, %v2651_v63  ;;  %v7949_v59 = vpop.f32.mrf.mxu0  ;;  %v7952_v34 = vpop.f32.mrf.mxu1 }
 0xaf0   :  { %9258 = vst [vmem:[#allocation30_spill] sm:$0xff] %v7949_v59  ;;  %v7961_v37 = vpop.f32.mrf.mxu2 }
 0xaf1   :  { %9259 = vst [vmem:[#allocation64_spill] sm:$0xff] %v7952_v34 }
 0xaf2   :  { %9263 = vst [vmem:[#allocation66_spill] sm:$0xff] %v7961_v37 }
 0xaf6   :  { %v2654_v35 = vpop.f32.mrf.mxu3 }
 0xaf7   :  { %5338 = vmatmul.msk.f32.gmra.mxu0 %vm379_vm0, %v2654_v35  ;;  %v7957_v27 = vpop.f32.mrf.mxu0  ;;  %v7959_v16 = vpop.f32.mrf.mxu1 }
 0xaf8   :  { %9261 = vst [vmem:[#allocation65_spill] sm:$0xff] %v7957_v27 }
 0xaf9   :  { %9262 = vst [vmem:[#allocation32_spill] sm:$0xff] %v7959_v16 }
 0xafe   :  { %v2657_v60 = vpop.f32.mrf.mxu3 }
 0xaff   :  { %5339 = vmatmul.msk.f32.gmra.mxu0 %vm379_vm0, %v2657_v60  ;;  %v7964_v36 = vpop.f32.mrf.mxu0  ;;  %v7966_v59 = vpop.f32.mrf.mxu1 }
 0xb00   :  { %9264 = vst [vmem:[#allocation33_spill] sm:$0xff] %v7964_v36 }
 0xb01   :  { %9265 = vst [vmem:[#allocation67_spill] sm:$0xff] %v7966_v59 }
 0xb06   :  { %v2660_v63 = vpop.f32.mrf.mxu3 }
 0xb07   :  { %5340 = vmatmul.msk.f32.gmra.mxu0 %vm379_vm0, %v2660_v63  ;;  %v7971_v53 = vpop.f32.mrf.mxu0  ;;  %v7973_v27 = vpop.f32.mrf.mxu1 }
 0xb08   :  { %9267 = vst [vmem:[#allocation68_spill] sm:$0xff] %v7971_v53 }
 0xb09   :  { %9268 = vst [vmem:[#allocation35_spill] sm:$0xff] %v7973_v27 }
 0xb0e   :  { %v2663_v35 = vpop.f32.mrf.mxu3 }
 0xb0f   :  { %5341 = vmatmul.msk.f32.gmra.mxu0 %vm379_vm0, %v2663_v35 }
 0xb16   :  { %v2666_v60 = vpop.f32.mrf.mxu3 }
 0xb17   :  { %5342 = vmatmul.msk.f32.gmra.mxu0 %vm379_vm0, %v2666_v60  ;;  %v7968_v60 = vpop.f32.mrf.mxu2 }
 0xb18   :  { %9266 = vst [vmem:[#allocation34_spill] sm:$0xff] %v7968_v60 }
 0xb1e   :  { %v2669_v63 = vpop.f32.mrf.mxu3 }
 0xb1f   :  { %5343 = vmatmul.msk.f32.gmra.mxu0 %vm379_vm0, %v2669_v63  ;;  %v7976_v37 = vpop.f32.mrf.mxu2 }
 0xb20   :  { %9269 = vst [vmem:[#allocation69_spill] sm:$0xff] %v7976_v37 }
 0xb26   :  { %v2672_v35 = vpop.f32.mrf.mxu3 }
 0xb27   :  { %5344 = vmatmul.msk.f32.gmra.mxu0 %vm379_vm0, %v2672_v35  ;;  %v7980_v35 = vpop.f32.mrf.mxu1  ;;  %v7982_v36 = vpop.f32.mrf.mxu2 }
 0xb28   :  { %9271 = vst [vmem:[#allocation70_spill] sm:$0xff] %v7980_v35 }
 0xb29   :  { %9272 = vst [vmem:[#allocation37_spill] sm:$0xff] %v7982_v36 }
 0xb2e   :  { %v2675_v34 = vpop.f32.mrf.mxu3 }
 0xb2f   :  { %5345 = vmatmul.msk.f32.gmra.mxu0 %vm379_vm0, %v2675_v34  ;;  %v7986_v60 = vpop.f32.mrf.mxu1  ;;  %v7988_v34 = vpop.f32.mrf.mxu2 }
 0xb30   :  { %9274 = vst [vmem:[#allocation38_spill] sm:$0xff] %v7986_v60 }
 0xb31   :  { %9275 = vst [vmem:[#allocation72_spill] sm:$0xff] %v7988_v34 }
 0xb36   :  { %v2678_v63 = vpop.f32.mrf.mxu3 }
 0xb37   :  { %5346 = vmatmul.msk.f32.gmra.mxu0 %vm379_vm0, %v2678_v63  ;;  %v4148_v63 = vld [vmem:[%s8959_s14 + $0x18] sm:$0xff]  ;;  %v7999_v35 = vpop.f32.mrf.mxu2 }
 0xb38   :  { %4213 = vmatpush.msrb.mxu1 %v4148_v63  ;;  %9278 = vst [vmem:[#allocation40_spill] sm:$0xff] %v7999_v35  ;;  %v4147_v63 = vld [vmem:[%s8959_s14 + $0x10] sm:$0xff] }
 0xb3a   :  { %4214 = vmatpush.msrb.mxu1 %v4147_v63 }
 0xb3c   :  { %v7978_v16 = vpop.f32.mrf.mxu0 }
 0xb3d   :  { %9270 = vst [vmem:[#allocation36_spill] sm:$0xff] %v7978_v16  ;;  %v7997_v16 = vpop.f32.mrf.mxu1 }
 0xb3f   :  { %v8005_v60 = vpop.f32.mrf.mxu2 }
 0xb40   :  { %9280 = vst [vmem:[#allocation41_spill] sm:$0xff] %v8005_v60 }
 0xb44   :  { %v7984_v59 = vpop.f32.mrf.mxu0 }
 0xb45   :  { %9273 = vst [vmem:[#allocation71_spill] sm:$0xff] %v7984_v59  ;;  %v8003_v59 = vpop.f32.mrf.mxu1 }
 0xb47   :  { %v8011_v27 = vpop.f32.mrf.mxu2 }
 0xb48   :  { %9283 = vst [vmem:[#allocation76_spill] sm:$0xff] %v8011_v27  ;;  %v2872_v27 = vadd.f32 %v7487_v38, %v7279_v58  ;;  %v2887_v58 = vadd.f32 %v7539_v51, %v7337_v17  ;;  %v2905_v17 = vadd.f32 %v7614_v42, %v7422_v14 }
 0xb4a   :  { %v3035_v63 = vadd.f32 %v7670_v18, %v2872_v27  ;;  %v9302_v27 = vld [vmem:[#allocation13_spill] sm:$0xff] }
 0xb4c   :  { %v7990_v53 = vpop.f32.mrf.mxu0 }
 0xb4d   :  { %9276 = vst [vmem:[#allocation39_spill] sm:$0xff] %v7990_v53  ;;  %v8009_v53 = vpop.f32.mrf.mxu1 }
 0xb4e   :  { %9282 = vst [vmem:[#allocation42_spill] sm:$0xff] %v8009_v53 }
 0xb4f   :  { %v8020_v35 = vpop.f32.mrf.mxu2 }
 0xb50   :  { %9286 = vst [vmem:[#allocation44_spill] sm:$0xff] %v8020_v35  ;;  %v2878_v35 = vadd.f32 %v7509_v13, %v7304_v56  ;;  %v2896_v56 = vadd.f32 %v7572_v25, %v7374_v52 }
 0xb52   :  { %v3043_v51 = vadd.f32 %v7775_v7, %v2896_v56  ;;  %v9306_v56 = vld [vmem:[#allocation16_spill] sm:$0xff] }
 0xb54   :  { %v7995_v37 = vpop.f32.mrf.mxu0 }
 0xb55   :  { %9277 = vst [vmem:[#allocation73_spill] sm:$0xff] %v7995_v37  ;;  %v8018_v37 = vpop.f32.mrf.mxu1 }
 0xb56   :  { %9285 = vst [vmem:[#allocation77_spill] sm:$0xff] %v8018_v37  ;;  %v2875_v37 = vadd.f32 %v7496_v48, %v7290_v0  ;;  %v3037_v48 = vadd.f32 %v7705_v1, %v2878_v35  ;;  %v9303_v35 = vld [vmem:[#allocation14_spill] sm:$0xff] }
 0xb57   :  { %v8028_v53 = vpop.f32.mrf.mxu2 }
 0xb58   :  { %9289 = vst [vmem:[#allocation80_spill] sm:$0xff] %v8028_v53  ;;  %v2884_v53 = vadd.f32 %v7529_v10, %v7326_v33  ;;  %v3036_v0 = vadd.f32 %v7689_v8, %v2875_v37  ;;  %v2902_v33 = vadd.f32 %v7595_v30, %v7401_v57  ;;  %v2908_v57 = vadd.f32 %v7630_v29, %v7440_v5  ;;  %v9290_v5 = vld [vmem:[#allocation10_spill] sm:$0xff] }
 0xb59   :  { %v3046_v30 = vadd.f32 %v7816_v3, %v2905_v17  ;;  %v2914_v29 = vadd.f32 %v7650_v31, %v9290_v5  ;;  %v9299_v3 = vld [vmem:[#allocation48_spill] sm:$0xff] }
 0xb5a   :  { %v3039_v52 = vadd.f32 %v7725_v4, %v2884_v53  ;;  %v3170_v10 = vadd.f32 %v7769_v39, %v3036_v0  ;;  %v9295_v39 = vld [vmem:[#allocation12_spill] sm:$0xff]  ;;  %v9300_v53 = vld [vmem:[#allocation45_spill] sm:$0xff]  ;;  %v9305_v0 = vld [vmem:[#allocation15_spill] sm:$0xff] }
 0xb5c   :  { %v8001_v36 = vpop.f32.mrf.mxu0  ;;  %v3173_v1 = vadd.f32 %v7812_v2, %v3039_v52  ;;  %v3304_v7 = vadd.f32 %v9295_v39, %v3170_v10  ;;  %v9310_v52 = vld [vmem:[#allocation19_spill] sm:$0xff]  ;;  %v9312_v10 = vld [vmem:[#allocation64_spill] sm:$0xff] }
 0xb5d   :  { %9279 = vst [vmem:[#allocation74_spill] sm:$0xff] %v8001_v36 }
 0xb5f   :  { %v8080_v42 = vpop.f32.mrf.mxu2 }
 0xb64   :  { %v8007_v34 = vpop.f32.mrf.mxu0 }
 0xb65   :  { %9281 = vst [vmem:[#allocation75_spill] sm:$0xff] %v8007_v34  ;;  %v8026_v34 = vpop.f32.mrf.mxu1 }
 0xb6c   :  { %v8013_v23 = vpop.f32.mrf.mxu0 }
 0xb6d   :  { %9284 = vst [vmem:[#allocation43_spill] sm:$0xff] %v8013_v23  ;;  %v2869_v23 = vadd.f32 %v7476_v44, %v7268_v28  ;;  %v2890_v28 = vadd.f32 %v7552_v20, %v7351_v24  ;;  %v2893_v44 = vadd.f32 %v7562_v43, %v7362_v6  ;;  %v3169_v24 = vadd.f32 %v7756_v21, %v3035_v63  ;;  %v8073_v20 = vpop.f32.mrf.mxu1 }
 0xb6e   :  { %v2911_v43 = vadd.f32 %v7640_v32, %v7452_v40 }
 0xb6f   :  { %v3042_v14 = vadd.f32 %v7760_v26, %v2893_v44  ;;  %v3303_v8 = vadd.f32 %v7825_v12, %v3169_v24  ;;  %v9294_v26 = vld [vmem:[#allocation49_spill] sm:$0xff]  ;;  %v3307_v44 = vadd.f32 %v9305_v0, %v3173_v1  ;;  %v9308_v24 = vld [vmem:[#allocation32_spill] sm:$0xff] }
 0xb71   :  { %v3437_v31 = vadd.f32 %v9294_v26, %v3303_v8  ;;  %v9317_v8 = vld [vmem:[#allocation67_spill] sm:$0xff] }
 0xb74   :  { %v8022_v36 = vpop.f32.mrf.mxu0 }
 0xb75   :  { %9287 = vst [vmem:[#allocation78_spill] sm:$0xff] %v8022_v36  ;;  %v3034_v36 = vadd.f32 %v7660_v49, %v2869_v23  ;;  %v3171_v49 = vadd.f32 %v7780_v45, %v3037_v48  ;;  %v9296_v45 = vld [vmem:[#allocation55_spill] sm:$0xff]  ;;  %v9298_v23 = vld [vmem:[#allocation58_spill] sm:$0xff]  ;;  %v3571_v48 = vadd.f32 %v9308_v24, %v3437_v31  ;;  %v9322_v31 = vld [vmem:[#allocation53_spill] sm:$0xff] }
 0xb76   :  { %v3180_v2 = vadd.f32 %v9298_v23, %v3046_v30  ;;  %v9315_v30 = vld [vmem:[#allocation25_spill] sm:$0xff]  ;;  %v3441_v39 = vadd.f32 %v9322_v31, %v3307_v44  ;;  %v9332_v44 = vld [vmem:[#allocation70_spill] sm:$0xff]  ;;  %v9334_v24 = vld [vmem:[#allocation60_spill] sm:$0xff] }
 0xb77   :  { %v3168_v13 = vadd.f32 %v7745_v22, %v3034_v36  ;;  %v9301_v36 = vld [vmem:[#allocation50_spill] sm:$0xff] }
 0xb78   :  { %v3438_v37 = vadd.f32 %v9301_v36, %v3304_v7  ;;  %v3314_v5 = vadd.f32 %v9315_v30, %v3180_v2  ;;  %v9323_v7 = vld [vmem:[#allocation31_spill] sm:$0xff]  ;;  %v9325_v2 = vld [vmem:[#allocation21_spill] sm:$0xff]  ;;  %v9345_v31 = vld [vmem:[#allocation74_spill] sm:$0xff] }
 0xb79   :  { %v9340_v30 = vld [vmem:[#allocation37_spill] sm:$0xff] }
 0xb7a   :  { %v3572_v1 = vadd.f32 %v9317_v8, %v3438_v37 }
 0xb7c   :  { %v8024_v60 = vpop.f32.mrf.mxu0 }
 0xb7d   :  { %9288 = vst [vmem:[#allocation79_spill] sm:$0xff] %v8024_v60  ;;  %v2881_v60 = vadd.f32 %v7519_v55, %v7315_v15  ;;  %v2899_v15 = vadd.f32 %v7582_v9, %v7386_v54  ;;  %v3040_v54 = vadd.f32 %v7735_v11, %v2887_v58  ;;  %v3041_v55 = vadd.f32 %v7749_v50, %v2890_v28  ;;  %v9292_v11 = vld [vmem:[#allocation52_spill] sm:$0xff]  ;;  %v9304_v58 = vld [vmem:[#allocation46_spill] sm:$0xff] }
 0xb7e   :  { %v3045_v9 = vadd.f32 %v7803_v41, %v2902_v33  ;;  %v3176_v22 = vadd.f32 %v9292_v11, %v3042_v14  ;;  %v9293_v50 = vld [vmem:[#allocation20_spill] sm:$0xff]  ;;  %v3048_v28 = vadd.f32 %v9304_v58, %v2911_v43  ;;  %v9307_v33 = vld [vmem:[#allocation17_spill] sm:$0xff]  ;;  %v8121_v11 = vpop.f32.mrf.mxu1 }
 0xb7f   :  { %v3038_v6 = vadd.f32 %v7715_v46, %v2881_v60  ;;  %v3044_v25 = vadd.f32 %v7790_v19, %v2899_v15  ;;  %v3174_v40 = vadd.f32 %v7827_v61, %v3040_v54  ;;  %v3175_v32 = vadd.f32 %v7843_v62, %v3041_v55  ;;  %v9291_v46 = vld [vmem:[#allocation11_spill] sm:$0xff]  ;;  %v9311_v55 = vld [vmem:[#allocation54_spill] sm:$0xff]  ;;  %v9331_v58 = vld [vmem:[#allocation36_spill] sm:$0xff] }
 0xb80   :  { %v3302_v4 = vadd.f32 %v9291_v46, %v3168_v13  ;;  %v3177_v21 = vadd.f32 %v9293_v50, %v3043_v51  ;;  %v3047_v62 = vadd.f32 %v9300_v53, %v2908_v57  ;;  %v3305_v60 = vadd.f32 %v9302_v27, %v3171_v49  ;;  %v9313_v51 = vld [vmem:[#allocation22_spill] sm:$0xff]  ;;  %v9329_v27 = vld [vmem:[#allocation24_spill] sm:$0xff] }
 0xb81   :  { %v3172_v18 = vadd.f32 %v7799_v47, %v3038_v6  ;;  %v3178_v19 = vadd.f32 %v9296_v45, %v3044_v25  ;;  %v9297_v47 = vld [vmem:[#allocation23_spill] sm:$0xff]  ;;  %v3308_v15 = vadd.f32 %v9306_v56, %v3174_v40  ;;  %v3309_v17 = vadd.f32 %v9307_v33, %v3175_v32  ;;  %v9316_v49 = vld [vmem:[#allocation26_spill] sm:$0xff] }
 0xb82   :  { %v3179_v41 = vadd.f32 %v9297_v47, %v3045_v9  ;;  %v3436_v12 = vadd.f32 %v9299_v3, %v3302_v4  ;;  %v9309_v6 = vld [vmem:[#allocation51_spill] sm:$0xff]  ;;  %v3310_v54 = vadd.f32 %v9310_v52, %v3176_v22  ;;  %v3311_v57 = vadd.f32 %v9311_v55, %v3177_v21  ;;  %v9314_v9 = vld [vmem:[#allocation57_spill] sm:$0xff]  ;;  %v9318_v40 = vld [vmem:[#allocation18_spill] sm:$0xff] }
 0xb83   :  { %v3306_v63 = vadd.f32 %v9303_v35, %v3172_v18  ;;  %v3439_v13 = vadd.f32 %v9309_v6, %v3305_v60  ;;  %v3312_v25 = vadd.f32 %v9313_v51, %v3178_v19  ;;  %v3181_v18 = vadd.f32 %v9316_v49, %v3047_v62  ;;  %v9319_v46 = vld [vmem:[#allocation66_spill] sm:$0xff]  ;;  %v9320_v22 = vld [vmem:[#allocation61_spill] sm:$0xff]  ;;  %v9321_v21 = vld [vmem:[#allocation47_spill] sm:$0xff]  ;;  %v8127_v19 = vpop.f32.mrf.mxu2 }
 0xb84   :  { %v8057_v38 = vpop.f32.mrf.mxu0  ;;  %v3570_v14 = vadd.f32 %v9312_v10, %v3436_v12  ;;  %v3313_v43 = vadd.f32 %v9314_v9, %v3179_v41  ;;  %v3705_v4 = vadd.f32 %v9319_v46, %v3571_v48  ;;  %v3182_v50 = vadd.f32 %v9320_v22, %v3048_v28  ;;  %v4146_v47 = vld [vmem:[%s8959_s14 + $0x8] sm:$0xff]  ;;  %v9324_v41 = vld [vmem:[#allocation35_spill] sm:$0xff]  ;;  %v9326_v12 = vld [vmem:[#allocation34_spill] sm:$0xff] }
 0xb85   :  { %v3440_v32 = vadd.f32 %v9318_v40, %v3306_v63  ;;  %v3049_v26 = vadd.f32 %v9321_v21, %v2914_v29  ;;  %v3573_v23 = vadd.f32 %v9324_v41, %v3439_v13  ;;  %v3442_v3 = vadd.f32 %v9325_v2, %v3308_v15  ;;  %v9327_v62 = vld [vmem:[#allocation71_spill] sm:$0xff]  ;;  %4215 = vmatpush.msrb.mxu1 %v4146_v47  ;;  %v9328_v29 = vld [vmem:[#allocation56_spill] sm:$0xff]  ;;  %v9333_v15 = vld [vmem:[#allocation69_spill] sm:$0xff] }
 0xb86   :  { %v3704_v45 = vadd.f32 %v9323_v7, %v3570_v14  ;;  %v3706_v53 = vadd.f32 %v9326_v12, %v3572_v1  ;;  %v8136_v36 = vadd.f32 %v9327_v62, %v3705_v4  ;;  %v3443_v37 = vadd.f32 %v9328_v29, %v3309_v17  ;;  %v9330_v35 = vld [vmem:[#allocation59_spill] sm:$0xff]  ;;  %v9336_v52 = vld [vmem:[#allocation29_spill] sm:$0xff]  ;;  %v9339_v14 = vld [vmem:[#allocation28_spill] sm:$0xff]  ;;  %v3561_v2 = vpop.f32.mrf.mxu1 }
 0xb87   :  { %v3444_v60 = vadd.f32 %v9329_v27, %v3310_v54  ;;  %v3445_v63 = vadd.f32 %v9330_v35, %v3311_v57  ;;  %v3574_v56 = vadd.f32 %v9332_v44, %v3440_v32  ;;  %v3707_v33 = vadd.f32 %v9333_v15, %v3573_v23  ;;  %v9335_v6 = vld [vmem:[#allocation39_spill] sm:$0xff]  ;;  %v9337_v54 = vld [vmem:[#allocation38_spill] sm:$0xff]  ;;  %v9343_v4 = vld [vmem:[#allocation77_spill] sm:$0xff] }
 0xb88   :  { %v8142_v28 = vadd.f32 %v9331_v58, %v3704_v45  ;;  %v3315_v48 = vadd.f32 %v9334_v24, %v3181_v18  ;;  %v8150_v13 = vadd.f32 %v9335_v6, %v3706_v53  ;;  %v8153_v17 = vadd.f32 %v9336_v52, %v3049_v26  ;;  %v9338_v57 = vld [vmem:[#allocation27_spill] sm:$0xff]  ;;  %v9341_v18 = vld [vmem:[#allocation73_spill] sm:$0xff]  ;;  %v9342_v32 = vld [vmem:[#allocation42_spill] sm:$0xff] }
 0xb89   :  { %v3575_v55 = vadd.f32 %v9337_v54, %v3441_v39  ;;  %v3446_v10 = vadd.f32 %v9338_v57, %v3312_v25  ;;  %v3316_v51 = vadd.f32 %v9339_v14, %v3182_v50  ;;  %v3576_v9 = vadd.f32 %v7997_v16, %v3442_v3  ;;  %v9344_v50 = vld [vmem:[#allocation72_spill] sm:$0xff]  ;;  %v9346_v7 = vld [vmem:[#allocation62_spill] sm:$0xff]  ;;  %v9348_v62 = vld [vmem:[#allocation75_spill] sm:$0xff] }
 0xb8a   :  { %v3708_v49 = vadd.f32 %v9340_v30, %v3574_v56  ;;  %v3895_v8 = vmul.f32 %v8136_v36, %v8136_v36  ;;  %v8163_v1 = vadd.f32 %v9341_v18, %v3707_v33  ;;  %v3577_v40 = vadd.f32 %v8003_v59, %v3443_v37  ;;  %v9347_v47 = vld [vmem:[#allocation40_spill] sm:$0xff]  ;;  %v9351_v33 = vld [vmem:[#allocation43_spill] sm:$0xff] }
 0xb8b   :  { %v3578_v46 = vadd.f32 %v9342_v32, %v3444_v60  ;;  %v3579_v22 = vadd.f32 %v9343_v4, %v3445_v63  ;;  %v3894_v25 = vmul.f32 %v8142_v28, %v8142_v28  ;;  %v3709_v21 = vadd.f32 %v9344_v50, %v3575_v55  ;;  %v3695_v60 = vpop.f32.mrf.mxu2  ;;  %v9352_v6 = vld [vmem:[#allocation76_spill] sm:$0xff] }
 0xb8c   :  { %v8099_v61 = vpop.f32.mrf.mxu0  ;;  %v3857_v16 = vsel %vm379_vm0, %v8136_v36, 0.0  ;;  %v3896_v26 = vmul.f32 %v8150_v13, %v8150_v13  ;;  %v8176_v39 = vadd.f32 %v9345_v31, %v3708_v49  ;;  %v3580_v59 = vadd.f32 %v8026_v34, %v3446_v10  ;;  %v9349_v34 = vld [vmem:[#allocation30_spill] sm:$0xff] }
 0xb8d   :  { %v3447_v45 = vadd.f32 %v9346_v7, %v3313_v43  ;;  %v3710_v41 = vadd.f32 %v9347_v47, %v3576_v9  ;;  %v3856_v23 = vsel %vm379_vm0, %v8142_v28, 0.0  ;;  %v3911_v3 = vsel %vm379_vm0, %v3895_v8, 0.0  ;;  %v9350_v43 = vld [vmem:[#allocation41_spill] sm:$0xff]  ;;  %v9353_v9 = vld [vmem:[#allocation78_spill] sm:$0xff]  ;;  %v9354_v8 = vld [vmem:[#allocation44_spill] sm:$0xff] }
 0xb8e   :  { %v3859_v12 = vsel %vm379_vm0, %v8150_v13, 0.0  ;;  %v3897_v53 = vmul.f32 %v8163_v1, %v8163_v1  ;;  %v8189_v29 = vadd.f32 %v9348_v62, %v3709_v21  ;;  %v3448_v37 = vadd.f32 %v9349_v34, %v3314_v5  ;;  %v9356_v21 = vld [vmem:[#allocation65_spill] sm:$0xff] }
 0xb8f   :  { %v3711_v27 = vadd.f32 %v9350_v43, %v3577_v40  ;;  %v3910_v35 = vsel %vm379_vm0, %v3894_v25, 0.0  ;;  %v3858_v63 = vadd.f32 %v3857_v16, %v3856_v23  ;;  %v3913_v44 = vsel %vm379_vm0, %v3896_v26, 0.0  ;;  %v9355_v25 = vld [vmem:[#allocation79_spill] sm:$0xff]  ;;  %v9357_v26 = vld [vmem:[#allocation80_spill] sm:$0xff]  ;;  %v9358_v23 = vld [vmem:[#allocation33_spill] sm:$0xff] }
 0xb90   :  { %v3861_v56 = vsel %vm379_vm0, %v8163_v1, 0.0  ;;  %v3898_v15 = vmul.f32 %v8176_v39, %v8176_v39  ;;  %v8200_v24 = vadd.f32 %v9351_v33, %v3710_v41  ;;  %v3581_v5 = vadd.f32 %v8073_v20, %v3447_v45 }
 0xb91   :  { %v3712_v52 = vadd.f32 %v9352_v6, %v3578_v46  ;;  %v3912_v54 = vadd.f32 %v3911_v3, %v3910_v35  ;;  %v3860_v55 = vadd.f32 %v3859_v12, %v3858_v63  ;;  %v3915_v57 = vsel %vm379_vm0, %v3897_v53, 0.0 }
 0xb92   :  { %v3863_v10 = vsel %vm379_vm0, %v8176_v39, 0.0  ;;  %v3899_v14 = vmul.f32 %v8189_v29, %v8189_v29  ;;  %v8210_v30 = vadd.f32 %v9353_v9, %v3711_v27  ;;  %v3582_v49 = vadd.f32 %v8121_v11, %v3448_v37  ;;  %v3564_v27 = vpop.f32.mrf.mxu1 }
 0xb93   :  { %v3713_v18 = vadd.f32 %v9354_v8, %v3579_v22  ;;  %v3914_v20 = vadd.f32 %v3913_v44, %v3912_v54  ;;  %v3862_v40 = vadd.f32 %v3861_v56, %v3860_v55  ;;  %v3917_v32 = vsel %vm379_vm0, %v3898_v15, 0.0  ;;  %v3698_v35 = vpop.f32.mrf.mxu2 }
 0xb94   :  { %v8144_v0 = vpop.f32.mrf.mxu0  ;;  %v3865_v46 = vsel %vm379_vm0, %v8189_v29, 0.0  ;;  %v3900_v4 = vmul.f32 %v8200_v24, %v8200_v24  ;;  %v8220_v50 = vadd.f32 %v9355_v25, %v3712_v52  ;;  %v3449_v16 = vadd.f32 %v9356_v21, %v3315_v48 }
 0xb95   :  { %v3714_v31 = vadd.f32 %v9357_v26, %v3580_v59  ;;  %v3916_v11 = vadd.f32 %v3915_v57, %v3914_v20  ;;  %v3864_v7 = vadd.f32 %v3863_v10, %v3862_v40  ;;  %v3919_v22 = vsel %vm379_vm0, %v3899_v14, 0.0  ;;  %v9359_v57 = vld [vmem:[#allocation63_spill] sm:$0xff]  ;;  %v9360_v20 = vld [vmem:[#allocation68_spill] sm:$0xff] }
 0xb96   :  { %v3867_v45 = vsel %vm379_vm0, %v8200_v24, 0.0  ;;  %v3901_v47 = vmul.f32 %v8210_v30, %v8210_v30  ;;  %v8230_v41 = vadd.f32 %v8057_v38, %v3713_v18  ;;  %v3450_v3 = vadd.f32 %v9358_v23, %v3316_v51 }
 0xb97   :  { %v3715_v12 = vadd.f32 %v8080_v42, %v3581_v5  ;;  %v3918_v48 = vadd.f32 %v3917_v32, %v3916_v11  ;;  %v3866_v53 = vadd.f32 %v3865_v46, %v3864_v7  ;;  %v3921_v62 = vsel %vm379_vm0, %v3900_v4, 0.0 }
 0xb98   :  { %v3869_v34 = vsel %vm379_vm0, %v8210_v30, 0.0  ;;  %v3902_v37 = vmul.f32 %v8220_v50, %v8220_v50  ;;  %v8240_v43 = vadd.f32 %v8099_v61, %v3714_v31  ;;  %v3583_v38 = vadd.f32 %v3561_v2, %v3449_v16 }
 0xb99   :  { %v3716_v51 = vadd.f32 %v8127_v19, %v3582_v49  ;;  %v3920_v42 = vadd.f32 %v3919_v22, %v3918_v48  ;;  %v3868_v63 = vadd.f32 %v3867_v45, %v3866_v53  ;;  %v3923_v44 = vsel %vm379_vm0, %v3901_v47, 0.0 }
 0xb9a   :  { %v3871_v56 = vsel %vm379_vm0, %v8220_v50, 0.0  ;;  %v3903_v15 = vmul.f32 %v8230_v41, %v8230_v41  ;;  %v8249_v33 = vadd.f32 %v8144_v0, %v3715_v12  ;;  %v3584_v61 = vadd.f32 %v3564_v27, %v3450_v3  ;;  %v3567_v22 = vpop.f32.mrf.mxu1 }
 0xb9b   :  { %v3717_v5 = vadd.f32 %v3695_v60, %v3583_v38  ;;  %v3922_v2 = vadd.f32 %v3921_v62, %v3920_v42  ;;  %v3870_v6 = vadd.f32 %v3869_v34, %v3868_v63  ;;  %v3925_v19 = vsel %vm379_vm0, %v3902_v37, 0.0  ;;  %v3701_v45 = vpop.f32.mrf.mxu2 }
 0xb9c   :  { %v3826_v58 = vpop.f32.mrf.mxu0  ;;  %v3873_v52 = vsel %vm379_vm0, %v8230_v41, 0.0  ;;  %v3904_v54 = vmul.f32 %v8240_v43, %v8240_v43  ;;  %v3317_v10 = vadd.f32 %v9359_v57, %v8153_v17  ;;  %v3718_v14 = vadd.f32 %v3698_v35, %v3584_v61 }
 0xb9d   :  { %v8256_v55 = vadd.f32 %v3826_v58, %v3716_v51  ;;  %v3924_v0 = vadd.f32 %v3923_v44, %v3922_v2  ;;  %v3872_v9 = vadd.f32 %v3871_v56, %v3870_v6  ;;  %v3927_v60 = vsel %vm379_vm0, %v3903_v15, 0.0 }
 0xb9e   :  { %v3875_v49 = vsel %vm379_vm0, %v8240_v43, 0.0  ;;  %v3905_v8 = vmul.f32 %v8249_v33, %v8249_v33  ;;  %v3451_v40 = vadd.f32 %v9360_v20, %v3317_v10  ;;  %v3929_v17 = vsel %vm379_vm0, %v3904_v54, 0.0 }
 0xb9f   :  { %v3926_v58 = vadd.f32 %v3925_v19, %v3924_v0  ;;  %v3874_v32 = vadd.f32 %v3873_v52, %v3872_v9  ;;  %v3877_v4 = vsel %vm379_vm0, %v8249_v33, 0.0  ;;  %v3906_v25 = vmul.f32 %v8256_v55, %v8256_v55 }
 0xba0   :  { %v3931_v31 = vsel %vm379_vm0, %v3905_v8, 0.0  ;;  %v3879_v11 = vsel %vm379_vm0, %v8256_v55, 0.0  ;;  %v3585_v3 = vadd.f32 %v3567_v22, %v3451_v40  ;;  %v9361_v40 = vld [vmem:[#allocation131_spill] sm:$0xff]  ;;  %v5365_v22 = vld [vmem:[%s8959_s14 + $0x30] sm:$0xff] }
 0xba1   :  { %v3928_v16 = vadd.f32 %v3927_v60, %v3926_v58  ;;  %v3876_v26 = vadd.f32 %v3875_v49, %v3874_v32  ;;  %v3933_v12 = vsel %vm379_vm0, %v3906_v25, 0.0 }
 0xba2   :  { %v3719_v34 = vadd.f32 %v3701_v45, %v3585_v3  ;;  %v5384_v45 = vld [vmem:[%s8959_s14 + $0x48] sm:$0xff] }
 0xba3   :  { %v3930_v47 = vadd.f32 %v3929_v17, %v3928_v16  ;;  %v3878_v23 = vadd.f32 %v3877_v4, %v3876_v26  ;;  %v5366_v17 = vld [vmem:[%s8959_s14 + $0x38] sm:$0xff] }
 0xba4   :  { %v3829_v59 = vpop.f32.mrf.mxu0  ;;  %v5386_v4 = vld [vmem:[%s8959_s14 + $0x58] sm:$0xff]  ;;  %4395 = vmatpush.msrb.mxu2 %v5366_v17 }
 0xba5   :  { %v8265_v18 = vadd.f32 %v3829_v59, %v3717_v5  ;;  %v3932_v59 = vadd.f32 %v3931_v31, %v3930_v47  ;;  %v3880_v62 = vadd.f32 %v3879_v11, %v3878_v23  ;;  %4593 = vmatpush.msrb.mxu0 %v5386_v4  ;;  %v5404_v11 = vld [vmem:[%s8959_s14 + $0x78] sm:$0xff]  ;;  %v5364_v47 = vld [vmem:[%s8959_s14 + $0x28] sm:$0xff]  ;;  %v5383_v23 = vld [vmem:[%s8959_s14 + $0x40] sm:$0xff] }
 0xba6   :  { %4396 = vmatpush.msrb.mxu2 %v5365_v22 }
 0xba7   :  { %v3907_v7 = vmul.f32 %v8265_v18, %v8265_v18  ;;  %v3881_v48 = vsel %vm379_vm0, %v8265_v18, 0.0  ;;  %v3934_v27 = vadd.f32 %v3933_v12, %v3932_v59 }
 0xba8   :  { %v3882_v51 = vadd.f32 %v3881_v48, %v3880_v62  ;;  %4397 = vmatpush.msrb.mxu2 %v5364_v47  ;;  %v5363_v48 = vld [vmem:[%s8959_s14 + $0x20] sm:$0xff] }
 0xba9   :  { %v3935_v37 = vsel %vm379_vm0, %v3907_v7, 0.0  ;;  %v5385_v7 = vld [vmem:[%s8959_s14 + $0x50] sm:$0xff] }
 0xbaa   :  { %v3936_v44 = vadd.f32 %v3935_v37, %v3934_v27  ;;  %4594 = vmatpush.msrb.mxu0 %v5385_v7  ;;  %4398 = vmatpush.msrb.mxu2 %v5363_v48  ;;  %v3854_v27 = vld [vmem:[%s8958_s13] sm:$0x1] }
 0xbac   :  { %v3832_v46 = vpop.f32.mrf.mxu0  ;;  %4595 = vmatpush.msrb.mxu0 %v5384_v45 }
 0xbad   :  { %v8273_v21 = vadd.f32 %v3832_v46, %v3718_v14  ;;  %v4145_v46 = vld [vmem:[%s8959_s14] sm:$0xff] }
 0xbae   :  { %4216 = vmatpush.msrb.mxu1 %v4145_v46  ;;  %4596 = vmatpush.msrb.mxu0 %v5383_v23 }
 0xbaf   :  { %v3908_v53 = vmul.f32 %v8273_v21, %v8273_v21  ;;  %v3883_v38 = vsel %vm379_vm0, %v8273_v21, 0.0 }
 0xbb0   :  { %v3884_v56 = vadd.f32 %v3883_v38, %v3882_v51  ;;  %4807 = vmatpush.msra.mxu1 %v5404_v11 }
 0xbb1   :  { %v3937_v42 = vsel %vm379_vm0, %v3908_v53, 0.0  ;;  %v5513_v53 = vmov 0.0  }
 0xbb2   :  { %v3938_v5 = vadd.f32 %v3937_v42, %v3936_v44  ;;  %4062 = vst.msk [vmem:[#allocation4 + $0x80] sm:$0xff] %vm379_vm0, %v5513_v53 }
 0xbb4   :  { %v3835_v35 = vpop.f32.mrf.mxu0 }
 0xbb5   :  { %v8289_v63 = vadd.f32 %v3835_v35, %v3719_v34  ;;  %v9362_v34 = vlaneseq }
 0xbb7   :  { %v3885_v15 = vsel %vm379_vm0, %v8289_v63, 0.0  ;;  %v3909_v61 = vmul.f32 %v8289_v63, %v8289_v63  ;;  %v8331_v37 = vshrl.u32 %v9362_v34, 7  ;;  %v5403_v34 = vld [vmem:[%s8959_s14 + $0x70] sm:$0xff] }
 0xbb8   :  { %v3886_v2 = vadd.f32 %v3885_v15, %v3884_v56  ;;  %4808 = vmatpush.msra.mxu1 %v5403_v34 }
 0xbb9   :  { %v3939_v6 = vsel %vm379_vm0, %v3909_v61, 0.0  ;;  %v8337_v35 = vadd.s32 8, %v8331_v37  ;;  %v8340_v42 = vadd.s32 16, %v8331_v37  ;;  %v8343_v44 = vadd.s32 24, %v8331_v37 }
 0xbba   :  { %v3887_v19 = vrot.slane %v3886_v2, 4  ;;  %v3940_v52 = vadd.f32 %v3939_v6, %v3938_v5  ;;  %v8346_v56 = vadd.s32 32, %v8331_v37  ;;  %v8349_v61 = vadd.s32 40, %v8331_v37  ;;  %v3855_v6 = vld [vmem:[%s8958_s13 + $0x1] sm:$0x1] }
 0xbbb   :  { %v8352_v5 = vadd.s32 48, %v8331_v37 }
 0xbbc   :  { %v3888_v54 = vadd.f32 %v3887_v19, %v3886_v2  ;;  %v3941_v57 = vrot.slane %v3940_v52, 4  ;;  %v4081_v19 = vand.u32 7, %v8331_v37 }
 0xbbe   :  { %v3889_v10 = vrot.slane %v3888_v54, 2  ;;  %v3942_v14 = vadd.f32 %v3941_v57, %v3940_v52  ;;  %v4082_v52 = vand.u32 7, %v8337_v35  ;;  %vm8412_vm4 = vcmp.ne.s32.totalorder %v4081_v19, 7 }
 0xbc0   :  { %v3890_v0 = vadd.f32 %v3889_v10, %v3888_v54  ;;  %v3943_v9 = vrot.slane %v3942_v14, 2  ;;  %v4083_v54 = vand.u32 7, %v8340_v42  ;;  %vm8436_vm10 = vcmp.ne.s32.totalorder %v4082_v52, 7 }
 0xbc2   :  { %v3891_v60 = vrot.slane %v3890_v0, 1  ;;  %v3944_v49 = vadd.f32 %v3943_v9, %v3942_v14  ;;  %v4084_v14 = vand.u32 7, %v8343_v44  ;;  %v4086_v9 = vand.u32 7, %v8349_v61 }
 0xbc3   :  { %vm8449_vm11 = vcmp.ne.s32.totalorder %v4083_v54, 7 }
 0xbc4   :  { %v3892_v8 = vadd.f32 %v3891_v60, %v3890_v0  ;;  %v3945_v20 = vrot.slane %v3944_v49, 1  ;;  %v4085_v0 = vand.u32 7, %v8346_v56  ;;  %v4087_v60 = vand.u32 7, %v8352_v5 }
 0xbc5   :  { %vm8457_vm12 = vcmp.ne.s32.totalorder %v4084_v14, 7 }
 0xbc6   :  { %v3893_v58 = vmul.f32 %v3892_v8, %v9361_v40  ;;  %v3946_v32 = vadd.f32 %v3945_v20, %v3944_v49  ;;  %v8367_v49 = vadd.s32 64, %v8331_v37  ;;  %v8370_v8 = vadd.s32 72, %v8331_v37 }
 0xbc8   :  { %v3947_v25 = vmul.f32 %v3946_v32, %v9361_v40  ;;  %v3948_v16 = vmul.f32 %v3893_v58, %v3893_v58  ;;  %v4089_v61 = vand.u32 7, %v8367_v49 }
 0xbca   :  { %v3949_v26 = vsub.f32 %v3947_v25, %v3948_v16 }
 0xbcc   :  { %v3950_v31 = vadd.f32 1e-05, %v3949_v26 }
 0xbce   :  { %5448 = vrsqrt.f32 %v3950_v31  ;;  %vm3957_vm14 = vweird.f32 %v3950_v31 }
 0xbd4   :  { %v5449_v3 = vpop.eup %5448 }
 0xbd5   :  { %v3952_v12 = vmul.f32 %v5449_v3, %v3950_v31  ;;  %vm3958_vm13 = vweird.f32 %v5449_v3 }
 0xbd6   :  { %vm3959_vm15 = vmor %vm3957_vm14, %vm3958_vm13 }
 0xbd7   :  { %v3953_v59 = vmul.f32 %v5449_v3, %v3952_v12 }
 0xbd9   :  { %v3954_v62 = vmul.f32 0.5, %v3953_v59 }
 0xbdb   :  { %v3955_v38 = vsub.f32 1.5, %v3954_v62 }
 0xbdd   :  { %v3956_v51 = vmul.f32 %v5449_v3, %v3955_v38 }
 0xbdf   :  { %v3960_v15 = vsel %vm3959_vm15, %v5449_v3, %v3956_v51 }
 0xbe0   :  { %v3961_v2 = vmul.f32 %v3960_v15, %v3854_v27 }
 0xbe2   :  { %v3962_v57 = vmul.f32 %v3961_v2, %v3893_v58  ;;  %v8360_v10 = vperm.slane %v3961_v2, 0 }
 0xbe4   :  { %v3963_v20 = vsub.f32 %v3855_v6, %v3962_v57  ;;  %v8374_v40 = vmul.f32 %v8360_v10, %v8289_v63  ;;  %v3965_v58 = vmul.f32 %v8360_v10, %v8142_v28  ;;  %v3966_v32 = vmul.f32 %v8360_v10, %v8136_v36 }
 0xbe5   :  { %v3967_v46 = vmul.f32 %v8360_v10, %v8150_v13  ;;  %v3968_v17 = vmul.f32 %v8360_v10, %v8163_v1  ;;  %v3969_v4 = vmul.f32 %v8360_v10, %v8176_v39  ;;  %v3970_v25 = vmul.f32 %v8360_v10, %v8189_v29 }
 0xbe6   :  { %v8388_v63 = vperm.slane %v3963_v20, 0  ;;  %v3971_v28 = vmul.f32 %v8360_v10, %v8200_v24  ;;  %v3972_v36 = vmul.f32 %v8360_v10, %v8210_v30  ;;  %v3973_v13 = vmul.f32 %v8360_v10, %v8220_v50 }
 0xbe7   :  { %v3974_v1 = vmul.f32 %v8360_v10, %v8230_v41  ;;  %v3975_v39 = vmul.f32 %v8360_v10, %v8240_v43  ;;  %v3976_v29 = vmul.f32 %v8360_v10, %v8249_v33  ;;  %v3977_v16 = vmul.f32 %v8360_v10, %v8256_v55 }
 0xbe8   :  { %v3982_v24 = vadd.f32 %v8388_v63, %v3965_v58  ;;  %v3983_v26 = vadd.f32 %v8388_v63, %v3966_v32  ;;  %v3984_v30 = vadd.f32 %v8388_v63, %v3967_v46  ;;  %v3985_v50 = vadd.f32 %v8388_v63, %v3968_v17 }
 0xbe9   :  { %v3986_v31 = vadd.f32 %v8388_v63, %v3969_v4  ;;  %v3987_v41 = vadd.f32 %v8388_v63, %v3970_v25  ;;  %v3988_v43 = vadd.f32 %v8388_v63, %v3971_v28  ;;  %v3989_v11 = vadd.f32 %v8388_v63, %v3972_v36 }
 0xbea   :  { %vm3998_vm2 = vcmp.ge.f32.partialorder %v3982_v24, 0.0  ;;  %v4014_v33 = vmul.f32 0.01, %v3982_v24  ;;  %vm3999_vm3 = vcmp.ge.f32.partialorder %v3983_v26, 0.0  ;;  %v4015_v55 = vmul.f32 0.01, %v3983_v26 }
 0xbeb   :  { %vm4000_vm5 = vcmp.ge.f32.partialorder %v3984_v30, 0.0  ;;  %v4016_v22 = vmul.f32 0.01, %v3984_v30  ;;  %vm4001_vm6 = vcmp.ge.f32.partialorder %v3985_v50, 0.0  ;;  %v4017_v45 = vmul.f32 0.01, %v3985_v50 }
 0xbec   :  { %v4030_v47 = vsel %vm3998_vm2, %v3982_v24, %v4014_v33  ;;  %v4031_v23 = vsel %vm3999_vm3, %v3983_v26, %v4015_v55  ;;  %vm4002_vm7 = vcmp.ge.f32.partialorder %v3986_v31, 0.0  ;;  %v4018_v3 = vmul.f32 0.01, %v3986_v31 }
 0xbed   :  { %4046 = vst.msk [vmem:[#allocation4] sm:$0xff] %vm379_vm0, %v4030_v47  ;;  %5347 = vmatmul.msk.f32.vlgmr.msrb.gmra.mxu1 %vm379_vm0, %v4030_v47  ;;  %v8418_v12 = vsel %vm4000_vm5, %v3984_v30, %v4016_v22  ;;  %v8420_v48 = vsel %vm4001_vm6, %v3985_v50, %v4017_v45  ;;  %vm4003_vm1 = vcmp.ge.f32.partialorder %v3987_v41, 0.0  ;;  %v4019_v59 = vmul.f32 0.01, %v3987_v41 }
 0xbee   :  { %4047 = vst.msk [vmem:[#allocation4 + $0x8] sm:$0xff] %vm379_vm0, %v4031_v23  ;;  %v8423_v62 = vsel %vm4002_vm7, %v3986_v31, %v4018_v3  ;;  %vm4004_vm8 = vcmp.ge.f32.partialorder %v3988_v43, 0.0  ;;  %v4020_v38 = vmul.f32 0.01, %v3988_v43  ;;  %vm4005_vm9 = vcmp.ge.f32.partialorder %v3989_v11, 0.0 }
 0xbef   :  { %4048 = vst.msk [vmem:[#allocation4 + $0x10] sm:$0xff] %vm379_vm0, %v8418_v12  ;;  %v8430_v27 = vsel %vm4003_vm1, %v3987_v41, %v4019_v59  ;;  %v4021_v51 = vmul.f32 0.01, %v3989_v11  ;;  %v3990_v15 = vadd.f32 %v8388_v63, %v3973_v13  ;;  %v3991_v2 = vadd.f32 %v8388_v63, %v3974_v1 }
 0xbf0   :  { %4049 = vst.msk [vmem:[#allocation4 + $0x18] sm:$0xff] %vm379_vm0, %v8420_v48  ;;  %v8442_v19 = vsel %vm4004_vm8, %v3988_v43, %v4020_v38  ;;  %v3992_v57 = vadd.f32 %v8388_v63, %v3975_v39  ;;  %v3993_v20 = vadd.f32 %v8388_v63, %v3976_v29  ;;  %v3994_v58 = vadd.f32 %v8388_v63, %v3977_v16 }
 0xbf1   :  { %4050 = vst.msk [vmem:[#allocation4 + $0x20] sm:$0xff] %vm379_vm0, %v8423_v62  ;;  %v8462_v52 = vsel %vm4005_vm9, %v3989_v11, %v4021_v51  ;;  %vm4006_vm13 = vcmp.ge.f32.partialorder %v3990_v15, 0.0  ;;  %v4022_v46 = vmul.f32 0.01, %v3990_v15  ;;  %vm4007_vm14 = vcmp.ge.f32.partialorder %v3991_v2, 0.0 }
 0xbf2   :  { %4051 = vst.msk [vmem:[#allocation4 + $0x28] sm:$0xff] %vm379_vm0, %v8430_v27  ;;  %v4023_v42 = vmul.f32 0.01, %v3991_v2  ;;  %vm4008_vm15 = vcmp.ge.f32.partialorder %v3992_v57, 0.0  ;;  %v4024_v54 = vmul.f32 0.01, %v3992_v57  ;;  %v3978_v17 = vmul.f32 %v8360_v10, %v8265_v18 }
 0xbf3   :  { %4052 = vst.msk [vmem:[#allocation4 + $0x30] sm:$0xff] %vm379_vm0, %v8442_v19  ;;  %v8470_v44 = vsel %vm4006_vm13, %v3990_v15, %v4022_v46  ;;  %vm4009_vm2 = vcmp.ge.f32.partialorder %v3993_v20, 0.0  ;;  %v4025_v14 = vmul.f32 0.01, %v3993_v20  ;;  %vm4010_vm3 = vcmp.ge.f32.partialorder %v3994_v58, 0.0 }
 0xbf4   :  { %4053 = vst.msk [vmem:[#allocation4 + $0x38] sm:$0xff] %vm379_vm0, %v8462_v52  ;;  %v8474_v4 = vsel %vm4007_vm14, %v3991_v2, %v4023_v42  ;;  %v8476_v25 = vsel %vm4008_vm15, %v3992_v57, %v4024_v54  ;;  %v4026_v28 = vmul.f32 0.01, %v3994_v58  ;;  %v3995_v36 = vadd.f32 %v8388_v63, %v3978_v17 }
 0xbf5   :  { %5348 = vmatmul.msk.f32.gmra.mxu1 %vm379_vm0, %v4031_v23  ;;  %v4464_v18 = vld [vmem:[#allocation4 + $0x8] sm:$0xff]  ;;  %4054 = vst.msk [vmem:[#allocation4 + $0x40] sm:$0xff] %vm379_vm0, %v8470_v44  ;;  %v8482_v1 = vsel %vm4009_vm2, %v3993_v20, %v4025_v14  ;;  %v4075_v39 = vadd.s32 80, %v8331_v37  ;;  %v4076_v29 = vadd.s32 88, %v8331_v37  ;;  %v3979_v16 = vmul.f32 %v8360_v10, %v8273_v21 }
 0xbf6   :  { %v4266_v13 = vld [vmem:[#allocation4 + $0x1] sm:$0xff]  ;;  %5387 = vmatmul.msk.f32.vlgmr.msrb.gmra.mxu0 %vm379_vm0, %v4464_v18  ;;  %v8491_v26 = vld [vmem:[#allocation4 + $0x9] sm:$0xff]  ;;  %4055 = vst.msk [vmem:[#allocation4 + $0x48] sm:$0xff] %vm379_vm0, %v8474_v4  ;;  %v8496_v30 = vsel %vm4010_vm3, %v3994_v58, %v4026_v28  ;;  %vm4011_vm5 = vcmp.ge.f32.partialorder %v3995_v36, 0.0  ;;  %v3997_v50 = vadd.f32 %v8388_v63, %v8374_v40  ;;  %vm8503_vm6 = vcmp.ne.s32.totalorder %v4085_v0, 7 }
 0xbf7   :  { %v4314_v24 = vsel %vm8412_vm4, %v4266_v13, 0.0  ;;  %vm8509_vm7 = vcmp.ne.s32.totalorder %v4086_v9, 7  ;;  %4056 = vst.msk [vmem:[#allocation4 + $0x50] sm:$0xff] %vm379_vm0, %v8476_v25  ;;  %v4027_v31 = vmul.f32 0.01, %v3995_v36  ;;  %v3996_v40 = vadd.f32 %v8388_v63, %v3979_v16  ;;  %v8516_v41 = vld [vmem:[#allocation4 + $0x11] sm:$0xff] }
 0xbf8   :  { %5367 = vmatmul.msk.f32.vlgmr.msrb.gmra.mxu2 %vm379_vm0, %v4314_v24  ;;  %vm8520_vm1 = vcmp.ne.s32.totalorder %v4087_v60, 7  ;;  %v4090_v0 = vand.u32 7, %v8370_v8  ;;  %4057 = vst.msk [vmem:[#allocation4 + $0x58] sm:$0xff] %vm379_vm0, %v8482_v1  ;;  %v4726_v9 = vsel %vm8412_vm4, %v8491_v26, 0.0  ;;  %v8531_v63 = vld [vmem:[#allocation4 + $0x19] sm:$0xff]  ;;  %v4091_v5 = vand.u32 7, %v4075_v39 }
 0xbf9   :  { %v8533_v43 = vld [vmem:[#allocation4 + $0x21] sm:$0xff]  ;;  %4058 = vst.msk [vmem:[#allocation4 + $0x60] sm:$0xff] %vm379_vm0, %v8496_v30  ;;  %v4092_v60 = vand.u32 7, %v4076_v29  ;;  %v8538_v49 = vsel %vm4011_vm5, %v3995_v36, %v4027_v31  ;;  %vm4012_vm8 = vcmp.ge.f32.partialorder %v3996_v40, 0.0  ;;  %v4077_v11 = vadd.s32 96, %v8331_v37  ;;  %v4465_v15 = vld [vmem:[#allocation4 + $0x10] sm:$0xff] }
 0xbfa   :  { %v8540_v8 = vld [vmem:[#allocation4 + $0x29] sm:$0xff]  ;;  %4059 = vst.msk [vmem:[#allocation4 + $0x68] sm:$0xff] %vm379_vm0, %v8538_v49  ;;  %v4028_v33 = vmul.f32 0.01, %v3996_v40  ;;  %vm4013_vm9 = vcmp.ge.f32.partialorder %v3997_v50, 0.0  ;;  %v4078_v22 = vadd.s32 104, %v8331_v37 }
 0xbfb   :  { %v8545_v55 = vld [vmem:[#allocation4 + $0x31] sm:$0xff]  ;;  %v4029_v45 = vmul.f32 0.01, %v3997_v50  ;;  %v4079_v47 = vadd.s32 112, %v8331_v37  ;;  %v4727_v23 = vsel %vm8436_vm10, %v8516_v41, 0.0  ;;  %vm8554_vm13 = vcmp.ne.s32.totalorder %v4089_v61, 7 }
 0xbfc   :  { %v8552_v3 = vld [vmem:[#allocation4 + $0x39] sm:$0xff]  ;;  %v8558_v34 = vsel %vm4012_vm8, %v3996_v40, %v4028_v33  ;;  %v4728_v38 = vsel %vm8449_vm11, %v8531_v63, 0.0  ;;  %v4729_v51 = vsel %vm8457_vm12, %v8533_v43, 0.0  ;;  %vm8568_vm14 = vcmp.ne.s32.totalorder %v4090_v0, 7 }
 0xbfd   :  { %5349 = vmatmul.msk.f32.gmra.mxu1 %vm379_vm0, %v8418_v12  ;;  %4060 = vst.msk [vmem:[#allocation4 + $0x70] sm:$0xff] %vm379_vm0, %v8558_v34  ;;  %v8574_v57 = vsel %vm4013_vm9, %v3997_v50, %v4029_v45  ;;  %v4730_v20 = vsel %vm8503_vm6, %v8540_v8, 0.0  ;;  %v4731_v58 = vsel %vm8509_vm7, %v8545_v55, 0.0  ;;  %v4315_v12 = vsel %vm8436_vm10, %v8491_v26, 0.0 }
 0xbfe   :  { %5388 = vmatmul.msk.f32.gmra.mxu0 %vm379_vm0, %v4465_v15  ;;  %v8586_v46 = vld [vmem:[#allocation4 + $0x49] sm:$0xff]  ;;  %vm8588_vm15 = vcmp.ne.s32.totalorder %v4091_v5, 7  ;;  %v4093_v54 = vand.u32 7, %v4077_v11  ;;  %4061 = vst.msk [vmem:[#allocation4 + $0x78] sm:$0xff] %vm379_vm0, %v8574_v57  ;;  %v4732_v17 = vsel %vm8520_vm1, %v8552_v3, 0.0  ;;  %vm8600_vm2 = vcmp.ne.s32.totalorder %v4092_v60, 7 }
 0xbff   :  { %v8598_v14 = vld [vmem:[#allocation4 + $0x51] sm:$0xff]  ;;  %v4094_v36 = vand.u32 7, %v4078_v22  ;;  %v4095_v18 = vand.u32 7, %v4079_v47  ;;  %v4734_v13 = vsel %vm8554_vm13, %v8586_v46, 0.0  ;;  %v4316_v22 = vsel %vm8449_vm11, %v8516_v41, 0.0  ;;  %v4467_v47 = vld [vmem:[#allocation4 + $0x20] sm:$0xff] }
 0xc00   :  { %5368 = vmatmul.msk.f32.gmra.mxu2 %vm379_vm0, %v4315_v12  ;;  %v8607_v39 = vld [vmem:[#allocation4 + $0x59] sm:$0xff]  ;;  %v4735_v29 = vsel %vm8568_vm14, %v8598_v14, 0.0  ;;  %vm8617_vm3 = vcmp.ne.s32.totalorder %v4093_v54, 7  ;;  %v4317_v15 = vsel %vm8457_vm12, %v8531_v63, 0.0  ;;  %v5402_v12 = vld [vmem:[%s8959_s14 + $0x68] sm:$0xff] }
 0xc01   :  { %v8612_v16 = vld [vmem:[#allocation4 + $0x61] sm:$0xff]  ;;  %v4736_v24 = vsel %vm8588_vm15, %v8607_v39, 0.0  ;;  %vm8624_vm5 = vcmp.ne.s32.totalorder %v4094_v36, 7  ;;  %vm8628_vm8 = vcmp.ne.s32.totalorder %v4095_v18, 7  ;;  %v4466_v5 = vld [vmem:[#allocation4 + $0x18] sm:$0xff]  ;;  %4809 = vmatpush.msra.mxu1 %v5402_v12  ;;  %v4469_v36 = vld [vmem:[#allocation4 + $0x30] sm:$0xff] }
 0xc02   :  { %v4737_v31 = vsel %vm8600_vm2, %v8612_v16, 0.0  ;;  %v4468_v54 = vld [vmem:[#allocation4 + $0x28] sm:$0xff]  ;;  %v4319_v18 = vsel %vm8509_vm7, %v8540_v8, 0.0 }
 0xc03   :  { %v4472_v12 = vld [vmem:[#allocation4 + $0x48] sm:$0xff] }
 0xc04   :  { %v8632_v0 = vld [vmem:[#allocation4 + $0x69] sm:$0xff] }
 0xc05   :  { %5350 = vmatmul.msk.f32.gmra.mxu1 %vm379_vm0, %v8420_v48  ;;  %v8636_v60 = vld [vmem:[#allocation4 + $0x71] sm:$0xff]  ;;  %v8638_v11 = vld [vmem:[#allocation4 + $0x79] sm:$0xff]  ;;  %v4738_v33 = vsel %vm8617_vm3, %v8632_v0, 0.0 }
 0xc06   :  { %5389 = vmatmul.msk.f32.gmra.mxu0 %vm379_vm0, %v4466_v5  ;;  %v4739_v45 = vsel %vm8624_vm5, %v8636_v60, 0.0  ;;  %v4740_v48 = vsel %vm8628_vm8, %v8638_v11, 0.0  ;;  %v4470_v5 = vld [vmem:[#allocation4 + $0x38] sm:$0xff] }
 0xc08   :  { %5369 = vmatmul.msk.f32.gmra.mxu2 %vm379_vm0, %v4316_v22 }
 0xc0d   :  { %5351 = vmatmul.msk.f32.gmra.mxu1 %vm379_vm0, %v8423_v62  ;;  %v4318_v62 = vsel %vm8503_vm6, %v8533_v43, 0.0 }
 0xc0e   :  { %5390 = vmatmul.msk.f32.gmra.mxu0 %vm379_vm0, %v4467_v47 }
 0xc10   :  { %5370 = vmatmul.msk.f32.gmra.mxu2 %vm379_vm0, %v4317_v15  ;;  %v4274_v15 = vld [vmem:[#allocation4 + $0x41] sm:$0xff] }
 0xc15   :  { %5352 = vmatmul.msk.f32.gmra.mxu1 %vm379_vm0, %v8430_v27  ;;  %v4072_v27 = vadd.s32 56, %v8331_v37 }
 0xc16   :  { %5391 = vmatmul.msk.f32.gmra.mxu0 %vm379_vm0, %v4468_v54  ;;  %v4473_v54 = vld [vmem:[#allocation4 + $0x50] sm:$0xff] }
 0xc17   :  { %v4088_v22 = vand.u32 7, %v4072_v27  ;;  %v4326_v27 = vsel %vm8617_vm3, %v8612_v16, 0.0 }
 0xc18   :  { %5371 = vmatmul.msk.f32.gmra.mxu2 %vm379_vm0, %v4318_v62  ;;  %v4323_v62 = vsel %vm8568_vm14, %v8586_v46, 0.0 }
 0xc19   :  { %vm4104_vm9 = vcmp.ne.s32.totalorder %v4088_v22, 7 }
 0xc1a   :  { %v4321_v47 = vsel %vm4104_vm9, %v8552_v3, 0.0 }
 0xc1d   :  { %5353 = vmatmul.msk.f32.gmra.mxu1 %vm379_vm0, %v8442_v19  ;;  %v4320_v19 = vsel %vm8520_vm1, %v8545_v55, 0.0 }
 0xc1e   :  { %5392 = vmatmul.msk.f32.gmra.mxu0 %vm379_vm0, %v4469_v36  ;;  %v4324_v36 = vsel %vm8588_vm15, %v8598_v14, 0.0 }
 0xc20   :  { %5372 = vmatmul.msk.f32.gmra.mxu2 %vm379_vm0, %v4319_v18  ;;  %v4325_v18 = vsel %vm8600_vm2, %v8607_v39, 0.0 }
 0xc25   :  { %5354 = vmatmul.msk.f32.gmra.mxu1 %vm379_vm0, %v8462_v52  ;;  %v5401_v52 = vld [vmem:[%s8959_s14 + $0x60] sm:$0xff] }
 0xc26   :  { %5393 = vmatmul.msk.f32.gmra.mxu0 %vm379_vm0, %v4470_v5  ;;  %4810 = vmatpush.msra.mxu1 %v5401_v52  ;;  %v4327_v5 = vsel %vm8624_vm5, %v8632_v0, 0.0 }
 0xc28   :  { %5373 = vmatmul.msk.f32.gmra.mxu2 %vm379_vm0, %v4320_v19  ;;  %v4478_v19 = vld [vmem:[#allocation4 + $0x78] sm:$0xff] }
 0xc2d   :  { %5355 = vmatmul.msk.f32.gmra.mxu1 %vm379_vm0, %v8470_v44  ;;  %v4322_v44 = vsel %vm8554_vm13, %v4274_v15, 0.0 }
 0xc2e   :  { %4618 = vmatmul.f32.gmra.mxu0 %v5513_v53 }
 0xc30   :  { %5374 = vmatmul.msk.f32.gmra.mxu2 %vm379_vm0, %v4321_v47 }
 0xc35   :  { %5356 = vmatmul.msk.f32.gmra.mxu1 %vm379_vm0, %v8474_v4  ;;  %v4474_v4 = vld [vmem:[#allocation4 + $0x58] sm:$0xff] }
 0xc36   :  { %5394 = vmatmul.msk.f32.gmra.mxu0 %vm379_vm0, %v4472_v12 }
 0xc38   :  { %5375 = vmatmul.msk.f32.gmra.mxu2 %vm379_vm0, %v4322_v44 }
 0xc3d   :  { %5357 = vmatmul.msk.f32.gmra.mxu1 %vm379_vm0, %v8476_v25  ;;  %v4475_v25 = vld [vmem:[#allocation4 + $0x60] sm:$0xff] }
 0xc3e   :  { %5395 = vmatmul.msk.f32.gmra.mxu0 %vm379_vm0, %v4473_v54 }
 0xc40   :  { %5376 = vmatmul.msk.f32.gmra.mxu2 %vm379_vm0, %v4323_v62 }
 0xc45   :  { %5358 = vmatmul.msk.f32.gmra.mxu1 %vm379_vm0, %v8482_v1  ;;  %v4476_v1 = vld [vmem:[#allocation4 + $0x68] sm:$0xff] }
 0xc46   :  { %5396 = vmatmul.msk.f32.gmra.mxu0 %vm379_vm0, %v4474_v4 }
 0xc48   :  { %5377 = vmatmul.msk.f32.gmra.mxu2 %vm379_vm0, %v4324_v36 }
 0xc4d   :  { %5359 = vmatmul.msk.f32.gmra.mxu1 %vm379_vm0, %v8496_v30  ;;  %v4477_v30 = vld [vmem:[#allocation4 + $0x70] sm:$0xff] }
 0xc4e   :  { %5397 = vmatmul.msk.f32.gmra.mxu0 %vm379_vm0, %v4475_v25 }
 0xc50   :  { %5378 = vmatmul.msk.f32.gmra.mxu2 %vm379_vm0, %v4325_v18 }
 0xc55   :  { %5360 = vmatmul.msk.f32.gmra.mxu1 %vm379_vm0, %v8538_v49  ;;  %v4080_v49 = vadd.s32 120, %v8331_v37 }
 0xc56   :  { %5398 = vmatmul.msk.f32.gmra.mxu0 %vm379_vm0, %v4476_v1 }
 0xc57   :  { %v4096_v22 = vand.u32 7, %v4080_v49 }
 0xc58   :  { %5379 = vmatmul.msk.f32.gmra.mxu2 %vm379_vm0, %v4326_v27 }
 0xc59   :  { %vm4112_vm9 = vcmp.ne.s32.totalorder %v4096_v22, 7 }
 0xc5a   :  { %v4329_v37 = vsel %vm4112_vm9, %v8638_v11, 0.0 }
 0xc5d   :  { %5361 = vmatmul.msk.f32.gmra.mxu1 %vm379_vm0, %v8558_v34  ;;  %v4328_v34 = vsel %vm8628_vm8, %v8636_v60, 0.0 }
 0xc5e   :  { %5399 = vmatmul.msk.f32.gmra.mxu0 %vm379_vm0, %v4477_v30 }
 0xc60   :  { %5380 = vmatmul.msk.f32.gmra.mxu2 %vm379_vm0, %v4327_v5 }
 0xc65   :  { %5362 = vmatmul.msk.f32.gmra.mxu1 %vm379_vm0, %v8574_v57 }
 0xc66   :  { %5400 = vmatmul.msk.f32.gmra.mxu0 %vm379_vm0, %v4478_v19 }
 0xc68   :  { %5381 = vmatmul.msk.f32.gmra.mxu2 %vm379_vm0, %v4328_v34 }
 0xc6a   :  { %v4218_v47 = vpop.f32.mrf.mxu1 }
 0xc6d   :  { %5405 = vmatmul.msk.f32.vlgmr.msra.gmra.mxu1 %vm379_vm0, %v4726_v9 }
 0xc6e   :  { %4642 = vmatmul.f32.gmra.mxu0 %v5513_v53 }
 0xc70   :  { %5382 = vmatmul.msk.f32.gmra.mxu2 %vm379_vm0, %v4329_v37 }
 0xc72   :  { %v4221_v57 = vpop.f32.mrf.mxu1 }
 0xc73   :  { %v4598_v63 = vpop.f32.mrf.mxu0 }
 0xc75   :  { %5406 = vmatmul.msk.f32.gmra.mxu1 %vm379_vm0, %v4727_v23 }
 0xc7a   :  { %v4224_v52 = vpop.f32.mrf.mxu1 }
 0xc7b   :  { %v4400_v9 = vpop.f32.mrf.mxu2  ;;  %v4601_v23 = vpop.f32.mrf.mxu0 }
 0xc7d   :  { %5407 = vmatmul.msk.f32.gmra.mxu1 %vm379_vm0, %v4728_v38 }
 0xc82   :  { %v8761_v7 = vpop.f32.mrf.mxu1 }
 0xc83   :  { %v4403_v8 = vpop.f32.mrf.mxu2  ;;  %v4604_v38 = vpop.f32.mrf.mxu0 }
 0xc85   :  { %5408 = vmatmul.msk.f32.gmra.mxu1 %vm379_vm0, %v4729_v51  ;;  %v8844_v51 = vld [vmem:[%s8960_s15] ss:$0 sm:$0xff]  ;;  %s4920_s15 = sshll.u32 %s8963_s18, 4  ;;  %s4921_s15 = int_to_ptr.hbm [resolvable:$true] %s4920_s15 }
 0xc86   :  { %v4222_v28 = vadd.f32 %v8844_v51, %v4221_v57  ;;  %4923 = dma.vmem_to_hbm [thread:$0]  %s4919_s3, 16, %s4921_s15, [#allocation6]  }
 0xc8a   :  { %v8768_v6 = vpop.f32.mrf.mxu1 }
 0xc8b   :  { %v4406_v3 = vpop.f32.mrf.mxu2  ;;  %v4607_v42 = vpop.f32.mrf.mxu0  ;;  %v4231_v36 = vadd.f32 %v8844_v51, %v8768_v6 }
 0xc8d   :  { %5409 = vmatmul.msk.f32.gmra.mxu1 %vm379_vm0, %v4730_v20 }
 0xc92   :  { %v8775_v32 = vpop.f32.mrf.mxu1 }
 0xc93   :  { %v4409_v2 = vpop.f32.mrf.mxu2  ;;  %v4610_v16 = vpop.f32.mrf.mxu0  ;;  %v4234_v19 = vadd.f32 %v8844_v51, %v8775_v32 }
 0xc95   :  { %5410 = vmatmul.msk.f32.gmra.mxu1 %vm379_vm0, %v4731_v58  ;;  %v4219_v58 = vadd.f32 %v8844_v51, %v4218_v47 }
 0xc97   :  { %v4448_v46 = vadd.f32 %v4400_v9, %v4219_v58 }
 0xc9a   :  { %v8782_v35 = vpop.f32.mrf.mxu1 }
 0xc9b   :  { %v4412_v39 = vpop.f32.mrf.mxu2  ;;  %v4613_v15 = vpop.f32.mrf.mxu0 }
 0xc9c   :  { %v4452_v18 = vadd.f32 %v4412_v39, %v4231_v36 }
 0xc9d   :  { %5411 = vmatmul.msk.f32.gmra.mxu1 %vm379_vm0, %v4732_v17  ;;  %v4646_v17 = vadd.f32 %v4598_v63, %v4448_v46 }
 0xc9e   :  { %v4650_v27 = vadd.f32 %v4610_v16, %v4452_v18 }
 0xca2   :  { %v8789_v26 = vpop.f32.mrf.mxu1 }
 0xca3   :  { %v4415_v0 = vpop.f32.mrf.mxu2  ;;  %v4616_v1 = vpop.f32.mrf.mxu0 }
 0xca4   :  { %v4453_v22 = vadd.f32 %v4415_v0, %v4234_v19 }
 0xca5   :  { %4832 = vmatmul.f32.gmra.mxu1 %v5513_v53 }
 0xca6   :  { %v4651_v37 = vadd.f32 %v4613_v15, %v4453_v22 }
 0xcaa   :  { %v8792_v21 = vpop.f32.mrf.mxu1 }
 0xcab   :  { %v4418_v44 = vpop.f32.mrf.mxu2  ;;  %v4619_v47 = vpop.f32.mrf.mxu0 }
 0xcad   :  { %5412 = vmatmul.msk.f32.gmra.mxu1 %vm379_vm0, %v4734_v13 }
 0xcb2   :  { %v8799_v10 = vpop.f32.mrf.mxu1 }
 0xcb3   :  { %v4421_v30 = vpop.f32.mrf.mxu2 }
 0xcb5   :  { %5413 = vmatmul.msk.f32.gmra.mxu1 %vm379_vm0, %v4735_v29  ;;  %v4449_v29 = vadd.f32 %v4403_v8, %v4222_v28  ;;  %v4622_v8 = vpop.f32.mrf.mxu0 }
 0xcba   :  { %v8806_v41 = vpop.f32.mrf.mxu1 }
 0xcbb   :  { %v4424_v9 = vpop.f32.mrf.mxu2 }
 0xcbd   :  { %5414 = vmatmul.msk.f32.gmra.mxu1 %vm379_vm0, %v4736_v24 }
 0xcc2   :  { %v8813_v56 = vpop.f32.mrf.mxu1 }
 0xcc3   :  { %v4427_v58 = vpop.f32.mrf.mxu2 }
 0xcc5   :  { %5415 = vmatmul.msk.f32.gmra.mxu1 %vm379_vm0, %v4737_v31  ;;  %v4225_v31 = vadd.f32 %v8844_v51, %v4224_v52 }
 0xcc7   :  { %v4450_v61 = vadd.f32 %v4406_v3, %v4225_v31 }
 0xcc9   :  { %v4648_v60 = vadd.f32 %v4604_v38, %v4450_v61  ;;  %v4240_v38 = vadd.f32 %v8844_v51, %v8789_v26 }
 0xcca   :  { %v8820_v43 = vpop.f32.mrf.mxu1 }
 0xccb   :  { %v4430_v39 = vpop.f32.mrf.mxu2 }
 0xccd   :  { %5416 = vmatmul.msk.f32.gmra.mxu1 %vm379_vm0, %v4738_v33 }
 0xcd2   :  { %v8827_v55 = vpop.f32.mrf.mxu1 }
 0xcd3   :  { %v4433_v61 = vpop.f32.mrf.mxu2 }
 0xcd5   :  { %5417 = vmatmul.msk.f32.gmra.mxu1 %vm379_vm0, %v4739_v45  ;;  %v4228_v45 = vadd.f32 %v8844_v51, %v8761_v7  ;;  %v4237_v7 = vadd.f32 %v8844_v51, %v8782_v35  ;;  %v4455_v35 = vadd.f32 %v4421_v30, %v4240_v38 }
 0xcd7   :  { %v4451_v12 = vadd.f32 %v4409_v2, %v4228_v45  ;;  %v4454_v32 = vadd.f32 %v4418_v44, %v4237_v7  ;;  %v4653_v46 = vadd.f32 %v4619_v47, %v4455_v35  ;;  %v4252_v44 = vadd.f32 %v8844_v51, %v8813_v56 }
 0xcd9   :  { %v4649_v54 = vadd.f32 %v4607_v42, %v4451_v12  ;;  %v4652_v63 = vadd.f32 %v4616_v1, %v4454_v32  ;;  %v4255_v1 = vadd.f32 %v8844_v51, %v8820_v43 }
 0xcda   :  { %v8834_v59 = vpop.f32.mrf.mxu1 }
 0xcdd   :  { %5418 = vmatmul.msk.f32.gmra.mxu1 %vm379_vm0, %v4740_v48  ;;  %vm4892_vm0 = vcmask 97280  }
 0xce2   :  { %v8846_v20 = vpop.f32.mrf.mxu1 }
 0xce3   :  { %v4264_v38 = vadd.f32 %v8844_v51, %v8846_v20 }
 0xce5   :  { %4856 = vmatmul.f32.gmra.mxu1 %v5513_v53  ;;  %v4647_v53 = vadd.f32 %v4601_v23, %v4449_v29 }
 0xcea   :  { %v4812_v14 = vpop.f32.mrf.mxu1 }
 0xceb   :  { %v4860_v13 = vadd.f32 %v4812_v14, %v4646_v17  ;;  %v4243_v14 = vadd.f32 %v8844_v51, %v8792_v21 }
 0xced   :  { %5450 = vtanh.f32 %v4860_v13  ;;  %v4625_v13 = vpop.f32.mrf.mxu0  ;;  %v4456_v26 = vadd.f32 %v4424_v9, %v4243_v14 }
 0xcef   :  { %v4654_v29 = vadd.f32 %v4622_v8, %v4456_v26 }
 0xcf2   :  { %v4815_v24 = vpop.f32.mrf.mxu1 }
 0xcf3   :  { %v5451_v50 = vpop.eup %5450  ;;  %v4861_v40 = vadd.f32 %v4815_v24, %v4647_v53  ;;  %v4246_v24 = vadd.f32 %v8844_v51, %v8799_v10 }
 0xcf4   :  { %4893 = vst.msk [vmem:[%s8961_s16] sm:$0xff] %vm4892_vm0, %v5451_v50 }
 0xcf5   :  { %5452 = vtanh.f32 %v4861_v40  ;;  %v4457_v21 = vadd.f32 %v4427_v58, %v4246_v24  ;;  %v4628_v31 = vpop.f32.mrf.mxu0 }
 0xcf7   :  { %v4655_v40 = vadd.f32 %v4625_v13, %v4457_v21 }
 0xcfa   :  { %v4818_v11 = vpop.f32.mrf.mxu1 }
 0xcfb   :  { %v5453_v33 = vpop.eup %5452  ;;  %v4862_v48 = vadd.f32 %v4818_v11, %v4648_v60  ;;  %v4249_v11 = vadd.f32 %v8844_v51, %v8806_v41  ;;  %v4459_v41 = vadd.f32 %v4433_v61, %v4252_v44 }
 0xcfc   :  { %4894 = vst.msk [vmem:[%s8961_s16 + $0x8] sm:$0xff] %vm4892_vm0, %v5453_v33 }
 0xcfd   :  { %5454 = vtanh.f32 %v4862_v48  ;;  %v4458_v10 = vadd.f32 %v4430_v39, %v4249_v11  ;;  %v4631_v45 = vpop.f32.mrf.mxu0 }
 0xcff   :  { %v4656_v48 = vadd.f32 %v4628_v31, %v4458_v10 }
 0xd02   :  { %v4821_v62 = vpop.f32.mrf.mxu1 }
 0xd03   :  { %v5455_v4 = vpop.eup %5454  ;;  %v4863_v25 = vadd.f32 %v4821_v62, %v4649_v54  ;;  %v4436_v62 = vpop.f32.mrf.mxu2 }
 0xd04   :  { %4895 = vst.msk [vmem:[%s8961_s16 + $0x10] sm:$0xff] %vm4892_vm0, %v5455_v4  ;;  %v4657_v4 = vadd.f32 %v4631_v45, %v4459_v41  ;;  %v4460_v56 = vadd.f32 %v4436_v62, %v4255_v1 }
 0xd05   :  { %5456 = vtanh.f32 %v4863_v25  ;;  %v4634_v36 = vpop.f32.mrf.mxu0 }
 0xd0a   :  { %v4824_v5 = vpop.f32.mrf.mxu1 }
 0xd0b   :  { %v5457_v49 = vpop.eup %5456  ;;  %v4864_v34 = vadd.f32 %v4824_v5, %v4650_v27  ;;  %v4439_v30 = vpop.f32.mrf.mxu2  ;;  %v4658_v5 = vadd.f32 %v4634_v36, %v4460_v56 }
 0xd0c   :  { %4896 = vst.msk [vmem:[%s8961_s16 + $0x18] sm:$0xff] %vm4892_vm0, %v5457_v49 }
 0xd0d   :  { %5458 = vtanh.f32 %v4864_v34  ;;  %v4258_v34 = vadd.f32 %v8844_v51, %v8827_v55  ;;  %v4637_v47 = vpop.f32.mrf.mxu0 }
 0xd0f   :  { %v4461_v43 = vadd.f32 %v4439_v30, %v4258_v34 }
 0xd12   :  { %v4827_v57 = vpop.f32.mrf.mxu1 }
 0xd13   :  { %v5459_v52 = vpop.eup %5458  ;;  %v4865_v6 = vadd.f32 %v4827_v57, %v4651_v37  ;;  %v4442_v37 = vpop.f32.mrf.mxu2  ;;  %v4659_v57 = vadd.f32 %v4637_v47, %v4461_v43 }
 0xd14   :  { %4897 = vst.msk [vmem:[%s8961_s16 + $0x20] sm:$0xff] %vm4892_vm0, %v5459_v52 }
 0xd15   :  { %5460 = vtanh.f32 %v4865_v6  ;;  %v4261_v6 = vadd.f32 %v8844_v51, %v8834_v59  ;;  %v4640_v32 = vpop.f32.mrf.mxu0 }
 0xd17   :  { %v4462_v55 = vadd.f32 %v4442_v37, %v4261_v6 }
 0xd1a   :  { %v4830_v23 = vpop.f32.mrf.mxu1 }
 0xd1b   :  { %v5461_v3 = vpop.eup %5460  ;;  %v4866_v2 = vadd.f32 %v4830_v23, %v4652_v63  ;;  %v4660_v63 = vadd.f32 %v4640_v32, %v4462_v55  ;;  %v4445_v8 = vpop.f32.mrf.mxu2 }
 0xd1c   :  { %4898 = vst.msk [vmem:[%s8961_s16 + $0x28] sm:$0xff] %vm4892_vm0, %v5461_v3  ;;  %v4463_v59 = vadd.f32 %v4445_v8, %v4264_v38 }
 0xd1d   :  { %5462 = vtanh.f32 %v4866_v2  ;;  %v4643_v35 = vpop.f32.mrf.mxu0 }
 0xd1e   :  { %v4661_v58 = vadd.f32 %v4643_v35, %v4463_v59 }
 0xd22   :  { %v4833_v42 = vpop.f32.mrf.mxu1 }
 0xd23   :  { %v5463_v17 = vpop.eup %5462  ;;  %v4867_v28 = vadd.f32 %v4833_v42, %v4653_v46 }
 0xd24   :  { %4899 = vst.msk [vmem:[%s8961_s16 + $0x30] sm:$0xff] %vm4892_vm0, %v5463_v17 }
 0xd25   :  { %5464 = vtanh.f32 %v4867_v28 }
 0xd2a   :  { %v4836_v53 = vpop.f32.mrf.mxu1 }
 0xd2b   :  { %v5465_v16 = vpop.eup %5464  ;;  %v4868_v50 = vadd.f32 %v4836_v53, %v4654_v29 }
 0xd2c   :  { %4900 = vst.msk [vmem:[%s8961_s16 + $0x38] sm:$0xff] %vm4892_vm0, %v5465_v16 }
 0xd2d   :  { %5466 = vtanh.f32 %v4868_v50 }
 0xd32   :  { %v4839_v0 = vpop.f32.mrf.mxu1 }
 0xd33   :  { %v5467_v60 = vpop.eup %5466  ;;  %v4869_v33 = vadd.f32 %v4839_v0, %v4655_v40 }
 0xd34   :  { %4901 = vst.msk [vmem:[%s8961_s16 + $0x40] sm:$0xff] %vm4892_vm0, %v5467_v60 }
 0xd35   :  { %5468 = vtanh.f32 %v4869_v33 }
 0xd3a   :  { %v4842_v15 = vpop.f32.mrf.mxu1 }
 0xd3b   :  { %v5469_v12 = vpop.eup %5468  ;;  %v4870_v54 = vadd.f32 %v4842_v15, %v4656_v48 }
 0xd3c   :  { %4902 = vst.msk [vmem:[%s8961_s16 + $0x48] sm:$0xff] %vm4892_vm0, %v5469_v12 }
 0xd3d   :  { %5470 = vtanh.f32 %v4870_v54 }
 0xd42   :  { %v4845_v25 = vpop.f32.mrf.mxu1 }
 0xd43   :  { %v5471_v18 = vpop.eup %5470  ;;  %v4871_v27 = vadd.f32 %v4845_v25, %v4657_v4 }
 0xd44   :  { %4903 = vst.msk [vmem:[%s8961_s16 + $0x50] sm:$0xff] %vm4892_vm0, %v5471_v18 }
 0xd45   :  { %5472 = vtanh.f32 %v4871_v27 }
 0xd4a   :  { %v4848_v49 = vpop.f32.mrf.mxu1 }
 0xd4b   :  { %v5473_v19 = vpop.eup %5472  ;;  %v4872_v22 = vadd.f32 %v4848_v49, %v4658_v5 }
 0xd4c   :  { %4904 = vst.msk [vmem:[%s8961_s16 + $0x58] sm:$0xff] %vm4892_vm0, %v5473_v19 }
 0xd4d   :  { %5474 = vtanh.f32 %v4872_v22 }
 0xd52   :  { %v4851_v52 = vpop.f32.mrf.mxu1 }
 0xd53   :  { %v5475_v7 = vpop.eup %5474  ;;  %v4873_v9 = vadd.f32 %v4851_v52, %v4659_v57 }
 0xd54   :  { %4905 = vst.msk [vmem:[%s8961_s16 + $0x60] sm:$0xff] %vm4892_vm0, %v5475_v7 }
 0xd55   :  { %5476 = vtanh.f32 %v4873_v9 }
 0xd5a   :  { %v4854_v23 = vpop.f32.mrf.mxu1 }
 0xd5b   :  { %v5477_v3 = vpop.eup %5476  ;;  %v4874_v2 = vadd.f32 %v4854_v23, %v4660_v63 }
 0xd5c   :  { %4906 = vst.msk [vmem:[%s8961_s16 + $0x68] sm:$0xff] %vm4892_vm0, %v5477_v3 }
 0xd5d   :  { %5478 = vtanh.f32 %v4874_v2 }
 0xd62   :  { %v4857_v46 = vpop.f32.mrf.mxu1 }
 0xd63   :  { %v5479_v42 = vpop.eup %5478  ;;  %v4875_v17 = vadd.f32 %v4857_v46, %v4661_v58 }
 0xd64   :  { %4907 = vst.msk [vmem:[%s8961_s16 + $0x70] sm:$0xff] %vm4892_vm0, %v5479_v42 }
 0xd65   :  { %5480 = vtanh.f32 %v4875_v17 }
 0xd6b   :  { %v5481_v51 = vpop.eup %5480 }
 0xd6c   :  { %4908 = vst.msk [vmem:[%s8961_s16 + $0x78] sm:$0xff] %vm4892_vm0, %v5481_v51 }
 0xd6d   :  { %5508 = dma.done.wait [#allocation6], 16  }
 0xd6e   :  { %5509 = vsyncadd [#allocation6], 4294967280 }
 0xd6f   :  { %4932 = vsyncpa [#allocation6], 1 }
 0xd70   :  { %4933 = vsyncmov [#allocation3] }
 0xd73   :  { %s4934_s18 = vpop.sfrf %4933 }
 0xd74   :  { %p5419_p0 = scmp.ne.s32.totalorder %s4934_s18, 0 }
 0xd76   :  { %4938 = shalt.err (%p5419_p0)  }

</bundles_post_ra>
